<compile_context>
chip_gen: v7x
topology: tpu7x:2x2x1
jax: 0.10.0
libtpu: 0.0.40
codegen_flags: <defaults>
</compile_context>

<pallas_src>
import jax
import jax.numpy as jnp
from jax.experimental import pallas as pl
from jax.experimental.pallas import tpu as pltpu


# ----------------------------- kernel bodies ------------------------------ #

def _backbone(x, w10, b10, w11, b11, w1s, w20, b20, w21, b21, w2s):
    """Two fused ResnetBlockFC blocks. x/weights bf16, biases f32, f32 accum."""
    f32 = jnp.float32
    bf16 = jnp.bfloat16
    relu = lambda v: jnp.maximum(v, 0)

    # ResnetBlockFC(c_dim -> MID): y1 = shortcut(x) + fc_1(relu(fc_0(relu(x))))
    net = jnp.dot(relu(x), w10, preferred_element_type=f32) + b10
    dx = jnp.dot(relu(net).astype(bf16), w11, preferred_element_type=f32) + b11
    y1 = jnp.dot(x, w1s, preferred_element_type=f32) + dx

    # ResnetBlockFC(MID -> N)
    net2 = jnp.dot(relu(y1).astype(bf16), w20, preferred_element_type=f32) + b20
    dx2 = jnp.dot(relu(net2).astype(bf16), w21, preferred_element_type=f32) + b21
    y2 = jnp.dot(y1.astype(bf16), w2s, preferred_element_type=f32) + dx2
    return y2


def point_decoder_kernel_resident(
    x_ref,
    w10_ref, b10_ref, w11_ref, b11_ref, w1s_ref,
    w20_ref, b20_ref, w21_ref, b21_ref, w2s_ref,
    wout_ref, bout_ref,
    o_ref,
):
    """1-D batch grid; wout fully VMEM-resident (128 MiB parts)."""
    y2 = _backbone(x_ref[...],
                   w10_ref[...], b10_ref[...], w11_ref[...], b11_ref[...], w1s_ref[...],
                   w20_ref[...], b20_ref[...], w21_ref[...], b21_ref[...], w2s_ref[...])
    out = jnp.dot(y2.astype(jnp.bfloat16), wout_ref[...],
                  preferred_element_type=jnp.float32) + bout_ref[...]
    o_ref[...] = out.astype(o_ref.dtype)


def point_decoder_kernel_streamed(
    x_ref,
    w10_ref, b10_ref, w11_ref, b11_ref, w1s_ref,
    w20_ref, b20_ref, w21_ref, b21_ref, w2s_ref,
    wout_ref, bout_ref,
    o_ref,
    y2_ref,
):
    """2-D grid: batch tiles (outer, "parallel") x fc_out column tiles (inner).

    INVARIANT: the fc_out column axis (grid dim 1) must stay the innermost,
    sequentially iterated ("arbitrary") axis and the batch axis (grid dim 0) the
    outermost; the y2 scratch caches the backbone result across column tiles and
    would be read stale / clobbered if the iteration order changed.
    """
    @pl.when(pl.program_id(1) == 0)
    def _():
        y2 = _backbone(x_ref[...],
                       w10_ref[...], b10_ref[...], w11_ref[...], b11_ref[...], w1s_ref[...],
                       w20_ref[...], b20_ref[...], w21_ref[...], b21_ref[...], w2s_ref[...])
        y2_ref[...] = y2.astype(jnp.bfloat16)

    out = jnp.dot(y2_ref[...], wout_ref[...],
                  preferred_element_type=jnp.float32) + bout_ref[...]
    o_ref[...] = out.astype(o_ref.dtype)


# ------------------------------- wrapper ---------------------------------- #

def _vmem_capacity_bytes():
    """Generation-aware VMEM capacity; conservative 64 MiB (v7x) fallback."""
    try:
        info = pltpu.get_tpu_info()
        cap = int(getattr(info, "vmem_capacity_bytes", 0))
        if cap > 0:
            return cap
    except Exception:
        pass
    return 64 << 20


def _pick_col_tile(total, target=1536):
    """Largest multiple of 128 that divides `total` and is <= target (else full width)."""
    if total <= target or total % 128 != 0:
        return total
    best = 128
    t = 128
    while t <= target:
        if total % t == 0:
            best = t
        t += 128
    return best


_BUFFERED = getattr(pl, "Buffered", None)


def point_decoder(x, params, *, tm=None, tn=None):
    """x: (B, c_dim) float32. params: pre-transposed (in, out) weights. Returns (B, N, 3) f32."""
    (w10, b10, w11, b11, w1s,
     w20, b20, w21, b21, w2s,
     wout, bout) = params

    B, c_dim = x.shape
    n_points, out_dim = wout.shape           # (N, 3N)
    h1 = w10.shape[1]
    mid = w11.shape[1]
    h2 = w20.shape[1]

    bf16 = jnp.bfloat16
    # bf16 weights and bf16 streamed activations; f32 MXU accumulation in-kernel.
    w10, w11, w1s = w10.astype(bf16), w11.astype(bf16), w1s.astype(bf16)
    w20, w21, w2s = w20.astype(bf16), w21.astype(bf16), w2s.astype(bf16)
    wout = wout.astype(bf16)
    x_in = x.astype(bf16)

    # ---- batch row tile: large enough to feed the MXU / amortize wout streaming ----
    if tm is None:
        tm = 512
    tm = min(int(tm), 128 * pl.cdiv(B, 128))   # don't over-pad tiny batches
    tm = 128 * pl.cdiv(tm, 128)                # MXU-friendly multiple of 128
    b_pad = tm * pl.cdiv(B, tm)
    if b_pad != B:
        x_in = jnp.pad(x_in, ((0, b_pad - B), (0, 0)))

    nbytes = lambda a: a.size * a.dtype.itemsize
    backbone_w = (w10, b10, w11, b11, w1s, w20, b20, w21, b21, w2s)
    resident_bytes = sum(nbytes(a) for a in backbone_w)

    vmem_cap = _vmem_capacity_bytes()
    # Allowance for live f32 backbone intermediates + compiler internal scratch.
    slack = tm * (h1 + 2 * mid + h2 + 2 * n_points) * 4 + (8 << 20)

    budget_resident = (resident_bytes + nbytes(wout) + nbytes(bout)
                       + 2 * tm * c_dim * 2        # x tiles (bf16, double-buffered)
                       + 2 * tm * out_dim * 4)     # output tiles (f32, double-buffered)

    # Stream wout in column tiles only if it can't be fully VMEM-resident
    # (v7x 64 MiB at real sizes) or the caller forces a column tile.
    use_streamed = (tn is not None) or (budget_resident + slack > vmem_cap)

    if use_streamed:
        if tn is None:
            tn = _pick_col_tile(out_dim)
        assert out_dim % tn == 0 and (tn % 128 == 0 or tn == out_dim)
        budget = (resident_bytes
                  + 2 * n_points * tn * 2          # wout column tiles (bf16)
                  + 2 * tn * 4                     # bout tiles
                  + 2 * tm * c_dim * 2             # x tiles (bf16)
                  + 2 * tm * tn * 4                # output tiles (f32)
                  + tm * n_points * 2)             # y2 scratch (bf16)
        wout_passes = b_pad // tm                  # wout re-streamed once per batch tile
    else:
        tn = out_dim
        budget = budget_resident
        wout_passes = 1                            # wout read from HBM exactly once

    vmem_limit = int(min(vmem_cap, max(budget + slack, 16 << 20)))

    flops = 2 * b_pad * (c_dim * h1 + h1 * mid + c_dim * mid
                         + mid * h2 + h2 * n_points + mid * n_points
                         + n_points * out_dim)
    bytes_accessed = (nbytes(x_in) + resident_bytes
                      + wout_passes * (nbytes(wout) + nbytes(bout))
                      + b_pad * out_dim * 4)

    def run(single_buffer_weights):
        n_grid = 2 if use_streamed else 1

        def const_spec(shape):
            """Full-array block, constant index_map -> VMEM-resident across the grid."""
            if n_grid == 1:
                idx = lambda i: (0,) * len(shape)
            else:
                idx = lambda i, j: (0,) * len(shape)
            if single_buffer_weights and _BUFFERED is not None:
                # Index never changes -> one buffer suffices; halves resident VMEM.
                return pl.BlockSpec(shape, idx, pipeline_mode=_BUFFERED(1))
            return pl.BlockSpec(shape, idx)

        weight_specs = [const_spec(a.shape) for a in backbone_w]

        if use_streamed:
            grid = (b_pad // tm, out_dim // tn)
            in_specs = ([pl.BlockSpec((tm, c_dim), lambda i, j: (i, 0))]
                        + weight_specs
                        + [pl.BlockSpec((n_points, tn), lambda i, j: (0, j)),
                           pl.BlockSpec((1, tn), lambda i, j: (0, j))])
            out_spec = pl.BlockSpec((tm, tn), lambda i, j: (i, j))
            kernel = point_decoder_kernel_streamed
            scratch = [pltpu.VMEM((tm, n_points), jnp.bfloat16)]
            dim_sem = ("parallel", "arbitrary")
        else:
            grid = (b_pad // tm,)
            in_specs = ([pl.BlockSpec((tm, c_dim), lambda i: (i, 0))]
                        + weight_specs
                        + [const_spec(wout.shape), const_spec(bout.shape)])
            out_spec = pl.BlockSpec((tm, out_dim), lambda i: (i, 0))
            kernel = point_decoder_kernel_resident
            scratch = []
            dim_sem = ("parallel",)

        return pl.pallas_call(
            kernel,
            out_shape=jax.ShapeDtypeStruct((b_pad, out_dim), jnp.float32),
            grid=grid,
            in_specs=in_specs,
            out_specs=out_spec,
            scratch_shapes=scratch,
            compiler_params=pltpu.CompilerParams(
                dimension_semantics=dim_sem,
                vmem_limit_bytes=vmem_limit,
            ),
            cost_estimate=pl.CostEstimate(
                flops=int(flops), transcendentals=0,
                bytes_accessed=int(bytes_accessed)),
        )(x_in, w10, b10, w11, b11, w1s, w20, b20, w21, b21, w2s, wout, bout)

    try:
        flat = jax.block_until_ready(run(single_buffer_weights=True))
    except Exception:
        # Fallback if pipeline_mode=pl.Buffered(1) is unsupported by this jax build.
        flat = jax.block_until_ready(run(single_buffer_weights=False))

    # Drop padded batch rows; reshape(-1, N, 3) matches torch.reshape (row-major).
    return flat[:B].reshape(B, n_points, 3)


# ------------------------- params / reference ------------------------------ #

def init_params(key, c_dim, mid, n_points):
    """Synthetic init matching the PyTorch module's parameter shapes.

    All Linear weights are stored pre-transposed as (in_features, out_features).
    Block1: ResnetBlockFC(c_dim, mid),    size_h = min(c_dim, mid)
    Block2: ResnetBlockFC(mid, n_points), size_h = min(mid, n_points)
    fc_out: Linear(n_points, 3 * n_points)
    """
    h1 = min(c_dim, mid)
    h2 = min(mid, n_points)
    ks = jax.random.split(key, 12)

    def lin(k, fan_in, fan_out):
        scale = 1.0 / jnp.sqrt(jnp.float32(fan_in))
        return jax.random.uniform(k, (fan_in, fan_out), jnp.float32, -scale, scale)

    def bias(k, fan_in, fan_out):
        scale = 1.0 / jnp.sqrt(jnp.float32(fan_in))
        return jax.random.uniform(k, (1, fan_out), jnp.float32, -scale, scale)

    # NOTE: PyTorch's ResnetBlockFC zero-inits fc_1's weight; random values here so
    # the kernel exercises the full datapath (init values are not forward semantics).
    w10, b10 = lin(ks[0], c_dim, h1), bias(ks[1], c_dim, h1)
    w11, b11 = lin(ks[2], h1, mid), bias(ks[3], h1, mid)
    w1s = lin(ks[4], c_dim, mid)                 # shortcut, no bias (c_dim != mid)
    w20, b20 = lin(ks[5], mid, h2), bias(ks[6], mid, h2)
    w21, b21 = lin(ks[7], h2, n_points), bias(ks[8], h2, n_points)
    w2s = lin(ks[9], mid, n_points)              # shortcut, no bias (mid != n_points)
    wout, bout = lin(ks[10], n_points, 3 * n_points), bias(ks[11], n_points, 3 * n_points)
    return (w10, b10, w11, b11, w1s, w20, b20, w21, b21, w2s, wout, bout)


def _reference(x, params):
    """Pure-JAX reference with the same bf16-weight / f32-accumulate mixed precision."""
    (w10, b10, w11, b11, w1s, w20, b20, w21, b21, w2s, wout, bout) = params
    bf = jnp.bfloat16
    xb = x.astype(bf)
    mm = lambda a, w: jnp.dot(a.astype(bf), w.astype(bf),
                              preferred_element_type=jnp.float32)
    r = lambda v: jnp.maximum(v, 0)
    net = mm(r(xb), w10) + b10
    y1 = mm(xb, w1s) + (mm(r(net), w11) + b11)
    net2 = mm(r(y1), w20) + b20
    y2 = mm(y1, w2s) + (mm(r(net2), w21) + b21)
    out = mm(y2, wout) + bout
    return out.reshape(x.shape[0], wout.shape[0], 3)


if __name__ == "__main__":
    # Small stand-in shapes consistent with the module structure:
    #   c_dim=128 (for 1024), MID=256 (for the internal 1024),
    #   output_points_count=128 (for 2048), batch=2.
    B, C_DIM, MID, N_POINTS = 2, 128, 256, 128

    key = jax.random.PRNGKey(0)
    kx, kp = jax.random.split(key)
    x = jax.random.normal(kx, (B, C_DIM), jnp.float32)
    params = init_params(kp, C_DIM, MID, N_POINTS)

    ref = _reference(x, params)

    # Path 1: auto config — at these sizes wout is VMEM-resident (1-D batch grid).
    out_auto = jax.block_until_ready(point_decoder(x, params))
    # Path 2: forced fc_out column tiling — exercises the v7x structure
    # (2-D grid, pl.when backbone + y2 scratch reuse across column tiles).
    out_tiled = jax.block_until_ready(point_decoder(x, params, tm=128, tn=128))

    for out in (out_auto, out_tiled):
        assert out.shape == (B, N_POINTS, 3), out.shape
        err = float(jnp.max(jnp.abs(out - ref)))
        assert jnp.allclose(out, ref, atol=2e-2, rtol=2e-2), err

    # TODO(synk): optionally emit the flat output in bf16 and upcast outside to halve
    # the B x 3N writeback if downstream tolerance allows.
    print("KERNEL_OK")
</pallas_src>

<mosaic_0001>
module attributes {stable_mosaic.version = 11 : i64} {
  func.func @point_decoder_kernel_resident(%arg0: i32, %arg1: memref<128x128xbf16, #tpu.memory_space<vmem>>, %arg2: memref<128x128xbf16, #tpu.memory_space<vmem>>, %arg3: memref<1x128xf32, #tpu.memory_space<vmem>>, %arg4: memref<128x256xbf16, #tpu.memory_space<vmem>>, %arg5: memref<1x256xf32, #tpu.memory_space<vmem>>, %arg6: memref<128x256xbf16, #tpu.memory_space<vmem>>, %arg7: memref<256x128xbf16, #tpu.memory_space<vmem>>, %arg8: memref<1x128xf32, #tpu.memory_space<vmem>>, %arg9: memref<128x128xbf16, #tpu.memory_space<vmem>>, %arg10: memref<1x128xf32, #tpu.memory_space<vmem>>, %arg11: memref<256x128xbf16, #tpu.memory_space<vmem>>, %arg12: memref<128x384xbf16, #tpu.memory_space<vmem>>, %arg13: memref<1x384xf32, #tpu.memory_space<vmem>>, %arg14: memref<128x384xf32, #tpu.memory_space<vmem>>) attributes {dimension_semantics = [#tpu.dimension_semantics<parallel>], iteration_bounds = array<i64: 1>, scalar_prefetch = 0 : i64, scratch_operands = 0 : i64, tpu.core_type = #tpu.core_type<tc>, window_params = [{transform_indices = @transform_0, window_bounds = array<i64: 128, 128>}, {pipeline_mode = #tpu.pipeline_mode<synchronous>, transform_indices = @transform_1, window_bounds = array<i64: 128, 128>}, {pipeline_mode = #tpu.pipeline_mode<synchronous>, transform_indices = @transform_2, window_bounds = array<i64: 1, 128>}, {pipeline_mode = #tpu.pipeline_mode<synchronous>, transform_indices = @transform_3, window_bounds = array<i64: 128, 256>}, {pipeline_mode = #tpu.pipeline_mode<synchronous>, transform_indices = @transform_4, window_bounds = array<i64: 1, 256>}, {pipeline_mode = #tpu.pipeline_mode<synchronous>, transform_indices = @transform_5, window_bounds = array<i64: 128, 256>}, {pipeline_mode = #tpu.pipeline_mode<synchronous>, transform_indices = @transform_6, window_bounds = array<i64: 256, 128>}, {pipeline_mode = #tpu.pipeline_mode<synchronous>, transform_indices = @transform_7, window_bounds = array<i64: 1, 128>}, {pipeline_mode = #tpu.pipeline_mode<synchronous>, transform_indices = @transform_8, window_bounds = array<i64: 128, 128>}, {pipeline_mode = #tpu.pipeline_mode<synchronous>, transform_indices = @transform_9, window_bounds = array<i64: 1, 128>}, {pipeline_mode = #tpu.pipeline_mode<synchronous>, transform_indices = @transform_10, window_bounds = array<i64: 256, 128>}, {pipeline_mode = #tpu.pipeline_mode<synchronous>, transform_indices = @transform_11, window_bounds = array<i64: 128, 384>}, {pipeline_mode = #tpu.pipeline_mode<synchronous>, transform_indices = @transform_12, window_bounds = array<i64: 1, 384>}, {transform_indices = @transform_13, window_bounds = array<i64: 128, 384>}]} {
    %c0 = arith.constant 0 : index
    %c0_0 = arith.constant 0 : index
    %0 = vector.load %arg1[%c0, %c0_0] : memref<128x128xbf16, #tpu.memory_space<vmem>>, vector<128x128xbf16>
    %c0_1 = arith.constant 0 : index
    %c0_2 = arith.constant 0 : index
    %1 = vector.load %arg2[%c0_1, %c0_2] : memref<128x128xbf16, #tpu.memory_space<vmem>>, vector<128x128xbf16>
    %c0_3 = arith.constant 0 : index
    %c0_4 = arith.constant 0 : index
    %2 = vector.load %arg3[%c0_3, %c0_4] : memref<1x128xf32, #tpu.memory_space<vmem>>, vector<1x128xf32>
    %c0_5 = arith.constant 0 : index
    %c0_6 = arith.constant 0 : index
    %3 = vector.load %arg4[%c0_5, %c0_6] : memref<128x256xbf16, #tpu.memory_space<vmem>>, vector<128x256xbf16>
    %c0_7 = arith.constant 0 : index
    %c0_8 = arith.constant 0 : index
    %4 = vector.load %arg5[%c0_7, %c0_8] : memref<1x256xf32, #tpu.memory_space<vmem>>, vector<1x256xf32>
    %c0_9 = arith.constant 0 : index
    %c0_10 = arith.constant 0 : index
    %5 = vector.load %arg6[%c0_9, %c0_10] : memref<128x256xbf16, #tpu.memory_space<vmem>>, vector<128x256xbf16>
    %c0_11 = arith.constant 0 : index
    %c0_12 = arith.constant 0 : index
    %6 = vector.load %arg7[%c0_11, %c0_12] : memref<256x128xbf16, #tpu.memory_space<vmem>>, vector<256x128xbf16>
    %c0_13 = arith.constant 0 : index
    %c0_14 = arith.constant 0 : index
    %7 = vector.load %arg8[%c0_13, %c0_14] : memref<1x128xf32, #tpu.memory_space<vmem>>, vector<1x128xf32>
    %c0_15 = arith.constant 0 : index
    %c0_16 = arith.constant 0 : index
    %8 = vector.load %arg9[%c0_15, %c0_16] : memref<128x128xbf16, #tpu.memory_space<vmem>>, vector<128x128xbf16>
    %c0_17 = arith.constant 0 : index
    %c0_18 = arith.constant 0 : index
    %9 = vector.load %arg10[%c0_17, %c0_18] : memref<1x128xf32, #tpu.memory_space<vmem>>, vector<1x128xf32>
    %c0_19 = arith.constant 0 : index
    %c0_20 = arith.constant 0 : index
    %10 = vector.load %arg11[%c0_19, %c0_20] : memref<256x128xbf16, #tpu.memory_space<vmem>>, vector<256x128xbf16>
    %cst = arith.constant 0.000000e+00 : bf16
    %11 = vector.broadcast %cst : bf16 to vector<128x128xbf16>
    %12 = arith.maximumf %0, %11 : vector<128x128xbf16>
    %cst_21 = arith.constant dense<0.000000e+00> : vector<128x128xf32>
    %13 = tpu.matmul %12, %1, %cst_21 {dimension_numbers = #tpu.dot_dimension_numbers<[1], [0], [0], [1], [0, 0, 1, 1], [], []>} : vector<128x128xbf16>, vector<128x128xbf16>, vector<128x128xf32> -> vector<128x128xf32>
    %14 = vector.broadcast %2 : vector<1x128xf32> to vector<128x128xf32>
    %15 = arith.addf %13, %14 : vector<128x128xf32>
    %cst_22 = arith.constant 0.000000e+00 : f32
    %16 = vector.broadcast %cst_22 : f32 to vector<128x128xf32>
    %17 = arith.maximumf %15, %16 : vector<128x128xf32>
    %18 = arith.truncf %17 : vector<128x128xf32> to vector<128x128xbf16>
    %cst_23 = arith.constant dense<0.000000e+00> : vector<128x256xf32>
    %19 = tpu.matmul %18, %3, %cst_23 {dimension_numbers = #tpu.dot_dimension_numbers<[1], [0], [0], [1], [0, 0, 1, 1], [], []>} : vector<128x128xbf16>, vector<128x256xbf16>, vector<128x256xf32> -> vector<128x256xf32>
    %20 = vector.broadcast %4 : vector<1x256xf32> to vector<128x256xf32>
    %21 = arith.addf %19, %20 : vector<128x256xf32>
    %cst_24 = arith.constant dense<0.000000e+00> : vector<128x256xf32>
    %22 = tpu.matmul %0, %5, %cst_24 {dimension_numbers = #tpu.dot_dimension_numbers<[1], [0], [0], [1], [0, 0, 1, 1], [], []>} : vector<128x128xbf16>, vector<128x256xbf16>, vector<128x256xf32> -> vector<128x256xf32>
    %23 = arith.addf %22, %21 : vector<128x256xf32>
    %cst_25 = arith.constant 0.000000e+00 : f32
    %24 = vector.broadcast %cst_25 : f32 to vector<128x256xf32>
    %25 = arith.maximumf %23, %24 : vector<128x256xf32>
    %26 = arith.truncf %25 : vector<128x256xf32> to vector<128x256xbf16>
    %cst_26 = arith.constant dense<0.000000e+00> : vector<128x128xf32>
    %27 = tpu.matmul %26, %6, %cst_26 {dimension_numbers = #tpu.dot_dimension_numbers<[1], [0], [0], [1], [0, 0, 1, 1], [], []>} : vector<128x256xbf16>, vector<256x128xbf16>, vector<128x128xf32> -> vector<128x128xf32>
    %28 = vector.broadcast %7 : vector<1x128xf32> to vector<128x128xf32>
    %29 = arith.addf %27, %28 : vector<128x128xf32>
    %cst_27 = arith.constant 0.000000e+00 : f32
    %30 = vector.broadcast %cst_27 : f32 to vector<128x128xf32>
    %31 = arith.maximumf %29, %30 : vector<128x128xf32>
    %32 = arith.truncf %31 : vector<128x128xf32> to vector<128x128xbf16>
    %cst_28 = arith.constant dense<0.000000e+00> : vector<128x128xf32>
    %33 = tpu.matmul %32, %8, %cst_28 {dimension_numbers = #tpu.dot_dimension_numbers<[1], [0], [0], [1], [0, 0, 1, 1], [], []>} : vector<128x128xbf16>, vector<128x128xbf16>, vector<128x128xf32> -> vector<128x128xf32>
    %34 = vector.broadcast %9 : vector<1x128xf32> to vector<128x128xf32>
    %35 = arith.addf %33, %34 : vector<128x128xf32>
    %36 = arith.truncf %23 : vector<128x256xf32> to vector<128x256xbf16>
    %cst_29 = arith.constant dense<0.000000e+00> : vector<128x128xf32>
    %37 = tpu.matmul %36, %10, %cst_29 {dimension_numbers = #tpu.dot_dimension_numbers<[1], [0], [0], [1], [0, 0, 1, 1], [], []>} : vector<128x256xbf16>, vector<256x128xbf16>, vector<128x128xf32> -> vector<128x128xf32>
    %38 = arith.addf %37, %35 : vector<128x128xf32>
    %39 = arith.truncf %38 : vector<128x128xf32> to vector<128x128xbf16>
    %c0_30 = arith.constant 0 : index
    %c0_31 = arith.constant 0 : index
    %40 = vector.load %arg12[%c0_30, %c0_31] : memref<128x384xbf16, #tpu.memory_space<vmem>>, vector<128x384xbf16>
    %cst_32 = arith.constant dense<0.000000e+00> : vector<128x384xf32>
    %41 = tpu.matmul %39, %40, %cst_32 {dimension_numbers = #tpu.dot_dimension_numbers<[1], [0], [0], [1], [0, 0, 1, 1], [], []>} : vector<128x128xbf16>, vector<128x384xbf16>, vector<128x384xf32> -> vector<128x384xf32>
    %c0_33 = arith.constant 0 : index
    %c0_34 = arith.constant 0 : index
    %42 = vector.load %arg13[%c0_33, %c0_34] : memref<1x384xf32, #tpu.memory_space<vmem>>, vector<1x384xf32>
    %43 = vector.broadcast %42 : vector<1x384xf32> to vector<128x384xf32>
    %44 = arith.addf %41, %43 : vector<128x384xf32>
    %c0_35 = arith.constant 0 : index
    %c0_36 = arith.constant 0 : index
    %45 = vector.load %arg14[%c0_35, %c0_36] : memref<128x384xf32, #tpu.memory_space<vmem>>, vector<128x384xf32>
    tpu.vector_store %arg14[%c0_35, %c0_36], %44 {strides = array<i32>} : memref<128x384xf32, #tpu.memory_space<vmem>>, vector<128x384xf32>,
    return
  }
  func.func @transform_0(%arg0: i32) -> (i32, i32) {
    %c0_i32 = arith.constant 0 : i32
    %c0_i32_0 = arith.constant 0 : i32
    return %arg0, %c0_i32 : i32, i32
  }
  func.func @transform_1(%arg0: i32) -> (i32, i32) {
    %c0_i32 = arith.constant 0 : i32
    %c0_i32_0 = arith.constant 0 : i32
    %c0_i32_1 = arith.constant 0 : i32
    return %c0_i32, %c0_i32_0 : i32, i32
  }
  func.func @transform_2(%arg0: i32) -> (i32, i32) {
    %c0_i32 = arith.constant 0 : i32
    %c0_i32_0 = arith.constant 0 : i32
    %c0_i32_1 = arith.constant 0 : i32
    return %c0_i32, %c0_i32_0 : i32, i32
  }
  func.func @transform_3(%arg0: i32) -> (i32, i32) {
    %c0_i32 = arith.constant 0 : i32
    %c0_i32_0 = arith.constant 0 : i32
    %c0_i32_1 = arith.constant 0 : i32
    return %c0_i32, %c0_i32_0 : i32, i32
  }
  func.func @transform_4(%arg0: i32) -> (i32, i32) {
    %c0_i32 = arith.constant 0 : i32
    %c0_i32_0 = arith.constant 0 : i32
    %c0_i32_1 = arith.constant 0 : i32
    return %c0_i32, %c0_i32_0 : i32, i32
  }
  func.func @transform_5(%arg0: i32) -> (i32, i32) {
    %c0_i32 = arith.constant 0 : i32
    %c0_i32_0 = arith.constant 0 : i32
    %c0_i32_1 = arith.constant 0 : i32
    return %c0_i32, %c0_i32_0 : i32, i32
  }
  func.func @transform_6(%arg0: i32) -> (i32, i32) {
    %c0_i32 = arith.constant 0 : i32
    %c0_i32_0 = arith.constant 0 : i32
    %c0_i32_1 = arith.constant 0 : i32
    return %c0_i32, %c0_i32_0 : i32, i32
  }
  func.func @transform_7(%arg0: i32) -> (i32, i32) {
    %c0_i32 = arith.constant 0 : i32
    %c0_i32_0 = arith.constant 0 : i32
    %c0_i32_1 = arith.constant 0 : i32
    return %c0_i32, %c0_i32_0 : i32, i32
  }
  func.func @transform_8(%arg0: i32) -> (i32, i32) {
    %c0_i32 = arith.constant 0 : i32
    %c0_i32_0 = arith.constant 0 : i32
    %c0_i32_1 = arith.constant 0 : i32
    return %c0_i32, %c0_i32_0 : i32, i32
  }
  func.func @transform_9(%arg0: i32) -> (i32, i32) {
    %c0_i32 = arith.constant 0 : i32
    %c0_i32_0 = arith.constant 0 : i32
    %c0_i32_1 = arith.constant 0 : i32
    return %c0_i32, %c0_i32_0 : i32, i32
  }
  func.func @transform_10(%arg0: i32) -> (i32, i32) {
    %c0_i32 = arith.constant 0 : i32
    %c0_i32_0 = arith.constant 0 : i32
    %c0_i32_1 = arith.constant 0 : i32
    return %c0_i32, %c0_i32_0 : i32, i32
  }
  func.func @transform_11(%arg0: i32) -> (i32, i32) {
    %c0_i32 = arith.constant 0 : i32
    %c0_i32_0 = arith.constant 0 : i32
    %c0_i32_1 = arith.constant 0 : i32
    return %c0_i32, %c0_i32_0 : i32, i32
  }
  func.func @transform_12(%arg0: i32) -> (i32, i32) {
    %c0_i32 = arith.constant 0 : i32
    %c0_i32_0 = arith.constant 0 : i32
    %c0_i32_1 = arith.constant 0 : i32
    return %c0_i32, %c0_i32_0 : i32, i32
  }
  func.func @transform_13(%arg0: i32) -> (i32, i32) {
    %c0_i32 = arith.constant 0 : i32
    %c0_i32_0 = arith.constant 0 : i32
    return %arg0, %c0_i32 : i32, i32
  }
}

module attributes {stable_mosaic.version = 11 : i64} {
  func.func @point_decoder_kernel_resident(%arg0: i32, %arg1: memref<128x128xbf16, #tpu.memory_space<vmem>>, %arg2: memref<128x128xbf16, #tpu.memory_space<vmem>>, %arg3: memref<1x128xf32, #tpu.memory_space<vmem>>, %arg4: memref<128x256xbf16, #tpu.memory_space<vmem>>, %arg5: memref<1x256xf32, #tpu.memory_space<vmem>>, %arg6: memref<128x256xbf16, #tpu.memory_space<vmem>>, %arg7: memref<256x128xbf16, #tpu.memory_space<vmem>>, %arg8: memref<1x128xf32, #tpu.memory_space<vmem>>, %arg9: memref<128x128xbf16, #tpu.memory_space<vmem>>, %arg10: memref<1x128xf32, #tpu.memory_space<vmem>>, %arg11: memref<256x128xbf16, #tpu.memory_space<vmem>>, %arg12: memref<128x384xbf16, #tpu.memory_space<vmem>>, %arg13: memref<1x384xf32, #tpu.memory_space<vmem>>, %arg14: memref<128x384xf32, #tpu.memory_space<vmem>>) attributes {dimension_semantics = [#tpu.dimension_semantics<parallel>], iteration_bounds = array<i64: 1>, scalar_prefetch = 0 : i64, scratch_operands = 0 : i64, tpu.core_type = #tpu.core_type<tc>, window_params = [{transform_indices = @transform_0, window_bounds = array<i64: 128, 128>}, {pipeline_mode = #tpu.pipeline_mode<synchronous>, transform_indices = @transform_1, window_bounds = array<i64: 128, 128>}, {pipeline_mode = #tpu.pipeline_mode<synchronous>, transform_indices = @transform_2, window_bounds = array<i64: 1, 128>}, {pipeline_mode = #tpu.pipeline_mode<synchronous>, transform_indices = @transform_3, window_bounds = array<i64: 128, 256>}, {pipeline_mode = #tpu.pipeline_mode<synchronous>, transform_indices = @transform_4, window_bounds = array<i64: 1, 256>}, {pipeline_mode = #tpu.pipeline_mode<synchronous>, transform_indices = @transform_5, window_bounds = array<i64: 128, 256>}, {pipeline_mode = #tpu.pipeline_mode<synchronous>, transform_indices = @transform_6, window_bounds = array<i64: 256, 128>}, {pipeline_mode = #tpu.pipeline_mode<synchronous>, transform_indices = @transform_7, window_bounds = array<i64: 1, 128>}, {pipeline_mode = #tpu.pipeline_mode<synchronous>, transform_indices = @transform_8, window_bounds = array<i64: 128, 128>}, {pipeline_mode = #tpu.pipeline_mode<synchronous>, transform_indices = @transform_9, window_bounds = array<i64: 1, 128>}, {pipeline_mode = #tpu.pipeline_mode<synchronous>, transform_indices = @transform_10, window_bounds = array<i64: 256, 128>}, {pipeline_mode = #tpu.pipeline_mode<synchronous>, transform_indices = @transform_11, window_bounds = array<i64: 128, 384>}, {pipeline_mode = #tpu.pipeline_mode<synchronous>, transform_indices = @transform_12, window_bounds = array<i64: 1, 384>}, {transform_indices = @transform_13, window_bounds = array<i64: 128, 384>}]} {
    %c0 = arith.constant 0 : index
    %c0_0 = arith.constant 0 : index
    %0 = vector.load %arg1[%c0, %c0_0] : memref<128x128xbf16, #tpu.memory_space<vmem>>, vector<128x128xbf16>
    %c0_1 = arith.constant 0 : index
    %c0_2 = arith.constant 0 : index
    %1 = vector.load %arg2[%c0_1, %c0_2] : memref<128x128xbf16, #tpu.memory_space<vmem>>, vector<128x128xbf16>
    %c0_3 = arith.constant 0 : index
    %c0_4 = arith.constant 0 : index
    %2 = vector.load %arg3[%c0_3, %c0_4] : memref<1x128xf32, #tpu.memory_space<vmem>>, vector<1x128xf32>
    %c0_5 = arith.constant 0 : index
    %c0_6 = arith.constant 0 : index
    %3 = vector.load %arg4[%c0_5, %c0_6] : memref<128x256xbf16, #tpu.memory_space<vmem>>, vector<128x256xbf16>
    %c0_7 = arith.constant 0 : index
    %c0_8 = arith.constant 0 : index
    %4 = vector.load %arg5[%c0_7, %c0_8] : memref<1x256xf32, #tpu.memory_space<vmem>>, vector<1x256xf32>
    %c0_9 = arith.constant 0 : index
    %c0_10 = arith.constant 0 : index
    %5 = vector.load %arg6[%c0_9, %c0_10] : memref<128x256xbf16, #tpu.memory_space<vmem>>, vector<128x256xbf16>
    %c0_11 = arith.constant 0 : index
    %c0_12 = arith.constant 0 : index
    %6 = vector.load %arg7[%c0_11, %c0_12] : memref<256x128xbf16, #tpu.memory_space<vmem>>, vector<256x128xbf16>
    %c0_13 = arith.constant 0 : index
    %c0_14 = arith.constant 0 : index
    %7 = vector.load %arg8[%c0_13, %c0_14] : memref<1x128xf32, #tpu.memory_space<vmem>>, vector<1x128xf32>
    %c0_15 = arith.constant 0 : index
    %c0_16 = arith.constant 0 : index
    %8 = vector.load %arg9[%c0_15, %c0_16] : memref<128x128xbf16, #tpu.memory_space<vmem>>, vector<128x128xbf16>
    %c0_17 = arith.constant 0 : index
    %c0_18 = arith.constant 0 : index
    %9 = vector.load %arg10[%c0_17, %c0_18] : memref<1x128xf32, #tpu.memory_space<vmem>>, vector<1x128xf32>
    %c0_19 = arith.constant 0 : index
    %c0_20 = arith.constant 0 : index
    %10 = vector.load %arg11[%c0_19, %c0_20] : memref<256x128xbf16, #tpu.memory_space<vmem>>, vector<256x128xbf16>
    %cst = arith.constant 0.000000e+00 : bf16
    %11 = vector.broadcast %cst : bf16 to vector<128x128xbf16>
    %12 = arith.maximumf %0, %11 : vector<128x128xbf16>
    %cst_21 = arith.constant dense<0.000000e+00> : vector<128x128xf32>
    %13 = tpu.matmul %12, %1, %cst_21 {dimension_numbers = #tpu.dot_dimension_numbers<[1], [0], [0], [1], [0, 0, 1, 1], [], []>} : vector<128x128xbf16>, vector<128x128xbf16>, vector<128x128xf32> -> vector<128x128xf32>
    %14 = vector.broadcast %2 : vector<1x128xf32> to vector<128x128xf32>
    %15 = arith.addf %13, %14 : vector<128x128xf32>
    %cst_22 = arith.constant 0.000000e+00 : f32
    %16 = vector.broadcast %cst_22 : f32 to vector<128x128xf32>
    %17 = arith.maximumf %15, %16 : vector<128x128xf32>
    %18 = arith.truncf %17 : vector<128x128xf32> to vector<128x128xbf16>
    %cst_23 = arith.constant dense<0.000000e+00> : vector<128x256xf32>
    %19 = tpu.matmul %18, %3, %cst_23 {dimension_numbers = #tpu.dot_dimension_numbers<[1], [0], [0], [1], [0, 0, 1, 1], [], []>} : vector<128x128xbf16>, vector<128x256xbf16>, vector<128x256xf32> -> vector<128x256xf32>
    %20 = vector.broadcast %4 : vector<1x256xf32> to vector<128x256xf32>
    %21 = arith.addf %19, %20 : vector<128x256xf32>
    %cst_24 = arith.constant dense<0.000000e+00> : vector<128x256xf32>
    %22 = tpu.matmul %0, %5, %cst_24 {dimension_numbers = #tpu.dot_dimension_numbers<[1], [0], [0], [1], [0, 0, 1, 1], [], []>} : vector<128x128xbf16>, vector<128x256xbf16>, vector<128x256xf32> -> vector<128x256xf32>
    %23 = arith.addf %22, %21 : vector<128x256xf32>
    %cst_25 = arith.constant 0.000000e+00 : f32
    %24 = vector.broadcast %cst_25 : f32 to vector<128x256xf32>
    %25 = arith.maximumf %23, %24 : vector<128x256xf32>
    %26 = arith.truncf %25 : vector<128x256xf32> to vector<128x256xbf16>
    %cst_26 = arith.constant dense<0.000000e+00> : vector<128x128xf32>
    %27 = tpu.matmul %26, %6, %cst_26 {dimension_numbers = #tpu.dot_dimension_numbers<[1], [0], [0], [1], [0, 0, 1, 1], [], []>} : vector<128x256xbf16>, vector<256x128xbf16>, vector<128x128xf32> -> vector<128x128xf32>
    %28 = vector.broadcast %7 : vector<1x128xf32> to vector<128x128xf32>
    %29 = arith.addf %27, %28 : vector<128x128xf32>
    %cst_27 = arith.constant 0.000000e+00 : f32
    %30 = vector.broadcast %cst_27 : f32 to vector<128x128xf32>
    %31 = arith.maximumf %29, %30 : vector<128x128xf32>
    %32 = arith.truncf %31 : vector<128x128xf32> to vector<128x128xbf16>
    %cst_28 = arith.constant dense<0.000000e+00> : vector<128x128xf32>
    %33 = tpu.matmul %32, %8, %cst_28 {dimension_numbers = #tpu.dot_dimension_numbers<[1], [0], [0], [1], [0, 0, 1, 1], [], []>} : vector<128x128xbf16>, vector<128x128xbf16>, vector<128x128xf32> -> vector<128x128xf32>
    %34 = vector.broadcast %9 : vector<1x128xf32> to vector<128x128xf32>
    %35 = arith.addf %33, %34 : vector<128x128xf32>
    %36 = arith.truncf %23 : vector<128x256xf32> to vector<128x256xbf16>
    %cst_29 = arith.constant dense<0.000000e+00> : vector<128x128xf32>
    %37 = tpu.matmul %36, %10, %cst_29 {dimension_numbers = #tpu.dot_dimension_numbers<[1], [0], [0], [1], [0, 0, 1, 1], [], []>} : vector<128x256xbf16>, vector<256x128xbf16>, vector<128x128xf32> -> vector<128x128xf32>
    %38 = arith.addf %37, %35 : vector<128x128xf32>
    %39 = arith.truncf %38 : vector<128x128xf32> to vector<128x128xbf16>
    %c0_30 = arith.constant 0 : index
    %c0_31 = arith.constant 0 : index
    %40 = vector.load %arg12[%c0_30, %c0_31] : memref<128x384xbf16, #tpu.memory_space<vmem>>, vector<128x384xbf16>
    %cst_32 = arith.constant dense<0.000000e+00> : vector<128x384xf32>
    %41 = tpu.matmul %39, %40, %cst_32 {dimension_numbers = #tpu.dot_dimension_numbers<[1], [0], [0], [1], [0, 0, 1, 1], [], []>} : vector<128x128xbf16>, vector<128x384xbf16>, vector<128x384xf32> -> vector<128x384xf32>
    %c0_33 = arith.constant 0 : index
    %c0_34 = arith.constant 0 : index
    %42 = vector.load %arg13[%c0_33, %c0_34] : memref<1x384xf32, #tpu.memory_space<vmem>>, vector<1x384xf32>
    %43 = vector.broadcast %42 : vector<1x384xf32> to vector<128x384xf32>
    %44 = arith.addf %41, %43 : vector<128x384xf32>
    %c0_35 = arith.constant 0 : index
    %c0_36 = arith.constant 0 : index
    %45 = vector.load %arg14[%c0_35, %c0_36] : memref<128x384xf32, #tpu.memory_space<vmem>>, vector<128x384xf32>
    tpu.vector_store %arg14[%c0_35, %c0_36], %44 {strides = array<i32>} : memref<128x384xf32, #tpu.memory_space<vmem>>, vector<128x384xf32>,
    return
  }
  func.func @transform_0(%arg0: i32) -> (i32, i32) {
    %c0_i32 = arith.constant 0 : i32
    %c0_i32_0 = arith.constant 0 : i32
    return %arg0, %c0_i32 : i32, i32
  }
  func.func @transform_1(%arg0: i32) -> (i32, i32) {
    %c0_i32 = arith.constant 0 : i32
    %c0_i32_0 = arith.constant 0 : i32
    %c0_i32_1 = arith.constant 0 : i32
    return %c0_i32, %c0_i32_0 : i32, i32
  }
  func.func @transform_2(%arg0: i32) -> (i32, i32) {
    %c0_i32 = arith.constant 0 : i32
    %c0_i32_0 = arith.constant 0 : i32
    %c0_i32_1 = arith.constant 0 : i32
    return %c0_i32, %c0_i32_0 : i32, i32
  }
  func.func @transform_3(%arg0: i32) -> (i32, i32) {
    %c0_i32 = arith.constant 0 : i32
    %c0_i32_0 = arith.constant 0 : i32
    %c0_i32_1 = arith.constant 0 : i32
    return %c0_i32, %c0_i32_0 : i32, i32
  }
  func.func @transform_4(%arg0: i32) -> (i32, i32) {
    %c0_i32 = arith.constant 0 : i32
    %c0_i32_0 = arith.constant 0 : i32
    %c0_i32_1 = arith.constant 0 : i32
    return %c0_i32, %c0_i32_0 : i32, i32
  }
  func.func @transform_5(%arg0: i32) -> (i32, i32) {
    %c0_i32 = arith.constant 0 : i32
    %c0_i32_0 = arith.constant 0 : i32
    %c0_i32_1 = arith.constant 0 : i32
    return %c0_i32, %c0_i32_0 : i32, i32
  }
  func.func @transform_6(%arg0: i32) -> (i32, i32) {
    %c0_i32 = arith.constant 0 : i32
    %c0_i32_0 = arith.constant 0 : i32
    %c0_i32_1 = arith.constant 0 : i32
    return %c0_i32, %c0_i32_0 : i32, i32
  }
  func.func @transform_7(%arg0: i32) -> (i32, i32) {
    %c0_i32 = arith.constant 0 : i32
    %c0_i32_0 = arith.constant 0 : i32
    %c0_i32_1 = arith.constant 0 : i32
    return %c0_i32, %c0_i32_0 : i32, i32
  }
  func.func @transform_8(%arg0: i32) -> (i32, i32) {
    %c0_i32 = arith.constant 0 : i32
    %c0_i32_0 = arith.constant 0 : i32
    %c0_i32_1 = arith.constant 0 : i32
    return %c0_i32, %c0_i32_0 : i32, i32
  }
  func.func @transform_9(%arg0: i32) -> (i32, i32) {
    %c0_i32 = arith.constant 0 : i32
    %c0_i32_0 = arith.constant 0 : i32
    %c0_i32_1 = arith.constant 0 : i32
    return %c0_i32, %c0_i32_0 : i32, i32
  }
  func.func @transform_10(%arg0: i32) -> (i32, i32) {
    %c0_i32 = arith.constant 0 : i32
    %c0_i32_0 = arith.constant 0 : i32
    %c0_i32_1 = arith.constant 0 : i32
    return %c0_i32, %c0_i32_0 : i32, i32
  }
  func.func @transform_11(%arg0: i32) -> (i32, i32) {
    %c0_i32 = arith.constant 0 : i32
    %c0_i32_0 = arith.constant 0 : i32
    %c0_i32_1 = arith.constant 0 : i32
    return %c0_i32, %c0_i32_0 : i32, i32
  }
  func.func @transform_12(%arg0: i32) -> (i32, i32) {
    %c0_i32 = arith.constant 0 : i32
    %c0_i32_0 = arith.constant 0 : i32
    %c0_i32_1 = arith.constant 0 : i32
    return %c0_i32, %c0_i32_0 : i32, i32
  }
  func.func @transform_13(%arg0: i32) -> (i32, i32) {
    %c0_i32 = arith.constant 0 : i32
    %c0_i32_0 = arith.constant 0 : i32
    return %arg0, %c0_i32 : i32, i32
  }
}

</mosaic_0001>

<bundles_post_ra>
// kernel: tpu_custom_call.1
= control target key start
LH: loop header
LB: loop body
LE: loop exit
PB: predicated region body
PF: predicated region fallthrough
CT: control target
= control target key end

     0   :  { %18 = vsyncpa [#allocation3], 0  ;;  %s3668_s0 = inlined_call_operand.hbm [shape: bf16[128,128], index: 0, kind: input, shape index: {}]   ;;  %s3669_s1 = inlined_call_operand.hbm [shape: bf16[128,128], index: 1, kind: input, shape index: {}]   ;;  %s3670_s2 = inlined_call_operand.vmem [shape: f32[1,128], index: 2, kind: input, shape index: {}]   ;;  %s3671_s3 = inlined_call_operand.hbm [shape: bf16[128,256], index: 3, kind: input, shape index: {}]   ;;  %s3672_s4 = inlined_call_operand.vmem [shape: f32[1,256], index: 4, kind: input, shape index: {}]   ;;  %s3673_s5 = inlined_call_operand.hbm [shape: bf16[128,256], index: 5, kind: input, shape index: {}]   ;;  %s3674_s6 = inlined_call_operand.hbm [shape: bf16[256,128], index: 6, kind: input, shape index: {}]   ;;  %s3675_s7 = inlined_call_operand.vmem [shape: f32[1,128], index: 7, kind: input, shape index: {}]   ;;  %s3676_s8 = inlined_call_operand.hbm [shape: bf16[128,128], index: 8, kind: input, shape index: {}]   ;;  %s3677_s9 = inlined_call_operand.vmem [shape: f32[1,128], index: 9, kind: input, shape index: {}]   ;;  %s3678_s10 = inlined_call_operand.hbm [shape: bf16[256,128], index: 10, kind: input, shape index: {}]   ;;  %s3679_s11 = inlined_call_operand.hbm [shape: bf16[128,384], index: 11, kind: input, shape index: {}]   ;;  %s3680_s12 = inlined_call_operand.vmem [shape: f32[1,384], index: 12, kind: input, shape index: {}]   ;;  %s3681_s13 = inlined_call_operand.hbm [shape: f32[128,384], index: 13, kind: output, shape index: {}]  }
   0x1   :  { %19 = vsyncpa [#allocation6], 0 }
   0x2   :  { %20 = vsyncpa [#allocation9], 0 }
   0x3   :  { %21 = vsyncpa [#allocation12], 0 }
   0x4   :  { %22 = vsyncpa [#allocation15], 0 }
   0x5   :  { %23 = vsyncpa [#allocation4], 0  ;;  %s2921_s25 = smov [#allocation5]   ;;  %s2711_s29 = scalar_lea.hbm %s3669_s1, 1024 }
   0x6   :  { %s41_s26 = sshll.u32 %s2921_s25, 4  ;;  %p2712_p0 = scmp.ne.s32.totalorder %s3669_s1, %s2711_s29  ;;  %s42_s26 = int_to_ptr.vmem [resolvable:$true] %s41_s26 }
   0x7   :  { %p2715_p1 = scmp.lt.u32.totalorder %s2711_s29, %s3669_s1 }
   0x9   :  { %p2717_p2 = pnand %p2715_p1, %p2712_p0 }
   0xb   :  { %2720 = shalt.err (!%p2717_p2)
}
   0xc   :  { %s2721_s17 = scalar_lea.vmem %s42_s26, 1024  ;;  %p2726_p4 = scmp.lt.s32.totalorder %s42_s26, %s42_s26 }
   0xd   :  { %p2722_p3 = scmp.ne.s32.totalorder %s42_s26, %s2721_s17  ;;  %p2727_p5 = scmp.lt.s32.totalorder %s2721_s17, %s2721_s17 }
   0xf   :  { %p2728_p6 = por %p2727_p5, %p2726_p4 }
  0x11   :  { %p2729_p7 = pnand %p2728_p6, %p2722_p3 }
  0x13   :  { %2732 = shalt.err (!%p2729_p7)
}
  0x14   :  { %s2922_s18 = smov 64   ;;  %s2923_s19 = smov 4  }
  0x15   :  { %47 = dma.hbm_to_vmem [thread:$0]  %s3669_s1, 1024, %s42_s26, [#allocation6], %s2922_s18, %s2922_s18, %s2923_s19  }
  0x16   :  { %s2924_s22 = smov [#allocation8]   ;;  %s2925_s24 = smov [#allocation11]  }
  0x17   :  { %s69_s23 = sshll.u32 %s2924_s22, 4  ;;  %s95_s25 = sshll.u32 %s2925_s24, 4  ;;  %s70_s23 = int_to_ptr.vmem [resolvable:$true] %s69_s23  ;;  %s96_s25 = int_to_ptr.vmem [resolvable:$true] %s95_s25 }
  0x18   :  { %s2733_s29 = scalar_lea.hbm %s3673_s5, 2048 }
  0x19   :  { %p2734_p8 = scmp.ne.s32.totalorder %s3673_s5, %s2733_s29  ;;  %p2737_p9 = scmp.lt.u32.totalorder %s2733_s29, %s3673_s5 }
  0x1b   :  { %p2739_p10 = pnand %p2737_p9, %p2734_p8 }
  0x1d   :  { %2742 = shalt.err (!%p2739_p10)
}
  0x1e   :  { %s2743_s1 = scalar_lea.vmem %s70_s23, 2048  ;;  %p2748_p12 = scmp.lt.s32.totalorder %s70_s23, %s70_s23 }
  0x1f   :  { %p2744_p11 = scmp.ne.s32.totalorder %s70_s23, %s2743_s1  ;;  %p2749_p13 = scmp.lt.s32.totalorder %s2743_s1, %s2743_s1 }
  0x21   :  { %p2750_p0 = por %p2749_p13, %p2748_p12 }
  0x23   :  { %p2751_p1 = pnand %p2750_p0, %p2744_p11 }
  0x25   :  { %2754 = shalt.err (!%p2751_p1)
}
  0x26   :  { %s2926_s26 = smov 128   ;;  %s2927_s17 = smov 8  }
  0x27   :  { %75 = dma.hbm_to_vmem [thread:$0]  %s3673_s5, 2048, %s70_s23, [#allocation9], %s2926_s26, %s2926_s26, %s2927_s17  }
  0x28   :  { %s2755_s27 = scalar_lea.hbm %s3676_s8, 1024 }
  0x29   :  { %p2756_p2 = scmp.ne.s32.totalorder %s3676_s8, %s2755_s27  ;;  %p2759_p3 = scmp.lt.u32.totalorder %s2755_s27, %s3676_s8 }
  0x2b   :  { %p2761_p4 = pnand %p2759_p3, %p2756_p2 }
  0x2d   :  { %2764 = shalt.err (!%p2761_p4)
}
  0x2e   :  { %s2765_s15 = scalar_lea.vmem %s96_s25, 1024  ;;  %p2770_p6 = scmp.lt.s32.totalorder %s96_s25, %s96_s25 }
  0x2f   :  { %p2766_p5 = scmp.ne.s32.totalorder %s96_s25, %s2765_s15  ;;  %p2771_p7 = scmp.lt.s32.totalorder %s2765_s15, %s2765_s15 }
  0x31   :  { %p2772_p8 = por %p2771_p7, %p2770_p6 }
  0x33   :  { %p2773_p9 = pnand %p2772_p8, %p2766_p5 }
  0x35   :  { %2776 = shalt.err (!%p2773_p9)
}
  0x36   :  { %101 = dma.hbm_to_vmem [thread:$0]  %s3676_s8, 1024, %s96_s25, [#allocation12], %s2922_s18, %s2922_s18, %s2923_s19  }
  0x37   :  { %s2928_s16 = smov [#allocation2]   ;;  %s2929_s20 = smov [#allocation7]  }
  0x38   :  { %s29_s1 = sshll.u32 %s2928_s16, 4  ;;  %s55_s21 = sshll.u32 %s2929_s20, 4  ;;  %s30_s1 = int_to_ptr.vmem [resolvable:$true] %s29_s1  ;;  %s56_s21 = int_to_ptr.vmem [resolvable:$true] %s55_s21 }
  0x39   :  { %s2777_s27 = scalar_lea.hbm %s3668_s0, 1024 }
  0x3a   :  { %p2778_p10 = scmp.ne.s32.totalorder %s3668_s0, %s2777_s27  ;;  %p2781_p11 = scmp.lt.u32.totalorder %s2777_s27, %s3668_s0 }
  0x3c   :  { %p2783_p12 = pnand %p2781_p11, %p2778_p10 }
  0x3e   :  { %2786 = shalt.err (!%p2783_p12)
}
  0x3f   :  { %s2787_s8 = scalar_lea.vmem %s30_s1, 1024  ;;  %p2792_p0 = scmp.lt.s32.totalorder %s30_s1, %s30_s1 }
  0x40   :  { %p2788_p13 = scmp.ne.s32.totalorder %s30_s1, %s2787_s8  ;;  %p2793_p1 = scmp.lt.s32.totalorder %s2787_s8, %s2787_s8 }
  0x42   :  { %p2794_p2 = por %p2793_p1, %p2792_p0 }
  0x44   :  { %p2795_p3 = pnand %p2794_p2, %p2788_p13 }
  0x46   :  { %2798 = shalt.err (!%p2795_p3)
}
  0x47   :  { %35 = dma.hbm_to_vmem [thread:$0]  %s3668_s0, 1024, %s30_s1, [#allocation3], %s2922_s18, %s2922_s18, %s2923_s19  }
  0x48   :  { %s2799_s16 = scalar_lea.hbm %s3671_s3, 2048 }
  0x49   :  { %p2800_p4 = scmp.ne.s32.totalorder %s3671_s3, %s2799_s16  ;;  %p2803_p5 = scmp.lt.u32.totalorder %s2799_s16, %s3671_s3 }
  0x4b   :  { %p2805_p6 = pnand %p2803_p5, %p2800_p4 }
  0x4d   :  { %2808 = shalt.err (!%p2805_p6)
}
  0x4e   :  { %s2809_s28 = scalar_lea.vmem %s56_s21, 2048  ;;  %p2814_p8 = scmp.lt.s32.totalorder %s56_s21, %s56_s21 }
  0x4f   :  { %p2810_p7 = scmp.ne.s32.totalorder %s56_s21, %s2809_s28  ;;  %p2815_p9 = scmp.lt.s32.totalorder %s2809_s28, %s2809_s28 }
  0x51   :  { %p2816_p10 = por %p2815_p9, %p2814_p8 }
  0x53   :  { %p2817_p11 = pnand %p2816_p10, %p2810_p7 }
  0x55   :  { %2820 = shalt.err (!%p2817_p11)
}
  0x56   :  { %61 = dma.hbm_to_vmem [thread:$0]  %s3671_s3, 2048, %s56_s21, [#allocation6], %s2926_s26, %s2926_s26, %s2927_s17  }
  0x57   :  { %s2930_s29 = smov [#allocation10]   ;;  %s2931_s14 = smov [#allocation13]  }
  0x58   :  { %s81_s30 = sshll.u32 %s2930_s29, 4  ;;  %s109_s8 = sshll.u32 %s2931_s14, 4  ;;  %s82_s30 = int_to_ptr.vmem [resolvable:$true] %s81_s30  ;;  %s110_s8 = int_to_ptr.vmem [resolvable:$true] %s109_s8 }
  0x59   :  { %s2821_s5 = scalar_lea.hbm %s3674_s6, 2048 }
  0x5a   :  { %p2822_p12 = scmp.ne.s32.totalorder %s3674_s6, %s2821_s5  ;;  %p2825_p13 = scmp.lt.u32.totalorder %s2821_s5, %s3674_s6 }
  0x5c   :  { %p2827_p0 = pnand %p2825_p13, %p2822_p12 }
  0x5e   :  { %2830 = shalt.err (!%p2827_p0)
}
  0x5f   :  { %s2831_s3 = scalar_lea.vmem %s82_s30, 2048  ;;  %p2836_p2 = scmp.lt.s32.totalorder %s82_s30, %s82_s30 }
  0x60   :  { %p2832_p1 = scmp.ne.s32.totalorder %s82_s30, %s2831_s3  ;;  %p2837_p3 = scmp.lt.s32.totalorder %s2831_s3, %s2831_s3 }
  0x62   :  { %p2838_p4 = por %p2837_p3, %p2836_p2 }
  0x64   :  { %p2839_p5 = pnand %p2838_p4, %p2832_p1 }
  0x66   :  { %2842 = shalt.err (!%p2839_p5)
}
  0x67   :  { %87 = dma.hbm_to_vmem [thread:$0]  %s3674_s6, 2048, %s82_s30, [#allocation9], %s2922_s18, %s2922_s18, %s2923_s19  }
  0x68   :  { %s2843_s27 = scalar_lea.hbm %s3678_s10, 2048 }
  0x69   :  { %p2844_p6 = scmp.ne.s32.totalorder %s3678_s10, %s2843_s27  ;;  %p2847_p7 = scmp.lt.u32.totalorder %s2843_s27, %s3678_s10 }
  0x6b   :  { %p2849_p8 = pnand %p2847_p7, %p2844_p6 }
  0x6d   :  { %2852 = shalt.err (!%p2849_p8)
}
  0x6e   :  { %s2853_s14 = scalar_lea.vmem %s110_s8, 2048  ;;  %p2858_p10 = scmp.lt.s32.totalorder %s110_s8, %s110_s8 }
  0x6f   :  { %p2854_p9 = scmp.ne.s32.totalorder %s110_s8, %s2853_s14  ;;  %p2859_p11 = scmp.lt.s32.totalorder %s2853_s14, %s2853_s14 }
  0x71   :  { %p2860_p12 = por %p2859_p11, %p2858_p10 }
  0x73   :  { %p2861_p13 = pnand %p2860_p12, %p2854_p9 }
  0x75   :  { %2864 = shalt.err (!%p2861_p13)
}
  0x76   :  { %115 = dma.hbm_to_vmem [thread:$0]  %s3678_s10, 2048, %s110_s8, [#allocation12], %s2922_s18, %s2922_s18, %s2923_s19  }
  0x77   :  { %s2932_s25 = smov [#allocation14]   ;;  %s2865_s16 = scalar_lea.hbm %s3679_s11, 3072 }
  0x78   :  { %s121_s15 = sshll.u32 %s2932_s25, 4  ;;  %p2866_p0 = scmp.ne.s32.totalorder %s3679_s11, %s2865_s16  ;;  %s122_s15 = int_to_ptr.vmem [resolvable:$true] %s121_s15 }
  0x79   :  { %p2869_p1 = scmp.lt.u32.totalorder %s2865_s16, %s3679_s11 }
  0x7b   :  { %p2871_p2 = pnand %p2869_p1, %p2866_p0 }
  0x7d   :  { %2874 = shalt.err (!%p2871_p2)
}
  0x7e   :  { %s2875_s17 = scalar_lea.vmem %s122_s15, 3072  ;;  %p2880_p4 = scmp.lt.s32.totalorder %s122_s15, %s122_s15 }
  0x7f   :  { %p2876_p3 = scmp.ne.s32.totalorder %s122_s15, %s2875_s17  ;;  %p2881_p5 = scmp.lt.s32.totalorder %s2875_s17, %s2875_s17 }
  0x81   :  { %p2882_p6 = por %p2881_p5, %p2880_p4 }
  0x83   :  { %p2883_p7 = pnand %p2882_p6, %p2876_p3 }
  0x85   :  { %2886 = shalt.err (!%p2883_p7)
}
  0x86   :  { %s2933_s10 = smov 192   ;;  %s2934_s18 = smov 12  }
  0x87   :  { %127 = dma.hbm_to_vmem [thread:$0]  %s3679_s11, 3072, %s122_s15, [#allocation15], %s2933_s10, %s2933_s10, %s2934_s18  }
  0x88   :  { %2909 = dma.done.wait [#allocation3], 1024  }
  0x89   :  { %2910 = vsyncadd [#allocation3], 4294966272 }
  0x8a   :  { %2911 = dma.done.wait [#allocation6], 3072  }
  0x8b   :  { %2912 = vsyncadd [#allocation6], 4294964224 }
  0x8c   :  { %2913 = dma.done.wait [#allocation9], 4096  }
  0x8d   :  { %2914 = vsyncadd [#allocation9], 4294963200 }
  0x8e   :  { %2915 = dma.done.wait [#allocation12], 3072  }
  0x8f   :  { %2916 = vsyncadd [#allocation12], 4294964224 }
  0x90   :  { %2917 = dma.done.wait [#allocation15], 3072  }
  0x91   :  { %2918 = vsyncadd [#allocation15], 4294964224  ;;  %v3684_v0 = vmov 0   ;;  %v2575_v1 = vld [vmem:[#allocation5] sm:$0xff]   ;;  %v2576_v2 = vld [vmem:[#allocation5 + $0x8] sm:$0xff]  }
  0x92   :  { %665 = vmatprep.mubr.bf16.mxu1 %v3684_v0  ;;  %2381 = vmatprep.subr.bf16.mxu0 %v2575_v1  ;;  %v2577_v3 = vld [vmem:[#allocation5 + $0x10] sm:$0xff]   ;;  %v2578_v4 = vld [vmem:[#allocation5 + $0x18] sm:$0xff]   ;;  %v3127_v5 = vld [vmem:[#allocation2] sm:$0xf] }
  0x93   :  { %2382 = vmatpush3.bf16.msra.mxu0 %v2575_v1  ;;  %v3129_v6 = vld [vmem:[#allocation2 + $0x4] sm:$0xf]  ;;  %v303_v7 = vmax.bf16 %v3684_v0, %v3127_v5  ;;  %v2586_v13 = vld [vmem:[#allocation7] ss:$8 sps:$4 sm:$0xff]   ;;  %v2587_v14 = vld [vmem:[#allocation7 + $0x14] ss:$8 sps:$4 sm:$0xff]  }
  0x94   :  { %2383 = vmatprep.subr.bf16.mxu0 %v2576_v2  ;;  %v304_v8 = vmax.bf16 %v3684_v0, %v3129_v6  ;;  %v2115_v9 = vcombine.low %v3127_v5, %v3129_v6  ;;  %v2579_v11 = vld [vmem:[#allocation5 + $0x20] sm:$0xff]   ;;  %v2580_v15 = vld [vmem:[#allocation5 + $0x28] sm:$0xff]   ;;  %v2589_v16 = vld [vmem:[#allocation7 + $0x10] ss:$8 sps:$4 sm:$0xff]  }
  0x95   :  { %v2584_v12 = vld [vmem:[#allocation7 + $0x4] ss:$8 sps:$4 sm:$0xff]   ;;  %v2581_v18 = vld [vmem:[#allocation5 + $0x30] sm:$0xff]   ;;  %v2592_v19 = vld [vmem:[#allocation7 + $0x20] ss:$8 sps:$4 sm:$0xff]  }
  0x96   :  { %v2083_v10 = vcombine.low %v303_v7, %v304_v8  ;;  %633 = vmatprep.subr.bf16.mxu1 %v2584_v12  ;;  %v2590_v17 = vld [vmem:[#allocation7 + $0x24] ss:$8 sps:$4 sm:$0xff]   ;;  %v3137_v20 = vld [vmem:[#allocation2 + $0x8] sm:$0xf]  ;;  %v2593_v22 = vld [vmem:[#allocation7 + $0x34] ss:$8 sps:$4 sm:$0xff]  }
  0x97   :  { %2384 = vmatpush3.bf16.msra.mxu0 %v2576_v2  ;;  %634 = vmatpush1.bf16.msra.mxu1 %v2586_v13  ;;  %v3139_v21 = vld [vmem:[#allocation2 + $0xc] sm:$0xf]  ;;  %v2582_v23 = vld [vmem:[#allocation5 + $0x38] sm:$0xff]   ;;  %v3141_v24 = vld [vmem:[#allocation2 + $0x10] sm:$0xf]  ;;  %v305_v28 = vmax.bf16 %v3684_v0, %v3137_v20 }
  0x98   :  { %2385 = vmatprep.subr.bf16.mxu0 %v2577_v3  ;;  %2397 = vmatprep.mubr.bf16.mxu0 %v2083_v10  ;;  %v3143_v25 = vld [vmem:[#allocation2 + $0x14] sm:$0xf]  ;;  %v2595_v26 = vld [vmem:[#allocation7 + $0x30] ss:$8 sps:$4 sm:$0xff]   ;;  %v2596_v27 = vld [vmem:[#allocation7 + $0x44] ss:$8 sps:$4 sm:$0xff]   ;;  %v306_v29 = vmax.bf16 %v3684_v0, %v3139_v21  ;;  %v307_v30 = vmax.bf16 %v3684_v0, %v3141_v24 }
  0x99   :  { %635 = vmatprep.subr.bf16.mxu1 %v2587_v14  ;;  %v308_v31 = vmax.bf16 %v3684_v0, %v3143_v25  ;;  %v2598_v32 = vld [vmem:[#allocation7 + $0x40] ss:$8 sps:$4 sm:$0xff]   ;;  %v2599_v33 = vld [vmem:[#allocation7 + $0x54] ss:$8 sps:$4 sm:$0xff]   ;;  %v3153_v34 = vld [vmem:[#allocation2 + $0x18] sm:$0xf] }
  0x9a   :  { %v3155_v35 = vld [vmem:[#allocation2 + $0x1c] sm:$0xf]  ;;  %v2084_v36 = vcombine.low %v305_v28, %v306_v29  ;;  %v3157_v37 = vld [vmem:[#allocation2 + $0x20] sm:$0xf]  ;;  %v3159_v38 = vld [vmem:[#allocation2 + $0x24] sm:$0xf]  ;;  %v309_v41 = vmax.bf16 %v3684_v0, %v3153_v34 }
  0x9b   :  { %2386 = vmatpush3.bf16.msra.mxu0 %v2577_v3  ;;  %636 = vmatpush1.bf16.msra.mxu1 %v2589_v16  ;;  %v2085_v39 = vcombine.low %v307_v30, %v308_v31  ;;  %v2601_v40 = vld [vmem:[#allocation7 + $0x50] ss:$8 sps:$4 sm:$0xff]   ;;  %v310_v42 = vmax.bf16 %v3684_v0, %v3155_v35  ;;  %v311_v43 = vmax.bf16 %v3684_v0, %v3157_v37  ;;  %v3169_v45 = vld [vmem:[#allocation2 + $0x28] sm:$0xf]  ;;  %v3171_v46 = vld [vmem:[#allocation2 + $0x2c] sm:$0xf] }
  0x9c   :  { %2387 = vmatprep.subr.bf16.mxu0 %v2578_v4  ;;  %637 = vmatprep.subr.bf16.mxu1 %v2590_v17  ;;  %v312_v44 = vmax.bf16 %v3684_v0, %v3159_v38  ;;  %v3173_v48 = vld [vmem:[#allocation2 + $0x30] sm:$0xf]  ;;  %v3175_v49 = vld [vmem:[#allocation2 + $0x34] sm:$0xf]  ;;  %v313_v51 = vmax.bf16 %v3684_v0, %v3169_v45  ;;  %v314_v52 = vmax.bf16 %v3684_v0, %v3171_v46  ;;  %v3185_v55 = vld [vmem:[#allocation2 + $0x38] sm:$0xf] }
  0x9d   :  { %v2086_v47 = vcombine.low %v309_v41, %v310_v42  ;;  %v315_v53 = vmax.bf16 %v3684_v0, %v3173_v48  ;;  %v316_v54 = vmax.bf16 %v3684_v0, %v3175_v49  ;;  %v3187_v56 = vld [vmem:[#allocation2 + $0x3c] sm:$0xf]  ;;  %v317_v59 = vmax.bf16 %v3684_v0, %v3185_v55  ;;  %v2602_v62 = vld [vmem:[#allocation7 + $0x64] ss:$8 sps:$4 sm:$0xff]   ;;  %v2604_v63 = vld [vmem:[#allocation7 + $0x60] ss:$8 sps:$4 sm:$0xff]  }
  0x9e   :  { %v2087_v50 = vcombine.low %v311_v43, %v312_v44  ;;  %v2088_v57 = vcombine.low %v313_v51, %v314_v52  ;;  %v318_v60 = vmax.bf16 %v3684_v0, %v3187_v56  ;;  %v2605_v1 = vld [vmem:[#allocation7 + $0x74] ss:$8 sps:$4 sm:$0xff]   ;;  %v2607_v2 = vld [vmem:[#allocation7 + $0x70] ss:$8 sps:$4 sm:$0xff]   ;;  %v2610_v3 = vld [vmem:[#allocation8 + $0x4] ss:$8 sps:$4 sm:$0xff]   ;;  %v2119_v5 = vcombine.low %v3157_v37, %v3159_v38 }
  0x9f   :  { %2388 = vmatpush3.bf16.msra.mxu0 %v2578_v4  ;;  %638 = vmatpush1.bf16.msra.mxu1 %v2592_v19  ;;  %v2089_v58 = vcombine.low %v315_v53, %v316_v54  ;;  %v3196_v4 = vld [vmem:[%s3670_s2] ss:$0 sm:$0xff]  ;;  %v2643_v28 = vld [vmem:[#allocation10 + $0x50] sm:$0xff]   ;;  %v2645_v43 = vld [vmem:[#allocation10 + $0x58] sm:$0xff]   ;;  %v2120_v6 = vcombine.low %v3169_v45, %v3171_v46  ;;  %v543_v37 = vlaneseq }
  0xa0   :  { %2389 = vmatprep.subr.bf16.mxu0 %v2579_v11  ;;  %639 = vmatprep.subr.bf16.mxu1 %v2593_v22  ;;  %v2090_v61 = vcombine.low %v317_v59, %v318_v60  ;;  %v2639_v13 = vld [vmem:[#allocation10 + $0x40] sm:$0xff]   ;;  %v2611_v51 = vld [vmem:[#allocation8 + $0x10] ss:$8 sps:$4 sm:$0xff]  }
  0xa1   :  { %v2640_v14 = vld [vmem:[#allocation10] sm:$0xff]   ;;  %v3247_v38 = vshrl.u32 %v543_v37, 7 }
  0xa2   :  { %v2608_v30 = vld [vmem:[#allocation8] ss:$8 sps:$4 sm:$0xff]   ;;  %v2616_v54 = vld [vmem:[#allocation8 + $0x24] ss:$8 sps:$4 sm:$0xff]  }
  0xa3   :  { %2390 = vmatpush3.bf16.msra.mxu0 %v2579_v11  ;;  %640 = vmatpush1.bf16.msra.mxu1 %v2595_v26  ;;  %v2647_v60 = vld [vmem:[#allocation10 + $0x60] sm:$0xff]   ;;  %v3683_v45 = vsub.s32 0, %v3247_v38 }
  0xa4   :  { %2391 = vmatprep.subr.bf16.mxu0 %v2580_v15  ;;  %641 = vmatprep.subr.bf16.mxu1 %v2596_v27  ;;  %v204_v46 = vld [vmem:[%s3672_s4] sm:$0x3] }
  0xa7   :  { %2392 = vmatpush3.bf16.msra.mxu0 %v2580_v15  ;;  %642 = vmatpush1.bf16.msra.mxu1 %v2598_v32  ;;  %v2641_v15 = vld [vmem:[#allocation10 + $0x48] sm:$0xff]  }
  0xa8   :  { %2393 = vmatprep.subr.bf16.mxu0 %v2581_v18  ;;  %643 = vmatprep.subr.bf16.mxu1 %v2599_v33  ;;  %v2613_v33 = vld [vmem:[#allocation8 + $0x14] ss:$8 sps:$4 sm:$0xff]  }
  0xab   :  { %2394 = vmatpush3.bf16.msra.mxu0 %v2581_v18  ;;  %644 = vmatpush1.bf16.msra.mxu1 %v2601_v40  ;;  %v2644_v40 = vld [vmem:[#allocation10 + $0x10] sm:$0xff]  }
  0xac   :  { %2395 = vmatprep.subr.bf16.mxu0 %v2582_v23  ;;  %645 = vmatprep.subr.bf16.mxu1 %v2602_v62  ;;  %v2614_v62 = vld [vmem:[#allocation8 + $0x20] ss:$8 sps:$4 sm:$0xff]  }
  0xaf   :  { %2396 = vmatpush3.bf16.msra.mxu0 %v2582_v23  ;;  %646 = vmatpush1.bf16.msra.mxu1 %v2604_v63  ;;  %v2642_v23 = vld [vmem:[#allocation10 + $0x8] sm:$0xff]  }
  0xb0   :  { %647 = vmatprep.subr.bf16.mxu1 %v2605_v1  ;;  %2221 = vmatprep.subr.bf16.mxu0 %v2639_v13 }
  0xb2   :  { %2398 = vmatmul.mubr.bf16.vlgmr.msra.gmra.mrb[0].mxu0 %v2084_v36 }
  0xb3   :  { %2401 = vmatprep.mubr.bf16.mxu0 %v2085_v39  ;;  %648 = vmatpush1.bf16.msra.mxu1 %v2607_v2  ;;  %v2619_v2 = vld [vmem:[#allocation8 + $0x34] ss:$8 sps:$4 sm:$0xff]  }
  0xb4   :  { %874 = vmatprep.subr.bf16.mxu1 %v2610_v3  ;;  %2222 = vmatpush3.bf16.msra.mxu0 %v2640_v14 }
  0xb5   :  { %2223 = vmatprep.subr.bf16.mxu0 %v2641_v15 }
  0xb8   :  { %2224 = vmatpush3.bf16.msra.mxu0 %v2642_v23  ;;  %v2650_v23 = vld [vmem:[#allocation10 + $0x28] sm:$0xff]  }
  0xb9   :  { %2225 = vmatprep.subr.bf16.mxu0 %v2643_v28  ;;  %v2620_v28 = vld [vmem:[#allocation8 + $0x40] ss:$8 sps:$4 sm:$0xff]  }
  0xba   :  { %2402 = vmatmul.mubr.bf16.gmra.mrb[4].mxu0 %v2086_v47 }
  0xbb   :  { %2405 = vmatprep.mubr.bf16.mxu0 %v2087_v50 }
  0xbc   :  { %2226 = vmatpush3.bf16.msra.mxu0 %v2644_v40 }
  0xbd   :  { %2227 = vmatprep.subr.bf16.mxu0 %v2645_v43  ;;  %v2623_v43 = vld [vmem:[#allocation8 + $0x50] ss:$8 sps:$4 sm:$0xff]  }
  0xc2   :  { %2406 = vmatmul.mubr.bf16.gmra.mrb[8].mxu0 %v2088_v57 }
  0xc3   :  { %2409 = vmatprep.mubr.bf16.mxu0 %v2089_v58  ;;  %v2646_v58 = vld [vmem:[#allocation10 + $0x18] sm:$0xff]  }
  0xc4   :  { %2228 = vmatpush3.bf16.msra.mxu0 %v2646_v58  ;;  %v2631_v58 = vld [vmem:[#allocation8 + $0x74] ss:$8 sps:$4 sm:$0xff]  }
  0xc5   :  { %2229 = vmatprep.subr.bf16.mxu0 %v2647_v60  ;;  %v2117_v60 = vcombine.low %v3141_v24, %v3143_v25  ;;  %v2652_v24 = vld [vmem:[#allocation10 + $0x30] sm:$0xff]   ;;  %v2653_v25 = vld [vmem:[#allocation10 + $0x78] sm:$0xff]  }
  0xca   :  { %2410 = vmatmul.mubr.bf16.gmra.mrb[12].mxu0 %v2090_v61 }
 0x185   :  { %v2399_v7 = vpop.f32.mrb[0].mxu0 }
 0x186   :  { %v464_v8 = vadd.f32 %v2399_v7, %v3196_v4  ;;  %v455_v10 = vpop.f32.mrb[1].mxu0 }
 0x187   :  { %v456_v11 = vadd.f32 %v3196_v4, %v455_v10  ;;  %v2400_v12 = vpop.f32.mrb[2].mxu0 }
 0x188   :  { %v467_v16 = vadd.f32 %v2400_v12, %v3196_v4  ;;  %v458_v17 = vpop.f32.mrb[3].mxu0  ;;  %v520_v19 = vmax.f32 %v464_v8, 0.0  ;;  %v2648_v8 = vld [vmem:[#allocation10 + $0x20] sm:$0xff]   ;;  %v2649_v12 = vld [vmem:[#allocation10 + $0x68] sm:$0xff]  }
 0x189   :  { %v459_v18 = vadd.f32 %v3196_v4, %v458_v17  ;;  %v518_v26 = vmax.f32 %v456_v11, 0.0  ;;  %2230 = vmatpush3.bf16.msra.mxu0 %v2648_v8 }
 0x18a   :  { %v521_v22 = vmax.f32 %v467_v16, 0.0  ;;  %v2617_v16 = vld [vmem:[#allocation8 + $0x30] ss:$8 sps:$4 sm:$0xff]   ;;  %2231 = vmatprep.subr.bf16.mxu0 %v2649_v12 }
 0x18b   :  { %v519_v27 = vmax.f32 %v459_v18, 0.0 }
 0x18c   :  { %v535_v29 = vpack.c.bf16 %v521_v22, %v520_v19  ;;  %v2622_v19 = vld [vmem:[#allocation8 + $0x44] ss:$8 sps:$4 sm:$0xff]  }
 0x18d   :  { %v534_v31 = vpack.c.bf16 %v519_v27, %v518_v26  ;;  %v2403_v32 = vpop.f32.mrb[4].mxu0  ;;  %2232 = vmatpush3.bf16.msra.mxu0 %v2650_v23  ;;  %v2656_v23 = vld [vmem:[#allocation11 + $0x8] sm:$0xff]  }
 0x18e   :  { %v480_v36 = vadd.f32 %v2403_v32, %v3196_v4  ;;  %v471_v39 = vpop.f32.mrb[5].mxu0 }
 0x18f   :  { %666 = vmatmul.mubr.bf16.vlgmr.msra.gmra.mrb[0].mxu1 %v534_v31  ;;  %v472_v41 = vadd.f32 %v3196_v4, %v471_v39  ;;  %v2404_v42 = vpop.f32.mrb[6].mxu0  ;;  %v2625_v31 = vld [vmem:[#allocation8 + $0x54] ss:$8 sps:$4 sm:$0xff]  }
 0x190   :  { %875 = vmatpush1.bf16.msra.mxu1 %v2608_v30  ;;  %v524_v44 = vmax.f32 %v480_v36, 0.0  ;;  %v483_v47 = vadd.f32 %v2404_v42, %v3196_v4  ;;  %v474_v50 = vpop.f32.mrb[7].mxu0  ;;  %675 = vmatprep.mubr.bf16.mxu1 %v3684_v0 }
 0x191   :  { %v522_v52 = vmax.f32 %v472_v41, 0.0  ;;  %v475_v53 = vadd.f32 %v3196_v4, %v474_v50  ;;  %876 = vmatprep.subr.bf16.mxu1 %v2613_v33  ;;  %v2628_v50 = vld [vmem:[#allocation8 + $0x64] ss:$8 sps:$4 sm:$0xff]  }
 0x192   :  { %v525_v57 = vmax.f32 %v483_v47, 0.0 }
 0x193   :  { %v523_v59 = vmax.f32 %v475_v53, 0.0 }
 0x194   :  { %v537_v61 = vpack.c.bf16 %v525_v57, %v524_v44  ;;  %877 = vmatpush1.bf16.msra.mxu1 %v2611_v51 }
 0x195   :  { %v536_v63 = vpack.c.bf16 %v523_v59, %v522_v52  ;;  %878 = vmatprep.subr.bf16.mxu1 %v2616_v54  ;;  %v2407_v1 = vpop.f32.mrb[8].mxu0  ;;  %v2626_v54 = vld [vmem:[#allocation8 + $0x60] ss:$8 sps:$4 sm:$0xff]   ;;  %v2629_v59 = vld [vmem:[#allocation8 + $0x70] ss:$8 sps:$4 sm:$0xff]  }
 0x196   :  { %v496_v3 = vadd.f32 %v2407_v1, %v3196_v4  ;;  %v487_v7 = vpop.f32.mrb[9].mxu0 }
 0x197   :  { %676 = vmatmul.mubr.bf16.gmra.mrb[4].mxu1 %v535_v29  ;;  %v488_v10 = vadd.f32 %v3196_v4, %v487_v7  ;;  %v2408_v11 = vpop.f32.mrb[10].mxu0 }
 0x198   :  { %685 = vmatprep.mubr.bf16.mxu1 %v3684_v0  ;;  %879 = vmatpush1.bf16.msra.mxu1 %v2614_v62  ;;  %v528_v13 = vmax.f32 %v496_v3, 0.0  ;;  %v499_v14 = vadd.f32 %v2408_v11, %v3196_v4  ;;  %v490_v15 = vpop.f32.mrb[11].mxu0 }
 0x199   :  { %v526_v17 = vmax.f32 %v488_v10, 0.0  ;;  %v491_v18 = vadd.f32 %v3196_v4, %v490_v15  ;;  %880 = vmatprep.subr.bf16.mxu1 %v2619_v2 }
 0x19a   :  { %v529_v22 = vmax.f32 %v499_v14, 0.0 }
 0x19b   :  { %v527_v26 = vmax.f32 %v491_v18, 0.0 }
 0x19c   :  { %v539_v27 = vpack.c.bf16 %v529_v22, %v528_v13  ;;  %881 = vmatpush1.bf16.msra.mxu1 %v2617_v16 }
 0x19d   :  { %v538_v29 = vpack.c.bf16 %v527_v26, %v526_v17  ;;  %882 = vmatprep.subr.bf16.mxu1 %v2622_v19  ;;  %v2411_v30 = vpop.f32.mrb[12].mxu0 }
 0x19e   :  { %v512_v32 = vadd.f32 %v2411_v30, %v3196_v4  ;;  %v503_v33 = vpop.f32.mrb[13].mxu0 }
 0x19f   :  { %686 = vmatmul.mubr.bf16.gmra.mrb[8].mxu1 %v536_v63  ;;  %v504_v36 = vadd.f32 %v3196_v4, %v503_v33  ;;  %v2412_v39 = vpop.f32.mrb[14].mxu0 }
 0x1a0   :  { %695 = vmatprep.mubr.bf16.mxu1 %v3684_v0  ;;  %883 = vmatpush1.bf16.msra.mxu1 %v2620_v28  ;;  %v532_v40 = vmax.f32 %v512_v32, 0.0  ;;  %v515_v41 = vadd.f32 %v2412_v39, %v3196_v4  ;;  %v506_v42 = vpop.f32.mrb[15].mxu0 }
 0x1a1   :  { %v530_v44 = vmax.f32 %v504_v36, 0.0  ;;  %v507_v47 = vadd.f32 %v3196_v4, %v506_v42  ;;  %884 = vmatprep.subr.bf16.mxu1 %v2625_v31  ;;  %v2116_v4 = vcombine.low %v3137_v20, %v3139_v21  ;;  %v2122_v20 = vcombine.low %v3185_v55, %v3187_v56  ;;  %v2651_v21 = vld [vmem:[#allocation10 + $0x70] sm:$0xff]  }
 0x1a2   :  { %v533_v51 = vmax.f32 %v515_v41, 0.0  ;;  %2233 = vmatprep.subr.bf16.mxu0 %v2651_v21  ;;  %v2657_v36 = vld [vmem:[#allocation11 + $0x10] sm:$0xff]  }
 0x1a3   :  { %v531_v52 = vmax.f32 %v507_v47, 0.0  ;;  %2234 = vmatpush3.bf16.msra.mxu0 %v2652_v24 }
 0x1a4   :  { %v541_v53 = vpack.c.bf16 %v533_v51, %v532_v40  ;;  %885 = vmatpush1.bf16.msra.mxu1 %v2623_v43  ;;  %2235 = vmatprep.subr.bf16.mxu0 %v2653_v25 }
 0x1a5   :  { %v540_v57 = vpack.c.bf16 %v531_v52, %v530_v44  ;;  %886 = vmatprep.subr.bf16.mxu1 %v2628_v50 }
 0x1a7   :  { %696 = vmatmul.mubr.bf16.gmra.mrb[12].mxu1 %v537_v61  ;;  %v2118_v61 = vcombine.low %v3153_v34, %v3155_v35  ;;  %v2654_v34 = vld [vmem:[#allocation10 + $0x38] sm:$0xff]   ;;  %v2655_v35 = vld [vmem:[#allocation11] sm:$0xff]  }
 0x1a8   :  { %705 = vmatprep.mubr.bf16.mxu1 %v3684_v0  ;;  %887 = vmatpush1.bf16.msra.mxu1 %v2626_v54 }
 0x1a9   :  { %888 = vmatprep.subr.bf16.mxu1 %v2631_v58  ;;  %2236 = vmatpush3.bf16.msra.mxu0 %v2654_v34 }
 0x1aa   :  { %2413 = vmatprep.subr.bf16.mxu0 %v2655_v35 }
 0x1ac   :  { %889 = vmatpush1.bf16.msra.mxu1 %v2629_v59 }
 0x1af   :  { %706 = vmatmul.mubr.bf16.gmra.mrb[16].mxu1 %v538_v29 }
 0x1b0   :  { %715 = vmatprep.mubr.bf16.mxu1 %v3684_v0 }
 0x1b7   :  { %716 = vmatmul.mubr.bf16.gmra.mrb[20].mxu1 %v539_v27 }
 0x1b8   :  { %725 = vmatprep.mubr.bf16.mxu1 %v3684_v0 }
 0x1bf   :  { %726 = vmatmul.mubr.bf16.gmra.mrb[24].mxu1 %v540_v57 }
 0x1c0   :  { %735 = vmatprep.mubr.bf16.mxu1 %v3684_v0 }
 0x1c7   :  { %736 = vmatmul.mubr.bf16.gmra.mrb[28].mxu1 %v541_v53 }
 0x1c8   :  { %906 = vmatprep.mubr.bf16.mxu1 %v3684_v0 }
 0x1cf   :  { %907 = vmatmul.mubr.bf16.vlgmr.msra.gmra.mrb[0].mxu1 %v2115_v9  ;;  %v2121_v9 = vcombine.low %v3173_v48, %v3175_v49  ;;  %v3682_v48 = vsub.s32 1, %v3247_v38  ;;  %v3256_v49 = vrot.slane %v204_v46, %v3683_v45 }
 0x1d0   :  { %916 = vmatprep.mubr.bf16.mxu1 %v3684_v0 }
 0x1d1   :  { %v3260_v55 = vrot.slane %v204_v46, %v3682_v48 }
 0x1d7   :  { %917 = vmatmul.mubr.bf16.gmra.mrb[4].mxu1 %v2116_v4 }
 0x1d8   :  { %926 = vmatprep.mubr.bf16.mxu1 %v3684_v0 }
 0x1df   :  { %927 = vmatmul.mubr.bf16.gmra.mrb[8].mxu1 %v2117_v60 }
 0x1e0   :  { %936 = vmatprep.mubr.bf16.mxu1 %v3684_v0 }
 0x1e7   :  { %937 = vmatmul.mubr.bf16.gmra.mrb[12].mxu1 %v2118_v61 }
 0x1e8   :  { %946 = vmatprep.mubr.bf16.mxu1 %v3684_v0 }
 0x1ef   :  { %947 = vmatmul.mubr.bf16.gmra.mrb[16].mxu1 %v2119_v5 }
 0x1f0   :  { %956 = vmatprep.mubr.bf16.mxu1 %v3684_v0 }
 0x1f7   :  { %957 = vmatmul.mubr.bf16.gmra.mrb[20].mxu1 %v2120_v6 }
 0x1f8   :  { %966 = vmatprep.mubr.bf16.mxu1 %v3684_v0 }
 0x1ff   :  { %967 = vmatmul.mubr.bf16.gmra.mrb[24].mxu1 %v2121_v9 }
 0x200   :  { %976 = vmatprep.mubr.bf16.mxu1 %v3684_v0 }
 0x207   :  { %977 = vmatmul.mubr.bf16.gmra.mrb[28].mxu1 %v2122_v20 }
 0x208   :  { %1835 = vmatprep.mubr.bf16.mxu1 %v3684_v0 }
 0x2a2   :  { %v908_v56 = vpop.f32.mrb[0].mxu1 }
 0x2a3   :  { %v3263_v62 = vadd.f32 %v908_v56, %v3256_v49  ;;  %v910_v63 = vpop.f32.mrb[1].mxu1 }
 0x2a4   :  { %v3266_v1 = vadd.f32 %v910_v63, %v3260_v55  ;;  %v912_v2 = vpop.f32.mrb[2].mxu1 }
 0x2a5   :  { %v3269_v3 = vadd.f32 %v912_v2, %v3256_v49  ;;  %v914_v7 = vpop.f32.mrb[3].mxu1  ;;  %v987_v10 = vmax.f32 %v3263_v62, 0.0 }
 0x2a6   :  { %v3272_v8 = vadd.f32 %v914_v7, %v3260_v55  ;;  %v988_v13 = vmax.f32 %v3266_v1, 0.0 }
 0x2a7   :  { %v989_v11 = vmax.f32 %v3269_v3, 0.0  ;;  %v1409_v12 = vpack.c.bf16 %v3269_v3, %v3263_v62  ;;  %v2679_v62 = vld [vmem:[#allocation14] ss:$12 sps:$4 sm:$0xff]   ;;  %v2684_v3 = vld [vmem:[#allocation14 + $0x1c] ss:$12 sps:$4 sm:$0xff]  }
 0x2a8   :  { %v990_v14 = vmax.f32 %v3272_v8, 0.0  ;;  %v1410_v15 = vpack.c.bf16 %v3272_v8, %v3266_v1  ;;  %v2681_v1 = vld [vmem:[#allocation14 + $0x4] ss:$12 sps:$4 sm:$0xff]  }
 0x2a9   :  { %v1019_v16 = vpack.c.bf16 %v989_v11, %v987_v10  ;;  %1803 = vmatprep.subr.bf16.mxu1 %v2681_v1 }
 0x2aa   :  { %v918_v17 = vpop.f32.mrb[4].mxu1  ;;  %v1020_v18 = vpack.c.bf16 %v990_v14, %v988_v13  ;;  %1804 = vmatpush1.bf16.msra.mxu1 %v2679_v62 }
 0x2ab   :  { %v3283_v19 = vadd.f32 %v918_v17, %v3256_v49  ;;  %v920_v22 = vpop.f32.mrb[5].mxu1  ;;  %1805 = vmatprep.subr.bf16.mxu1 %v2684_v3  ;;  %v3693_v3 = vmov 0  }
 0x2ac   :  { %v3286_v26 = vadd.f32 %v920_v22, %v3260_v55  ;;  %v922_v27 = vpop.f32.mrb[6].mxu1  ;;  %1169 = vmatprep.mubr.bf16.mxu0 %v1020_v18 }
 0x2ad   :  { %v3289_v28 = vadd.f32 %v922_v27, %v3256_v49  ;;  %v924_v29 = vpop.f32.mrb[7].mxu1  ;;  %1170 = vmatmul.mubr.bf16.vlgmr.msra.gmra.mrb[16].mxu0 %v1019_v16  ;;  %v991_v31 = vmax.f32 %v3283_v19, 0.0 }
 0x2ae   :  { %v3292_v30 = vadd.f32 %v924_v29, %v3260_v55  ;;  %2414 = vmatpush3.bf16.msra.mxu0 %v2655_v35  ;;  %v992_v39 = vmax.f32 %v3286_v26, 0.0 }
 0x2af   :  { %v993_v32 = vmax.f32 %v3289_v28, 0.0  ;;  %v1411_v33 = vpack.c.bf16 %v3289_v28, %v3283_v19  ;;  %2415 = vmatprep.subr.bf16.mxu0 %v2656_v23  ;;  %v2685_v28 = vld [vmem:[#allocation14 + $0x30] ss:$12 sps:$4 sm:$0xff]  }
 0x2b0   :  { %v994_v40 = vmax.f32 %v3292_v30, 0.0  ;;  %v1412_v41 = vpack.c.bf16 %v3292_v30, %v3286_v26  ;;  %v2687_v30 = vld [vmem:[#allocation14 + $0x34] ss:$12 sps:$4 sm:$0xff]  }
 0x2b1   :  { %v1021_v42 = vpack.c.bf16 %v993_v32, %v991_v31 }
 0x2b2   :  { %v928_v43 = vpop.f32.mrb[8].mxu1  ;;  %v1022_v44 = vpack.c.bf16 %v994_v40, %v992_v39  ;;  %2416 = vmatpush3.bf16.msra.mxu0 %v2656_v23 }
 0x2b3   :  { %v3303_v47 = vadd.f32 %v928_v43, %v3256_v49  ;;  %v930_v50 = vpop.f32.mrb[9].mxu1  ;;  %2417 = vmatprep.subr.bf16.mxu0 %v2657_v36 }
 0x2b4   :  { %v3306_v51 = vadd.f32 %v930_v50, %v3260_v55  ;;  %v932_v52 = vpop.f32.mrb[10].mxu1  ;;  %1177 = vmatprep.mubr.bf16.mxu0 %v1022_v44 }
 0x2b5   :  { %v3309_v53 = vadd.f32 %v932_v52, %v3256_v49  ;;  %v934_v54 = vpop.f32.mrb[11].mxu1  ;;  %1178 = vmatmul.mubr.bf16.gmra.mrb[20].mxu0 %v1021_v42  ;;  %v995_v58 = vmax.f32 %v3303_v47, 0.0 }
 0x2b6   :  { %v3312_v57 = vadd.f32 %v934_v54, %v3260_v55  ;;  %2418 = vmatpush3.bf16.msra.mxu0 %v2657_v36  ;;  %v996_v60 = vmax.f32 %v3306_v51, 0.0 }
 0x2b7   :  { %v997_v59 = vmax.f32 %v3309_v53, 0.0  ;;  %v1413_v4 = vpack.c.bf16 %v3309_v53, %v3303_v47  ;;  %v2688_v47 = vld [vmem:[#allocation14 + $0x48] ss:$12 sps:$4 sm:$0xff]  }
 0x2b8   :  { %v998_v61 = vmax.f32 %v3312_v57, 0.0  ;;  %v1414_v5 = vpack.c.bf16 %v3312_v57, %v3306_v51  ;;  %v2691_v57 = vld [vmem:[#allocation14 + $0x60] ss:$12 sps:$4 sm:$0xff]  }
 0x2b9   :  { %v1023_v6 = vpack.c.bf16 %v997_v59, %v995_v58 }
 0x2ba   :  { %v938_v9 = vpop.f32.mrb[12].mxu1  ;;  %v1024_v20 = vpack.c.bf16 %v998_v61, %v996_v60 }
 0x2bb   :  { %v3323_v21 = vadd.f32 %v938_v9, %v3256_v49  ;;  %v940_v24 = vpop.f32.mrb[13].mxu1 }
 0x2bc   :  { %v3326_v25 = vadd.f32 %v940_v24, %v3260_v55  ;;  %v942_v34 = vpop.f32.mrb[14].mxu1  ;;  %1185 = vmatprep.mubr.bf16.mxu0 %v1024_v20 }
 0x2bd   :  { %v3329_v35 = vadd.f32 %v942_v34, %v3256_v49  ;;  %v944_v37 = vpop.f32.mrb[15].mxu1  ;;  %1186 = vmatmul.mubr.bf16.gmra.mrb[24].mxu0 %v1023_v6  ;;  %v999_v56 = vmax.f32 %v3323_v21, 0.0 }
 0x2be   :  { %v3332_v46 = vadd.f32 %v944_v37, %v3260_v55  ;;  %v1000_v7 = vmax.f32 %v3326_v25, 0.0 }
 0x2bf   :  { %v1001_v63 = vmax.f32 %v3329_v35, 0.0  ;;  %v1415_v2 = vpack.c.bf16 %v3329_v35, %v3323_v21  ;;  %v3491_v21 = vld [vmem:[#allocation14 + $0x8] ss:$12 sps:$4 sm:$0xff]   ;;  %v3493_v35 = vld [vmem:[#allocation14 + $0x20] ss:$12 sps:$4 sm:$0xff]  }
 0x2c0   :  { %v1002_v10 = vmax.f32 %v3332_v46, 0.0  ;;  %v1416_v11 = vpack.c.bf16 %v3332_v46, %v3326_v25  ;;  %v2694_v25 = vld [vmem:[#allocation14 + $0x78] ss:$12 sps:$4 sm:$0xff]  }
 0x2c1   :  { %v1025_v13 = vpack.c.bf16 %v1001_v63, %v999_v56  ;;  %v2665_v63 = vld [vmem:[#allocation13 + $0x48] sm:$0xff]   ;;  %v3499_v46 = vld [vmem:[#allocation14 + $0x38] ss:$12 sps:$4 sm:$0xff]  }
 0x2c2   :  { %v948_v14 = vpop.f32.mrb[16].mxu1  ;;  %v1026_v16 = vpack.c.bf16 %v1002_v10, %v1000_v7 }
 0x2c3   :  { %v3343_v17 = vadd.f32 %v948_v14, %v3256_v49  ;;  %v950_v18 = vpop.f32.mrb[17].mxu1 }
 0x2c4   :  { %v3346_v22 = vadd.f32 %v950_v18, %v3260_v55  ;;  %v952_v23 = vpop.f32.mrb[18].mxu1  ;;  %1193 = vmatprep.mubr.bf16.mxu0 %v1026_v16 }
 0x2c5   :  { %v3349_v27 = vadd.f32 %v952_v23, %v3256_v49  ;;  %v954_v29 = vpop.f32.mrb[19].mxu1  ;;  %1194 = vmatmul.mubr.bf16.gmra.mrb[28].mxu0 %v1025_v13  ;;  %v1003_v32 = vmax.f32 %v3343_v17, 0.0 }
 0x2c6   :  { %v3352_v31 = vadd.f32 %v954_v29, %v3260_v55  ;;  %v1004_v40 = vmax.f32 %v3346_v22, 0.0 }
 0x2c7   :  { %v1005_v36 = vmax.f32 %v3349_v27, 0.0  ;;  %v3686_v8 = vpack.c.bf16 %v3349_v27, %v3343_v17  ;;  %v3503_v17 = vld [vmem:[#allocation14 + $0x50] ss:$12 sps:$4 sm:$0xff]   ;;  %v2704_v27 = vld [vmem:[#allocation14 + $0xa8] ss:$12 sps:$4 sm:$0xff]  }
 0x2c8   :  { %v1006_v42 = vmax.f32 %v3352_v31, 0.0  ;;  %v1418_v43 = vpack.c.bf16 %v3352_v31, %v3346_v22  ;;  %v3507_v22 = vld [vmem:[#allocation14 + $0x68] ss:$12 sps:$4 sm:$0xff]   ;;  %v2706_v31 = vld [vmem:[#allocation14 + $0xac] ss:$12 sps:$4 sm:$0xff]  }
 0x2c9   :  { %v1027_v44 = vpack.c.bf16 %v1005_v36, %v1003_v32 }
 0x2ca   :  { %v958_v50 = vpop.f32.mrb[20].mxu1  ;;  %v1028_v52 = vpack.c.bf16 %v1006_v42, %v1004_v40 }
 0x2cb   :  { %v3363_v54 = vadd.f32 %v958_v50, %v3256_v49  ;;  %v960_v58 = vpop.f32.mrb[21].mxu1 }
 0x2cc   :  { %v3366_v59 = vadd.f32 %v960_v58, %v3260_v55  ;;  %v962_v60 = vpop.f32.mrb[22].mxu1  ;;  %1201 = vmatprep.mubr.bf16.mxu0 %v1028_v52 }
 0x2cd   :  { %v3369_v61 = vadd.f32 %v962_v60, %v3256_v49  ;;  %v964_v6 = vpop.f32.mrb[23].mxu1  ;;  %1202 = vmatmul.mubr.bf16.gmra.mrb[32].mxu0 %v1027_v44  ;;  %v1007_v20 = vmax.f32 %v3363_v54, 0.0 }
 0x2ce   :  { %v3372_v9 = vadd.f32 %v964_v6, %v3260_v55  ;;  %v1008_v37 = vmax.f32 %v3366_v59, 0.0 }
 0x2cf   :  { %v1009_v24 = vmax.f32 %v3369_v61, 0.0  ;;  %v3688_v19 = vpack.c.bf16 %v3369_v61, %v3363_v54  ;;  %v3516_v54 = vld [vmem:[#allocation14 + $0x98] ss:$12 sps:$4 sm:$0xff]  }
 0x2d0   :  { %v1010_v56 = vmax.f32 %v3372_v9, 0.0 }
 0x2d1   :  { %v1029_v7 = vpack.c.bf16 %v1009_v24, %v1007_v20 }
 0x2d2   :  { %v968_v10 = vpop.f32.mrb[24].mxu1  ;;  %v1030_v13 = vpack.c.bf16 %v1010_v56, %v1008_v37 }
 0x2d3   :  { %v3383_v14 = vadd.f32 %v968_v10, %v3256_v49  ;;  %v970_v16 = vpop.f32.mrb[25].mxu1 }
 0x2d4   :  { %v3386_v18 = vadd.f32 %v970_v16, %v3260_v55  ;;  %v972_v23 = vpop.f32.mrb[26].mxu1  ;;  %1209 = vmatprep.mubr.bf16.mxu0 %v1030_v13 }
 0x2d5   :  { %v3389_v29 = vadd.f32 %v972_v23, %v3256_v49  ;;  %v974_v32 = vpop.f32.mrb[27].mxu1  ;;  %1210 = vmatmul.mubr.bf16.gmra.mrb[36].mxu0 %v1029_v7  ;;  %v1011_v40 = vmax.f32 %v3383_v14, 0.0 }
 0x2d6   :  { %v3392_v36 = vadd.f32 %v974_v32, %v3260_v55  ;;  %v1012_v50 = vmax.f32 %v3386_v18, 0.0 }
 0x2d7   :  { %v1013_v42 = vmax.f32 %v3389_v29, 0.0 }
 0x2d8   :  { %v1014_v52 = vmax.f32 %v3392_v36, 0.0  ;;  %v3689_v26 = vpack.c.bf16 %v3392_v36, %v3386_v18 }
 0x2d9   :  { %v1031_v60 = vpack.c.bf16 %v1013_v42, %v1011_v40 }
 0x2da   :  { %v978_v6 = vpop.f32.mrb[28].mxu1  ;;  %v1032_v20 = vpack.c.bf16 %v1014_v52, %v1012_v50 }
 0x2db   :  { %v3403_v24 = vadd.f32 %v978_v6, %v3256_v49  ;;  %v980_v37 = vpop.f32.mrb[29].mxu1 }
 0x2dc   :  { %v3406_v56 = vadd.f32 %v980_v37, %v3260_v55  ;;  %v982_v7 = vpop.f32.mrb[30].mxu1  ;;  %1217 = vmatprep.mubr.bf16.mxu0 %v1032_v20  ;;  %v2660_v20 = vld [vmem:[#allocation11 + $0x28] sm:$0xff]   ;;  %v2661_v37 = vld [vmem:[#allocation11 + $0x30] sm:$0xff]  }
 0x2dd   :  { %v3409_v10 = vadd.f32 %v982_v7, %v3256_v49  ;;  %v984_v13 = vpop.f32.mrb[31].mxu1  ;;  %1218 = vmatmul.mubr.bf16.gmra.mrb[40].mxu0 %v1031_v60  ;;  %v1015_v23 = vmax.f32 %v3403_v24, 0.0  ;;  %v2659_v60 = vld [vmem:[#allocation11 + $0x20] sm:$0xff]   ;;  %v2662_v7 = vld [vmem:[#allocation11 + $0x38] sm:$0xff]  }
 0x2de   :  { %v3412_v16 = vadd.f32 %v984_v13, %v3260_v55  ;;  %v1016_v42 = vmax.f32 %v3406_v56, 0.0  ;;  %v2658_v55 = vld [vmem:[#allocation11 + $0x18] sm:$0xff]   ;;  %v2663_v13 = vld [vmem:[#allocation13 + $0x40] sm:$0xff]  }
 0x2df   :  { %v1017_v32 = vmax.f32 %v3409_v10, 0.0  ;;  %2419 = vmatprep.subr.bf16.mxu0 %v2658_v55  ;;  %v3692_v53 = vpack.c.bf16 %v3409_v10, %v3403_v24 }
 0x2e0   :  { %v1018_v50 = vmax.f32 %v3412_v16, 0.0  ;;  %2420 = vmatpush3.bf16.msra.mxu0 %v2658_v55  ;;  %v3691_v51 = vpack.c.bf16 %v3412_v16, %v3406_v56 }
 0x2e1   :  { %v1033_v52 = vpack.c.bf16 %v1017_v32, %v1015_v23  ;;  %2421 = vmatprep.subr.bf16.mxu0 %v2659_v60  ;;  %v3425_v32 = vld [vmem:[%s3675_s7] ss:$0 sm:$0xff] }
 0x2e2   :  { %v1034_v6 = vpack.c.bf16 %v1018_v50, %v1016_v42 }
 0x2e4   :  { %1225 = vmatprep.mubr.bf16.mxu0 %v1034_v6  ;;  %2422 = vmatpush3.bf16.msra.mxu0 %v2659_v60 }
 0x2e5   :  { %1226 = vmatmul.mubr.bf16.gmra.mrb[44].mxu0 %v1033_v52  ;;  %2423 = vmatprep.subr.bf16.mxu0 %v2660_v20 }
 0x2e8   :  { %2424 = vmatpush3.bf16.msra.mxu0 %v2660_v20 }
 0x2e9   :  { %2425 = vmatprep.subr.bf16.mxu0 %v2661_v37 }
 0x2ec   :  { %2426 = vmatpush3.bf16.msra.mxu0 %v2661_v37 }
 0x2ed   :  { %2427 = vmatprep.subr.bf16.mxu0 %v2662_v7 }
 0x2f0   :  { %2428 = vmatpush3.bf16.msra.mxu0 %v2662_v7 }
 0x2f1   :  { %2301 = vmatprep.subr.bf16.mxu0 %v2663_v13 }
 0x380   :  { %v2237_v23 = vpop.f32.mrb[16].mxu0 }
 0x381   :  { %v2238_v42 = vpop.f32.mrb[17].mxu0 }
 0x382   :  { %v2239_v50 = vadd.f32 %v2238_v42, %v2237_v23  ;;  %v2240_v52 = vpop.f32.mrb[18].mxu0 }
 0x383   :  { %v2241_v6 = vpop.f32.mrb[19].mxu0 }
 0x384   :  { %v1172_v55 = vadd.f32 %v2239_v50, %v3425_v32  ;;  %v2242_v60 = vadd.f32 %v2241_v6, %v2240_v52  ;;  %v2664_v6 = vld [vmem:[#allocation13] sm:$0xff]  }
 0x386   :  { %v1175_v20 = vadd.f32 %v2242_v60, %v3425_v32  ;;  %v1234_v37 = vmax.f32 %v1172_v55, 0.0 }
 0x388   :  { %v1235_v48 = vmax.f32 %v1175_v20, 0.0  ;;  %v2243_v7 = vpop.f32.mrb[20].mxu0 }
 0x389   :  { %v2244_v45 = vpop.f32.mrb[21].mxu0 }
 0x38a   :  { %v2245_v13 = vadd.f32 %v2244_v45, %v2243_v7  ;;  %v2246_v0 = vpop.f32.mrb[22].mxu0  ;;  %v1250_v40 = vpack.c.bf16 %v1235_v48, %v1234_v37  ;;  %v2666_v37 = vld [vmem:[#allocation13 + $0x8] sm:$0xff]  }
 0x38b   :  { %v2247_v49 = vpop.f32.mrb[23].mxu0 }
 0x38c   :  { %v1180_v44 = vadd.f32 %v2245_v13, %v3425_v32  ;;  %v2248_v58 = vadd.f32 %v2247_v49, %v2246_v0  ;;  %2429 = vmatprep.mubr.bf16.mxu0 %v1250_v40 }
 0x38e   :  { %v1183_v23 = vadd.f32 %v2248_v58, %v3425_v32  ;;  %v1236_v42 = vmax.f32 %v1180_v44, 0.0  ;;  %v2667_v58 = vld [vmem:[#allocation13 + $0x50] sm:$0xff]  }
 0x390   :  { %v1237_v34 = vmax.f32 %v1183_v23, 0.0  ;;  %v2249_v50 = vpop.f32.mrb[24].mxu0 }
 0x391   :  { %v2250_v52 = vpop.f32.mrb[25].mxu0 }
 0x392   :  { %v1251_v60 = vpack.c.bf16 %v1237_v34, %v1236_v42  ;;  %v2251_v55 = vadd.f32 %v2250_v52, %v2249_v50  ;;  %v2252_v20 = vpop.f32.mrb[26].mxu0  ;;  %v2668_v34 = vld [vmem:[#allocation13 + $0x10] sm:$0xff]   ;;  %v2669_v50 = vld [vmem:[#allocation13 + $0x58] sm:$0xff]  }
 0x393   :  { %v2253_v39 = vpop.f32.mrb[27].mxu0 }
 0x394   :  { %v1188_v45 = vadd.f32 %v2251_v55, %v3425_v32  ;;  %v2254_v48 = vadd.f32 %v2253_v39, %v2252_v20  ;;  %2430 = vmatmul.mubr.bf16.vlgmr.msra.gmra.mrb[48].mxu0 %v1251_v60  ;;  %v2670_v60 = vld [vmem:[#allocation13 + $0x18] sm:$0xff]   ;;  %v2671_v55 = vld [vmem:[#allocation13 + $0x60] sm:$0xff]  }
 0x395   :  { %2302 = vmatpush3.bf16.msra.mxu0 %v2664_v6 }
 0x396   :  { %v1191_v0 = vadd.f32 %v2254_v48, %v3425_v32  ;;  %2303 = vmatprep.subr.bf16.mxu0 %v2665_v63  ;;  %v1238_v44 = vmax.f32 %v1188_v45, 0.0 }
 0x398   :  { %v1239_v40 = vmax.f32 %v1191_v0, 0.0  ;;  %v2255_v49 = vpop.f32.mrb[28].mxu0  ;;  %v2672_v0 = vld [vmem:[#allocation13 + $0x20] sm:$0xff]  }
 0x399   :  { %v2256_v7 = vpop.f32.mrb[29].mxu0  ;;  %2304 = vmatpush3.bf16.msra.mxu0 %v2666_v37 }
 0x39a   :  { %v2257_v13 = vadd.f32 %v2256_v7, %v2255_v49  ;;  %v2258_v23 = vpop.f32.mrb[30].mxu0  ;;  %v1252_v42 = vpack.c.bf16 %v1239_v40, %v1238_v44  ;;  %2305 = vmatprep.subr.bf16.mxu0 %v2667_v58  ;;  %v2673_v49 = vld [vmem:[#allocation13 + $0x68] sm:$0xff]  }
 0x39b   :  { %v2259_v52 = vpop.f32.mrb[31].mxu0 }
 0x39c   :  { %v1196_v39 = vadd.f32 %v2257_v13, %v3425_v32  ;;  %v2260_v6 = vadd.f32 %v2259_v52, %v2258_v23  ;;  %2433 = vmatprep.mubr.bf16.mxu0 %v1252_v42  ;;  %v2674_v23 = vld [vmem:[#allocation13 + $0x28] sm:$0xff]  }
 0x39d   :  { %2306 = vmatpush3.bf16.msra.mxu0 %v2668_v34 }
 0x39e   :  { %v1199_v63 = vadd.f32 %v2260_v6, %v3425_v32  ;;  %2307 = vmatprep.subr.bf16.mxu0 %v2669_v50  ;;  %v1240_v20 = vmax.f32 %v1196_v39, 0.0  ;;  %v2675_v50 = vld [vmem:[#allocation13 + $0x70] sm:$0xff]  }
 0x3a0   :  { %v1241_v45 = vmax.f32 %v1199_v63, 0.0  ;;  %v2261_v48 = vpop.f32.mrb[32].mxu0  ;;  %v2676_v63 = vld [vmem:[#allocation13 + $0x30] sm:$0xff]  }
 0x3a1   :  { %v2262_v37 = vpop.f32.mrb[33].mxu0  ;;  %2308 = vmatpush3.bf16.msra.mxu0 %v2670_v60 }
 0x3a2   :  { %v2263_v44 = vadd.f32 %v2262_v37, %v2261_v48  ;;  %v2264_v58 = vpop.f32.mrb[34].mxu0  ;;  %v1253_v40 = vpack.c.bf16 %v1241_v45, %v1240_v20  ;;  %2309 = vmatprep.subr.bf16.mxu0 %v2671_v55  ;;  %v2677_v48 = vld [vmem:[#allocation13 + $0x78] sm:$0xff]  }
 0x3a3   :  { %v2265_v7 = vpop.f32.mrb[35].mxu0 }
 0x3a4   :  { %v1204_v13 = vadd.f32 %v2263_v44, %v3425_v32  ;;  %v2266_v34 = vadd.f32 %v2265_v7, %v2264_v58  ;;  %2434 = vmatmul.mubr.bf16.gmra.mrb[52].mxu0 %v1253_v40  ;;  %v2678_v58 = vld [vmem:[#allocation13 + $0x38] sm:$0xff]  }
 0x3a5   :  { %2310 = vmatpush3.bf16.msra.mxu0 %v2672_v0 }
 0x3a6   :  { %v1207_v42 = vadd.f32 %v2266_v34, %v3425_v32  ;;  %2311 = vmatprep.subr.bf16.mxu0 %v2673_v49  ;;  %v1242_v52 = vmax.f32 %v1204_v13, 0.0 }
 0x3a8   :  { %v1243_v39 = vmax.f32 %v1207_v42, 0.0  ;;  %v2267_v6 = vpop.f32.mrb[36].mxu0 }
 0x3a9   :  { %v2268_v60 = vpop.f32.mrb[37].mxu0  ;;  %2312 = vmatpush3.bf16.msra.mxu0 %v2674_v23 }
 0x3aa   :  { %v2269_v20 = vadd.f32 %v2268_v60, %v2267_v6  ;;  %v2270_v55 = vpop.f32.mrb[38].mxu0  ;;  %v1254_v45 = vpack.c.bf16 %v1243_v39, %v1242_v52  ;;  %2313 = vmatprep.subr.bf16.mxu0 %v2675_v50 }
 0x3ab   :  { %v2271_v37 = vpop.f32.mrb[39].mxu0 }
 0x3ac   :  { %v1212_v44 = vadd.f32 %v2269_v20, %v3425_v32  ;;  %v2272_v0 = vadd.f32 %v2271_v37, %v2270_v55  ;;  %2437 = vmatprep.mubr.bf16.mxu0 %v1254_v45 }
 0x3ad   :  { %2314 = vmatpush3.bf16.msra.mxu0 %v2676_v63 }
 0x3ae   :  { %v1215_v40 = vadd.f32 %v2272_v0, %v3425_v32  ;;  %2315 = vmatprep.subr.bf16.mxu0 %v2677_v48  ;;  %v1244_v49 = vmax.f32 %v1212_v44, 0.0 }
 0x3b0   :  { %v1245_v7 = vmax.f32 %v1215_v40, 0.0  ;;  %v2273_v13 = vpop.f32.mrb[40].mxu0 }
 0x3b1   :  { %v2274_v34 = vpop.f32.mrb[41].mxu0  ;;  %2316 = vmatpush3.bf16.msra.mxu0 %v2678_v58 }
 0x3b2   :  { %v2275_v23 = vadd.f32 %v2274_v34, %v2273_v13  ;;  %v2276_v42 = vpop.f32.mrb[42].mxu0  ;;  %v1255_v52 = vpack.c.bf16 %v1245_v7, %v1244_v49  ;;  %2445 = vmatprep.subr.bf16.mxu0 %v3491_v21 }
 0x3b3   :  { %v2277_v50 = vpop.f32.mrb[43].mxu0 }
 0x3b4   :  { %v1220_v39 = vadd.f32 %v2275_v23, %v3425_v32  ;;  %v2278_v6 = vadd.f32 %v2277_v50, %v2276_v42  ;;  %2438 = vmatmul.mubr.bf16.gmra.mrb[56].mxu0 %v1255_v52 }
 0x3b6   :  { %v1223_v60 = vadd.f32 %v2278_v6, %v3425_v32  ;;  %v1246_v63 = vmax.f32 %v1220_v39, 0.0  ;;  %v3545_v6 = vld [vmem:[%s3677_s9] ss:$0 sm:$0xff] }
 0x3b8   :  { %v1247_v20 = vmax.f32 %v1223_v60, 0.0  ;;  %v2279_v55 = vpop.f32.mrb[44].mxu0 }
 0x3b9   :  { %v2280_v45 = vpop.f32.mrb[45].mxu0 }
 0x3ba   :  { %v2281_v48 = vadd.f32 %v2280_v45, %v2279_v55  ;;  %v2282_v37 = vpop.f32.mrb[46].mxu0  ;;  %v1256_v44 = vpack.c.bf16 %v1247_v20, %v1246_v63 }
 0x3bb   :  { %v2283_v0 = vpop.f32.mrb[47].mxu0 }
 0x3bc   :  { %v1228_v58 = vadd.f32 %v2281_v48, %v3425_v32  ;;  %v2284_v40 = vadd.f32 %v2283_v0, %v2282_v37  ;;  %2441 = vmatprep.mubr.bf16.mxu0 %v1256_v44 }
 0x3be   :  { %v1231_v49 = vadd.f32 %v2284_v40, %v3425_v32  ;;  %v1248_v7 = vmax.f32 %v1228_v58, 0.0 }
 0x3c0   :  { %v1249_v13 = vmax.f32 %v1231_v49, 0.0 }
 0x3c2   :  { %v1257_v34 = vpack.c.bf16 %v1249_v13, %v1248_v7 }
 0x3c4   :  { %2442 = vmatmul.mubr.bf16.gmra.mrb[60].mxu0 %v1257_v34 }
 0x3c5   :  { %1553 = vmatprep.mubr.bf16.mxu0 %v1410_v15  ;;  %v3687_v15 = vpack.c.bf16 %v3372_v9, %v3366_v59  ;;  %v3520_v59 = vld [vmem:[#allocation14 + $0xb0] ss:$12 sps:$4 sm:$0xff]  }
 0x3cc   :  { %1554 = vmatmul.mubr.bf16.vlgmr.msra.gmra.mrb[64].mxu0 %v1409_v12  ;;  %v2682_v12 = vld [vmem:[#allocation14 + $0x18] ss:$12 sps:$4 sm:$0xff]  }
 0x3cd   :  { %1561 = vmatprep.mubr.bf16.mxu0 %v1412_v41  ;;  %1806 = vmatpush1.bf16.msra.mxu1 %v2682_v12  ;;  %v3690_v41 = vpack.c.bf16 %v3389_v29, %v3383_v14 }
 0x3ce   :  { %1807 = vmatprep.subr.bf16.mxu1 %v2687_v30  ;;  %2446 = vmatpush3.bf16.msra.mxu0 %v3491_v21 }
 0x3cf   :  { %2447 = vmatprep.subr.bf16.mxu0 %v3493_v35 }
 0x3d1   :  { %1808 = vmatpush1.bf16.msra.mxu1 %v2685_v28 }
 0x3d2   :  { %2448 = vmatpush3.bf16.msra.mxu0 %v3493_v35 }
 0x3d3   :  { %2449 = vmatprep.subr.bf16.mxu0 %v3499_v46 }
 0x3d4   :  { %1562 = vmatmul.mubr.bf16.gmra.mrb[68].mxu0 %v1411_v33  ;;  %v2690_v33 = vld [vmem:[#allocation14 + $0x4c] ss:$12 sps:$4 sm:$0xff]  }
 0x3d5   :  { %1569 = vmatprep.mubr.bf16.mxu0 %v1414_v5  ;;  %1809 = vmatprep.subr.bf16.mxu1 %v2690_v33  ;;  %v2696_v5 = vld [vmem:[#allocation14 + $0x7c] ss:$12 sps:$4 sm:$0xff]  }
 0x3d6   :  { %1810 = vmatpush1.bf16.msra.mxu1 %v2688_v47  ;;  %2450 = vmatpush3.bf16.msra.mxu0 %v3499_v46 }
 0x3d7   :  { %2451 = vmatprep.subr.bf16.mxu0 %v3503_v17 }
 0x3da   :  { %2452 = vmatpush3.bf16.msra.mxu0 %v3503_v17 }
 0x3db   :  { %2453 = vmatprep.subr.bf16.mxu0 %v3507_v22 }
 0x3dc   :  { %1570 = vmatmul.mubr.bf16.gmra.mrb[72].mxu0 %v1413_v4  ;;  %v2693_v4 = vld [vmem:[#allocation14 + $0x64] ss:$12 sps:$4 sm:$0xff]  }
 0x3dd   :  { %1577 = vmatprep.mubr.bf16.mxu0 %v1416_v11  ;;  %1811 = vmatprep.subr.bf16.mxu1 %v2693_v4  ;;  %v2701_v11 = vld [vmem:[#allocation14 + $0x94] ss:$12 sps:$4 sm:$0xff]  }
 0x3de   :  { %1812 = vmatpush1.bf16.msra.mxu1 %v2691_v57  ;;  %2454 = vmatpush3.bf16.msra.mxu0 %v3507_v22 }
 0x3df   :  { %1813 = vmatprep.subr.bf16.mxu1 %v2696_v5 }
 0x3e2   :  { %1814 = vmatpush1.bf16.msra.mxu1 %v2694_v25 }
 0x3e3   :  { %1815 = vmatprep.subr.bf16.mxu1 %v2701_v11 }
 0x3e4   :  { %1578 = vmatmul.mubr.bf16.gmra.mrb[76].mxu0 %v1415_v2  ;;  %v2699_v2 = vld [vmem:[#allocation14 + $0x90] ss:$12 sps:$4 sm:$0xff]  }
 0x3e5   :  { %1585 = vmatprep.mubr.bf16.mxu0 %v1418_v43  ;;  %v3511_v43 = vld [vmem:[#allocation14 + $0x80] ss:$12 sps:$4 sm:$0xff]  }
 0x3e6   :  { %1816 = vmatpush1.bf16.msra.mxu1 %v2699_v2  ;;  %2455 = vmatprep.subr.bf16.mxu0 %v3511_v43 }
 0x3e7   :  { %1817 = vmatprep.subr.bf16.mxu1 %v2706_v31  ;;  %2456 = vmatpush3.bf16.msra.mxu0 %v3511_v43 }
 0x3e8   :  { %2457 = vmatprep.subr.bf16.mxu0 %v3516_v54 }
 0x3ea   :  { %1818 = vmatpush1.bf16.msra.mxu1 %v2704_v27 }
 0x3eb   :  { %2477 = vmatprep.subr.bf16.mxu1 %v3491_v21  ;;  %2458 = vmatpush3.bf16.msra.mxu0 %v3516_v54 }
 0x3ec   :  { %1586 = vmatmul.mubr.bf16.gmra.mrb[80].mxu0 %v3686_v8  ;;  %2459 = vmatprep.subr.bf16.mxu0 %v3520_v59 }
 0x3ed   :  { %1593 = vmatprep.mubr.bf16.mxu0 %v3687_v15 }
 0x3ef   :  { %2460 = vmatpush3.bf16.msra.mxu0 %v3520_v59 }
 0x3f4   :  { %1594 = vmatmul.mubr.bf16.gmra.mrb[84].mxu0 %v3688_v19 }
 0x3f5   :  { %1601 = vmatprep.mubr.bf16.mxu0 %v3689_v26 }
 0x3fc   :  { %1602 = vmatmul.mubr.bf16.gmra.mrb[88].mxu0 %v3690_v41 }
 0x3fd   :  { %1609 = vmatprep.mubr.bf16.mxu0 %v3691_v51 }
 0x404   :  { %1610 = vmatmul.mubr.bf16.gmra.mrb[92].mxu0 %v3692_v53 }
 0x467   :  { %v2431_v61 = vpop.f32.mrb[48].mxu0 }
 0x468   :  { %v1346_v9 = vpop.f32.mrb[49].mxu0  ;;  %v1355_v13 = vadd.f32 %v2431_v61, %v3545_v6 }
 0x469   :  { %v2432_v14 = vpop.f32.mrb[50].mxu0  ;;  %v1347_v20 = vadd.f32 %v3545_v6, %v1346_v9 }
 0x46a   :  { %v1349_v18 = vpop.f32.mrb[51].mxu0  ;;  %v1358_v8 = vadd.f32 %v2432_v14, %v3545_v6 }
 0x46b   :  { %v1350_v37 = vadd.f32 %v3545_v6, %v1349_v18 }
 0x477   :  { %v2435_v29 = vpop.f32.mrb[52].mxu0 }
 0x478   :  { %v1362_v36 = vpop.f32.mrb[53].mxu0  ;;  %v1371_v2 = vadd.f32 %v2435_v29, %v3545_v6 }
 0x479   :  { %v3524_v24 = vpop.f32.mrb[54].mxu0  ;;  %v1363_v33 = vadd.f32 %v3545_v6, %v1362_v36 }
 0x47a   :  { %v1365_v56 = vpop.f32.mrb[55].mxu0  ;;  %v1374_v31 = vadd.f32 %v3524_v24, %v3545_v6 }
 0x47b   :  { %v1366_v53 = vadd.f32 %v3545_v6, %v1365_v56 }
 0x487   :  { %v3526_v10 = vpop.f32.mrb[56].mxu0 }
 0x488   :  { %v3528_v16 = vpop.f32.mrb[57].mxu0 }
 0x489   :  { %v3530_v32 = vpop.f32.mrb[58].mxu0  ;;  %v1379_v36 = vadd.f32 %v3545_v6, %v3528_v16 }
 0x48a   :  { %v3532_v23 = vpop.f32.mrb[59].mxu0 }
 0x497   :  { %v3534_v42 = vpop.f32.mrb[60].mxu0 }
 0x498   :  { %v3536_v52 = vpop.f32.mrb[61].mxu0 }
 0x499   :  { %v3538_v50 = vpop.f32.mrb[62].mxu0 }
 0x49a   :  { %v3540_v39 = vpop.f32.mrb[63].mxu0 }
 0x49f   :  { %v2317_v60 = vpop.f32.mrb[64].mxu0 }
 0x4a0   :  { %v2318_v63 = vpop.f32.mrb[65].mxu0 }
 0x4a1   :  { %v2319_v55 = vadd.f32 %v2318_v63, %v2317_v60  ;;  %v2320_v45 = vpop.f32.mrb[66].mxu0 }
 0x4a2   :  { %v2321_v48 = vpop.f32.mrb[67].mxu0 }
 0x4a3   :  { %v1556_v44 = vadd.f32 %v2319_v55, %v1347_v20  ;;  %v2322_v0 = vadd.f32 %v2321_v48, %v2320_v45  ;;  %v1387_v48 = vadd.f32 %v3526_v10, %v3545_v6 }
 0x4a5   :  { %v1559_v58 = vadd.f32 %v2322_v0, %v1350_v37 }
 0x4a7   :  { %v1618_v40 = vpack.c.bf16 %v1559_v58, %v1556_v44  ;;  %v2323_v49 = vpop.f32.mrb[68].mxu0 }
 0x4a8   :  { %v2324_v7 = vpop.f32.mrb[69].mxu0 }
 0x4a9   :  { %v2325_v34 = vadd.f32 %v2324_v7, %v2323_v49  ;;  %v2326_v62 = vpop.f32.mrb[70].mxu0  ;;  %1836 = vmatmul.mubr.bf16.vlgmr.msra.gmra.mrb[32].mxu1 %v1618_v40  ;;  %2461 = vmatprep.mubr.bf16.mxu0 %v1618_v40 }
 0x4aa   :  { %2485 = vmatpush3.bf16.msra.mxu1 %v3491_v21  ;;  %v2327_v1 = vpop.f32.mrb[71].mxu0  ;;  %1845 = vmatprep.mubr.bf16.mxu1 %v3693_v3 }
 0x4ab   :  { %v1564_v12 = vadd.f32 %v2325_v34, %v1355_v13  ;;  %v2328_v15 = vadd.f32 %v2327_v1, %v2326_v62  ;;  %2478 = vmatprep.subr.bf16.mxu1 %v3493_v35  ;;  %v1395_v13 = vadd.f32 %v3545_v6, %v3536_v52  ;;  %v1398_v1 = vadd.f32 %v3545_v6, %v3540_v39 }
 0x4ad   :  { %v1567_v19 = vadd.f32 %v2328_v15, %v1358_v8 }
 0x4ae   :  { %2486 = vmatpush3.bf16.msra.mxu1 %v3493_v35 }
 0x4af   :  { %v2329_v26 = vpop.f32.mrb[72].mxu0  ;;  %v1619_v28 = vpack.c.bf16 %v1567_v19, %v1564_v12  ;;  %2479 = vmatprep.subr.bf16.mxu1 %v3499_v46 }
 0x4b0   :  { %v2330_v30 = vpop.f32.mrb[73].mxu0 }
 0x4b1   :  { %v2331_v41 = vadd.f32 %v2330_v30, %v2329_v26  ;;  %v2332_v47 = vpop.f32.mrb[74].mxu0  ;;  %1846 = vmatmul.mubr.bf16.gmra.mrb[36].mxu1 %v1619_v28  ;;  %2462 = vmatmul.mubr.bf16.vlgmr.msra.gmra.mrb[96].mxu0 %v1619_v28  ;;  %v1403_v28 = vadd.f32 %v3534_v42, %v3545_v6  ;;  %v1658_v42 = vld [vmem:[%s3680_s12] sm:$0x7]  ;;  %s2936_s12 = smov [#allocation16]  }
 0x4b2   :  { %v2333_v51 = vpop.f32.mrb[75].mxu0  ;;  %1855 = vmatprep.mubr.bf16.mxu1 %v3693_v3  ;;  %2487 = vmatpush3.bf16.msra.mxu1 %v3499_v46  ;;  %s2066_s1 = sshll.u32 %s2936_s12, 4  ;;  %s2067_s1 = int_to_ptr.vmem [resolvable:$true] %s2066_s1 }
 0x4b3   :  { %v1572_v57 = vadd.f32 %v2331_v41, %v1363_v33  ;;  %v2334_v4 = vadd.f32 %v2333_v51, %v2332_v47  ;;  %2480 = vmatprep.subr.bf16.mxu1 %v3503_v17  ;;  %v1406_v41 = vadd.f32 %v3538_v50, %v3545_v6  ;;  %s2887_s29 = scalar_lea.vmem %s2067_s1, 6144  ;;  %p2892_p9 = scmp.lt.s32.totalorder %s2067_s1, %s2067_s1 }
 0x4b4   :  { %p2888_p8 = scmp.ne.s32.totalorder %s2067_s1, %s2887_s29  ;;  %p2893_p10 = scmp.lt.s32.totalorder %s2887_s29, %s2887_s29 }
 0x4b5   :  { %v1575_v5 = vadd.f32 %v2334_v4, %v1366_v53 }
 0x4b6   :  { %2488 = vmatpush3.bf16.msra.mxu1 %v3503_v17  ;;  %p2894_p11 = por %p2893_p10, %p2892_p9 }
 0x4b7   :  { %v2335_v21 = vpop.f32.mrb[76].mxu0  ;;  %v1620_v25 = vpack.c.bf16 %v1575_v5, %v1572_v57  ;;  %2481 = vmatprep.subr.bf16.mxu1 %v3507_v22  ;;  %v3694_v57 = vsub.s32 0, %v3247_v38 }
 0x4b8   :  { %v2336_v35 = vpop.f32.mrb[77].mxu0  ;;  %p2895_p12 = pnand %p2894_p11, %p2888_p8 }
 0x4b9   :  { %v2337_v11 = vadd.f32 %v2336_v35, %v2335_v21  ;;  %v2338_v27 = vpop.f32.mrb[78].mxu0  ;;  %1856 = vmatmul.mubr.bf16.gmra.mrb[40].mxu1 %v1620_v25  ;;  %2465 = vmatprep.mubr.bf16.mxu0 %v1620_v25  ;;  %v3599_v4 = vrot.slane %v1658_v42, %v3694_v57  ;;  %v1670_v25 = vsub.s32 2, %v3247_v38 }
 0x4ba   :  { %v2339_v46 = vpop.f32.mrb[79].mxu0  ;;  %1865 = vmatprep.mubr.bf16.mxu1 %v3693_v3  ;;  %2489 = vmatpush3.bf16.msra.mxu1 %v3507_v22 }
 0x4bb   :  { %v1580_v17 = vadd.f32 %v2337_v11, %v1371_v2  ;;  %v2340_v61 = vadd.f32 %v2339_v46, %v2338_v27  ;;  %2482 = vmatprep.subr.bf16.mxu1 %v3511_v43 }
 0x4bd   :  { %v1583_v9 = vadd.f32 %v2340_v61, %v1374_v31  ;;  %v3610_v31 = vrot.slane %v1658_v42, %v1670_v25 }
 0x4be   :  { %2490 = vmatpush3.bf16.msra.mxu1 %v3511_v43  ;;  %v1382_v43 = vadd.f32 %v3545_v6, %v3532_v23  ;;  %v1390_v23 = vadd.f32 %v3530_v32, %v3545_v6 }
 0x4bf   :  { %v2341_v14 = vpop.f32.mrb[80].mxu0  ;;  %v1621_v18 = vpack.c.bf16 %v1583_v9, %v1580_v17  ;;  %2483 = vmatprep.subr.bf16.mxu1 %v3516_v54 }
 0x4c0   :  { %v2342_v29 = vpop.f32.mrb[81].mxu0 }
 0x4c1   :  { %v2343_v56 = vadd.f32 %v2342_v29, %v2341_v14  ;;  %v2344_v22 = vpop.f32.mrb[82].mxu0  ;;  %1866 = vmatmul.mubr.bf16.gmra.mrb[44].mxu1 %v1621_v18  ;;  %2466 = vmatmul.mubr.bf16.gmra.mrb[100].mxu0 %v1621_v18 }
 0x4c2   :  { %v2345_v24 = vpop.f32.mrb[83].mxu0  ;;  %1875 = vmatprep.mubr.bf16.mxu1 %v3693_v3  ;;  %2491 = vmatpush3.bf16.msra.mxu1 %v3516_v54 }
 0x4c3   :  { %v1588_v60 = vadd.f32 %v2343_v56, %v1379_v36  ;;  %v2346_v63 = vadd.f32 %v2345_v24, %v2344_v22  ;;  %2484 = vmatprep.subr.bf16.mxu1 %v3520_v59 }
 0x4c5   :  { %v1591_v20 = vadd.f32 %v2346_v63, %v1382_v43 }
 0x4c6   :  { %2492 = vmatpush3.bf16.msra.mxu1 %v3520_v59 }
 0x4c7   :  { %v2347_v16 = vpop.f32.mrb[84].mxu0  ;;  %v1622_v55 = vpack.c.bf16 %v1591_v20, %v1588_v60 }
 0x4c8   :  { %v2348_v45 = vpop.f32.mrb[85].mxu0 }
 0x4c9   :  { %v2349_v37 = vadd.f32 %v2348_v45, %v2347_v16  ;;  %v2350_v44 = vpop.f32.mrb[86].mxu0  ;;  %1876 = vmatmul.mubr.bf16.gmra.mrb[48].mxu1 %v1622_v55 }
 0x4ca   :  { %v2351_v54 = vpop.f32.mrb[87].mxu0  ;;  %1885 = vmatprep.mubr.bf16.mxu1 %v3693_v3 }
 0x4cb   :  { %v1596_v0 = vadd.f32 %v2349_v37, %v1387_v48  ;;  %v2352_v58 = vadd.f32 %v2351_v54, %v2350_v44 }
 0x4cd   :  { %v1599_v40 = vadd.f32 %v2352_v58, %v1390_v23 }
 0x4cf   :  { %v2353_v49 = vpop.f32.mrb[88].mxu0  ;;  %v1623_v59 = vpack.c.bf16 %v1599_v40, %v1596_v0 }
 0x4d0   :  { %v2354_v7 = vpop.f32.mrb[89].mxu0 }
 0x4d1   :  { %v2355_v34 = vadd.f32 %v2354_v7, %v2353_v49  ;;  %v2356_v10 = vpop.f32.mrb[90].mxu0  ;;  %1886 = vmatmul.mubr.bf16.gmra.mrb[52].mxu1 %v1623_v59 }
 0x4d2   :  { %v2357_v62 = vpop.f32.mrb[91].mxu0  ;;  %1895 = vmatprep.mubr.bf16.mxu1 %v3693_v3 }
 0x4d3   :  { %v1604_v8 = vadd.f32 %v2355_v34, %v1395_v13  ;;  %v2358_v32 = vadd.f32 %v2357_v62, %v2356_v10 }
 0x4d5   :  { %v1607_v12 = vadd.f32 %v2358_v32, %v1398_v1 }
 0x4d7   :  { %v2359_v15 = vpop.f32.mrb[92].mxu0  ;;  %v1624_v19 = vpack.c.bf16 %v1607_v12, %v1604_v8 }
 0x4d8   :  { %v2360_v26 = vpop.f32.mrb[93].mxu0 }
 0x4d9   :  { %v2361_v30 = vadd.f32 %v2360_v26, %v2359_v15  ;;  %v2362_v52 = vpop.f32.mrb[94].mxu0  ;;  %1896 = vmatmul.mubr.bf16.gmra.mrb[56].mxu1 %v1624_v19 }
 0x4da   :  { %v2363_v33 = vpop.f32.mrb[95].mxu0  ;;  %1905 = vmatprep.mubr.bf16.mxu1 %v3693_v3  ;;  %v3695_v3 = vsub.s32 1, %v3247_v38 }
 0x4db   :  { %v1612_v47 = vadd.f32 %v2361_v30, %v1403_v28  ;;  %v2364_v39 = vadd.f32 %v2363_v33, %v2362_v52 }
 0x4dc   :  { %v3603_v50 = vrot.slane %v1658_v42, %v3695_v3 }
 0x4dd   :  { %v1615_v51 = vadd.f32 %v2364_v39, %v1406_v41 }
 0x4df   :  { %v1625_v53 = vpack.c.bf16 %v1615_v51, %v1612_v47 }
 0x4e1   :  { %1906 = vmatmul.mubr.bf16.gmra.mrb[60].mxu1 %v1625_v53 }
 0x4e2   :  { %2469 = vmatprep.mubr.bf16.mxu1 %v1622_v55 }
 0x4e9   :  { %2470 = vmatmul.mubr.bf16.vlgmr.msra.gmra.mrb[64].mxu1 %v1623_v59 }
 0x4ea   :  { %2473 = vmatprep.mubr.bf16.mxu1 %v1624_v19 }
 0x4f1   :  { %2474 = vmatmul.mubr.bf16.gmra.mrb[68].mxu1 %v1625_v53 }
 0x57c   :  { %v1837_v6 = vpop.f32.mrb[32].mxu1 }
 0x57d   :  { %v1838_v5 = vadd.f32 %v1837_v6, %v3599_v4  ;;  %v1839_v21 = vpop.f32.mrb[33].mxu1 }
 0x57e   :  { %v1840_v35 = vadd.f32 %v1839_v21, %v3603_v50  ;;  %v1841_v2 = vpop.f32.mrb[34].mxu1 }
 0x57f   :  { %2013 = vst [vmem:[#allocation16] sm:$0xff] %v1838_v5  ;;  %v1842_v11 = vadd.f32 %v1841_v2, %v3599_v4  ;;  %v1843_v27 = vpop.f32.mrb[35].mxu1 }
 0x580   :  { %2014 = vst [vmem:[#allocation16 + $0x8] sm:$0xff] %v1840_v35  ;;  %v1844_v46 = vadd.f32 %v1843_v27, %v3603_v50 }
 0x581   :  { %2016 = vst [vmem:[#allocation16 + $0x18] sm:$0xff] %v1842_v11 }
 0x582   :  { %2017 = vst [vmem:[#allocation16 + $0x20] sm:$0xff] %v1844_v46 }
 0x584   :  { %v1847_v17 = vpop.f32.mrb[36].mxu1  ;;  %v2463_v61 = vpop.f32.mrb[96].mxu0 }
 0x585   :  { %v1848_v9 = vadd.f32 %v1847_v17, %v3599_v4  ;;  %v1959_v38 = vadd.f32 %v2463_v61, %v3610_v31  ;;  %v1849_v14 = vpop.f32.mrb[37].mxu1  ;;  %v1950_v18 = vpop.f32.mrb[97].mxu0 }
 0x586   :  { %v1850_v29 = vadd.f32 %v1849_v14, %v3603_v50  ;;  %v1951_v36 = vadd.f32 %v1950_v18, %v3610_v31  ;;  %v1851_v56 = vpop.f32.mrb[38].mxu1  ;;  %v2464_v22 = vpop.f32.mrb[98].mxu0 }
 0x587   :  { %2019 = vst [vmem:[#allocation16 + $0x30] sm:$0xff] %v1848_v9  ;;  %2021 = vst [vmem:[#allocation16 + $0x40] sm:$0xff] %v1959_v38  ;;  %v1852_v24 = vadd.f32 %v1851_v56, %v3599_v4  ;;  %v1962_v43 = vadd.f32 %v2464_v22, %v3610_v31  ;;  %v1853_v60 = vpop.f32.mrb[39].mxu1  ;;  %v1953_v63 = vpop.f32.mrb[99].mxu0 }
 0x588   :  { %2020 = vst [vmem:[#allocation16 + $0x38] sm:$0xff] %v1850_v29  ;;  %2015 = vst [vmem:[#allocation16 + $0x10] sm:$0xff] %v1951_v36  ;;  %v1854_v20 = vadd.f32 %v1853_v60, %v3603_v50  ;;  %v1954_v16 = vadd.f32 %v1953_v63, %v3610_v31 }
 0x589   :  { %2022 = vst [vmem:[#allocation16 + $0x48] sm:$0xff] %v1852_v24  ;;  %2024 = vst [vmem:[#allocation16 + $0x58] sm:$0xff] %v1962_v43 }
 0x58a   :  { %2023 = vst [vmem:[#allocation16 + $0x50] sm:$0xff] %v1854_v20  ;;  %2018 = vst [vmem:[#allocation16 + $0x28] sm:$0xff] %v1954_v16 }
 0x58c   :  { %v1857_v55 = vpop.f32.mrb[40].mxu1 }
 0x58d   :  { %v1858_v45 = vadd.f32 %v1857_v55, %v3599_v4  ;;  %v1859_v48 = vpop.f32.mrb[41].mxu1 }
 0x58e   :  { %v1860_v37 = vadd.f32 %v1859_v48, %v3603_v50  ;;  %v1861_v44 = vpop.f32.mrb[42].mxu1 }
 0x58f   :  { %2025 = vst [vmem:[#allocation16 + $0x60] sm:$0xff] %v1858_v45  ;;  %v1862_v54 = vadd.f32 %v1861_v44, %v3599_v4  ;;  %v1863_v23 = vpop.f32.mrb[43].mxu1 }
 0x590   :  { %2026 = vst [vmem:[#allocation16 + $0x68] sm:$0xff] %v1860_v37  ;;  %v1864_v0 = vadd.f32 %v1863_v23, %v3603_v50 }
 0x591   :  { %2028 = vst [vmem:[#allocation16 + $0x78] sm:$0xff] %v1862_v54 }
 0x592   :  { %2029 = vst [vmem:[#allocation16 + $0x80] sm:$0xff] %v1864_v0 }
 0x594   :  { %v1867_v58 = vpop.f32.mrb[44].mxu1  ;;  %v2467_v40 = vpop.f32.mrb[100].mxu0 }
 0x595   :  { %v1868_v49 = vadd.f32 %v1867_v58, %v3599_v4  ;;  %v1975_v59 = vadd.f32 %v2467_v40, %v3610_v31  ;;  %v1869_v7 = vpop.f32.mrb[45].mxu1  ;;  %v1966_v13 = vpop.f32.mrb[101].mxu0 }
 0x596   :  { %v1870_v34 = vadd.f32 %v1869_v7, %v3603_v50  ;;  %v1967_v10 = vadd.f32 %v1966_v13, %v3610_v31  ;;  %v1871_v62 = vpop.f32.mrb[46].mxu1  ;;  %v2468_v1 = vpop.f32.mrb[102].mxu0 }
 0x597   :  { %2031 = vst [vmem:[#allocation16 + $0x90] sm:$0xff] %v1868_v49  ;;  %2033 = vst [vmem:[#allocation16 + $0xa0] sm:$0xff] %v1975_v59  ;;  %v1872_v8 = vadd.f32 %v1871_v62, %v3599_v4  ;;  %v1978_v32 = vadd.f32 %v2468_v1, %v3610_v31  ;;  %v1873_v12 = vpop.f32.mrb[47].mxu1  ;;  %v1969_v15 = vpop.f32.mrb[103].mxu0 }
 0x598   :  { %2032 = vst [vmem:[#allocation16 + $0x98] sm:$0xff] %v1870_v34  ;;  %2027 = vst [vmem:[#allocation16 + $0x70] sm:$0xff] %v1967_v10  ;;  %v1874_v19 = vadd.f32 %v1873_v12, %v3603_v50  ;;  %v1970_v26 = vadd.f32 %v1969_v15, %v3610_v31 }
 0x599   :  { %2034 = vst [vmem:[#allocation16 + $0xa8] sm:$0xff] %v1872_v8  ;;  %2036 = vst [vmem:[#allocation16 + $0xb8] sm:$0xff] %v1978_v32 }
 0x59a   :  { %2035 = vst [vmem:[#allocation16 + $0xb0] sm:$0xff] %v1874_v19  ;;  %2030 = vst [vmem:[#allocation16 + $0x88] sm:$0xff] %v1970_v26 }
 0x59c   :  { %v1877_v28 = vpop.f32.mrb[48].mxu1 }
 0x59d   :  { %v1878_v30 = vadd.f32 %v1877_v28, %v3599_v4  ;;  %v1879_v52 = vpop.f32.mrb[49].mxu1 }
 0x59e   :  { %v1880_v33 = vadd.f32 %v1879_v52, %v3603_v50  ;;  %v1881_v41 = vpop.f32.mrb[50].mxu1 }
 0x59f   :  { %2037 = vst [vmem:[#allocation16 + $0xc0] sm:$0xff] %v1878_v30  ;;  %v1882_v47 = vadd.f32 %v1881_v41, %v3599_v4  ;;  %v1883_v39 = vpop.f32.mrb[51].mxu1 }
 0x5a0   :  { %2038 = vst [vmem:[#allocation16 + $0xc8] sm:$0xff] %v1880_v33  ;;  %v1884_v51 = vadd.f32 %v1883_v39, %v3603_v50 }
 0x5a1   :  { %2040 = vst [vmem:[#allocation16 + $0xd8] sm:$0xff] %v1882_v47 }
 0x5a2   :  { %2041 = vst [vmem:[#allocation16 + $0xe0] sm:$0xff] %v1884_v51 }
 0x5a4   :  { %v1887_v53 = vpop.f32.mrb[52].mxu1 }
 0x5a5   :  { %v1888_v42 = vadd.f32 %v1887_v53, %v3599_v4  ;;  %v1889_v57 = vpop.f32.mrb[53].mxu1 }
 0x5a6   :  { %v1890_v3 = vadd.f32 %v1889_v57, %v3603_v50  ;;  %v1891_v6 = vpop.f32.mrb[54].mxu1 }
 0x5a7   :  { %2043 = vst [vmem:[#allocation16 + $0xf0] sm:$0xff] %v1888_v42  ;;  %v1892_v5 = vadd.f32 %v1891_v6, %v3599_v4  ;;  %v1893_v21 = vpop.f32.mrb[55].mxu1 }
 0x5a8   :  { %2044 = vst [vmem:[#allocation16 + $0xf8] sm:$0xff] %v1890_v3  ;;  %v1894_v25 = vadd.f32 %v1893_v21, %v3603_v50 }
 0x5a9   :  { %2046 = vst [vmem:[#allocation16 + $0x108] sm:$0xff] %v1892_v5 }
 0x5aa   :  { %2047 = vst [vmem:[#allocation16 + $0x110] sm:$0xff] %v1894_v25 }
 0x5ac   :  { %v1897_v35 = vpop.f32.mrb[56].mxu1 }
 0x5ad   :  { %v1898_v2 = vadd.f32 %v1897_v35, %v3599_v4  ;;  %v1899_v11 = vpop.f32.mrb[57].mxu1 }
 0x5ae   :  { %v1900_v27 = vadd.f32 %v1899_v11, %v3603_v50  ;;  %v1901_v46 = vpop.f32.mrb[58].mxu1 }
 0x5af   :  { %2049 = vst [vmem:[#allocation16 + $0x120] sm:$0xff] %v1898_v2  ;;  %v1902_v17 = vadd.f32 %v1901_v46, %v3599_v4  ;;  %v1903_v61 = vpop.f32.mrb[59].mxu1 }
 0x5b0   :  { %2050 = vst [vmem:[#allocation16 + $0x128] sm:$0xff] %v1900_v27  ;;  %v1904_v9 = vadd.f32 %v1903_v61, %v3603_v50 }
 0x5b1   :  { %2052 = vst [vmem:[#allocation16 + $0x138] sm:$0xff] %v1902_v17 }
 0x5b2   :  { %2053 = vst [vmem:[#allocation16 + $0x140] sm:$0xff] %v1904_v9 }
 0x5b4   :  { %v1907_v38 = vpop.f32.mrb[60].mxu1 }
 0x5b5   :  { %v1908_v14 = vadd.f32 %v1907_v38, %v3599_v4  ;;  %v1909_v18 = vpop.f32.mrb[61].mxu1 }
 0x5b6   :  { %v1910_v29 = vadd.f32 %v1909_v18, %v3603_v50  ;;  %v1911_v36 = vpop.f32.mrb[62].mxu1 }
 0x5b7   :  { %2055 = vst [vmem:[#allocation16 + $0x150] sm:$0xff] %v1908_v14  ;;  %v1912_v56 = vadd.f32 %v1911_v36, %v3599_v4  ;;  %v1913_v22 = vpop.f32.mrb[63].mxu1 }
 0x5b8   :  { %2056 = vst [vmem:[#allocation16 + $0x158] sm:$0xff] %v1910_v29  ;;  %v1914_v24 = vadd.f32 %v1913_v22, %v3603_v50 }
 0x5b9   :  { %2058 = vst [vmem:[#allocation16 + $0x168] sm:$0xff] %v1912_v56 }
 0x5ba   :  { %2059 = vst [vmem:[#allocation16 + $0x170] sm:$0xff] %v1914_v24 }
 0x5bc   :  { %v2471_v43 = vpop.f32.mrb[64].mxu1 }
 0x5bd   :  { %v1991_v60 = vadd.f32 %v2471_v43, %v3610_v31  ;;  %v1982_v63 = vpop.f32.mrb[65].mxu1 }
 0x5be   :  { %v1983_v20 = vadd.f32 %v1982_v63, %v3610_v31  ;;  %v2472_v16 = vpop.f32.mrb[66].mxu1 }
 0x5bf   :  { %2045 = vst [vmem:[#allocation16 + $0x100] sm:$0xff] %v1991_v60  ;;  %v1994_v55 = vadd.f32 %v2472_v16, %v3610_v31  ;;  %v1985_v45 = vpop.f32.mrb[67].mxu1 }
 0x5c0   :  { %2039 = vst [vmem:[#allocation16 + $0xd0] sm:$0xff] %v1983_v20  ;;  %v1986_v4 = vadd.f32 %v1985_v45, %v3610_v31 }
 0x5c1   :  { %2048 = vst [vmem:[#allocation16 + $0x118] sm:$0xff] %v1994_v55 }
 0x5c2   :  { %2042 = vst [vmem:[#allocation16 + $0xe8] sm:$0xff] %v1986_v4 }
 0x5c4   :  { %v2475_v48 = vpop.f32.mrb[68].mxu1 }
 0x5c5   :  { %v2007_v50 = vadd.f32 %v2475_v48, %v3610_v31  ;;  %v1998_v37 = vpop.f32.mrb[69].mxu1 }
 0x5c6   :  { %v1999_v44 = vadd.f32 %v1998_v37, %v3610_v31  ;;  %v2476_v54 = vpop.f32.mrb[70].mxu1 }
 0x5c7   :  { %2057 = vst [vmem:[#allocation16 + $0x160] sm:$0xff] %v2007_v50  ;;  %v2010_v23 = vadd.f32 %v2476_v54, %v3610_v31  ;;  %v2001_v0 = vpop.f32.mrb[71].mxu1 }
 0x5c8   :  { %2051 = vst [vmem:[#allocation16 + $0x130] sm:$0xff] %v1999_v44  ;;  %v2002_v58 = vadd.f32 %v2001_v0, %v3610_v31 }
 0x5c9   :  { %2060 = vst [vmem:[#allocation16 + $0x178] sm:$0xff] %v2010_v23 }
 0x5ca   :  { %2054 = vst [vmem:[#allocation16 + $0x148] sm:$0xff] %v2002_v58 }
 0x5cb   :  { %2898 = shalt.err (!%p2895_p12)
}
 0x5cc   :  { %s2899_s30 = scalar_lea.hbm %s3681_s13, 6144 }
 0x5cd   :  { %p2900_p13 = scmp.ne.s32.totalorder %s3681_s13, %s2899_s30  ;;  %p2903_p0 = scmp.lt.u32.totalorder %s2899_s30, %s3681_s13 }
 0x5cf   :  { %p2905_p1 = pnand %p2903_p0, %p2900_p13 }
 0x5d1   :  { %2908 = shalt.err (!%p2905_p1)
}
 0x5d2   :  { %s2937_s16 = smov 384   ;;  %s2938_s20 = smov 24  }
 0x5d3   :  { %2072 = dma.vmem_to_hbm [thread:$0]  %s2067_s1, 6144, %s3681_s13, [#allocation4], %s2937_s16, %s2937_s16, %s2938_s20  }
 0x5d4   :  { %2919 = dma.done.wait [#allocation4], 6144  }
 0x5d5   :  { %2920 = vsyncadd [#allocation4], 4294961152 }
 0x5d6   :  { %2076 = vsyncpa [#allocation3], 1 }
 0x5d7   :  { %2077 = vsyncpa [#allocation6], 1 }
 0x5d8   :  { %2078 = vsyncpa [#allocation9], 1 }
 0x5d9   :  { %2079 = vsyncpa [#allocation12], 1 }
 0x5da   :  { %2080 = vsyncpa [#allocation15], 1 }
 0x5db   :  { %2081 = vsyncpa [#allocation4], 1 }

// kernel: tpu_custom_call.1
= control target key start
LH: loop header
LB: loop body
LE: loop exit
PB: predicated region body
PF: predicated region fallthrough
CT: control target
= control target key end

     0   :  { %18 = vsyncpa [#allocation3], 0  ;;  %s3668_s0 = inlined_call_operand.hbm [shape: bf16[128,128], index: 0, kind: input, shape index: {}]   ;;  %s3669_s1 = inlined_call_operand.hbm [shape: bf16[128,128], index: 1, kind: input, shape index: {}]   ;;  %s3670_s2 = inlined_call_operand.vmem [shape: f32[1,128], index: 2, kind: input, shape index: {}]   ;;  %s3671_s3 = inlined_call_operand.hbm [shape: bf16[128,256], index: 3, kind: input, shape index: {}]   ;;  %s3672_s4 = inlined_call_operand.vmem [shape: f32[1,256], index: 4, kind: input, shape index: {}]   ;;  %s3673_s5 = inlined_call_operand.hbm [shape: bf16[128,256], index: 5, kind: input, shape index: {}]   ;;  %s3674_s6 = inlined_call_operand.hbm [shape: bf16[256,128], index: 6, kind: input, shape index: {}]   ;;  %s3675_s7 = inlined_call_operand.vmem [shape: f32[1,128], index: 7, kind: input, shape index: {}]   ;;  %s3676_s8 = inlined_call_operand.hbm [shape: bf16[128,128], index: 8, kind: input, shape index: {}]   ;;  %s3677_s9 = inlined_call_operand.vmem [shape: f32[1,128], index: 9, kind: input, shape index: {}]   ;;  %s3678_s10 = inlined_call_operand.hbm [shape: bf16[256,128], index: 10, kind: input, shape index: {}]   ;;  %s3679_s11 = inlined_call_operand.hbm [shape: bf16[128,384], index: 11, kind: input, shape index: {}]   ;;  %s3680_s12 = inlined_call_operand.vmem [shape: f32[1,384], index: 12, kind: input, shape index: {}]   ;;  %s3681_s13 = inlined_call_operand.hbm [shape: f32[128,384], index: 13, kind: output, shape index: {}]  }
   0x1   :  { %19 = vsyncpa [#allocation6], 0 }
   0x2   :  { %20 = vsyncpa [#allocation9], 0 }
   0x3   :  { %21 = vsyncpa [#allocation12], 0 }
   0x4   :  { %22 = vsyncpa [#allocation15], 0 }
   0x5   :  { %23 = vsyncpa [#allocation4], 0  ;;  %s2921_s25 = smov [#allocation5]   ;;  %s2711_s29 = scalar_lea.hbm %s3669_s1, 1024 }
   0x6   :  { %s41_s26 = sshll.u32 %s2921_s25, 4  ;;  %p2712_p0 = scmp.ne.s32.totalorder %s3669_s1, %s2711_s29  ;;  %s42_s26 = int_to_ptr.vmem [resolvable:$true] %s41_s26 }
   0x7   :  { %p2715_p1 = scmp.lt.u32.totalorder %s2711_s29, %s3669_s1 }
   0x9   :  { %p2717_p2 = pnand %p2715_p1, %p2712_p0 }
   0xb   :  { %2720 = shalt.err (!%p2717_p2)
}
   0xc   :  { %s2721_s17 = scalar_lea.vmem %s42_s26, 1024  ;;  %p2726_p4 = scmp.lt.s32.totalorder %s42_s26, %s42_s26 }
   0xd   :  { %p2722_p3 = scmp.ne.s32.totalorder %s42_s26, %s2721_s17  ;;  %p2727_p5 = scmp.lt.s32.totalorder %s2721_s17, %s2721_s17 }
   0xf   :  { %p2728_p6 = por %p2727_p5, %p2726_p4 }
  0x11   :  { %p2729_p7 = pnand %p2728_p6, %p2722_p3 }
  0x13   :  { %2732 = shalt.err (!%p2729_p7)
}
  0x14   :  { %s2922_s18 = smov 64   ;;  %s2923_s19 = smov 4  }
  0x15   :  { %47 = dma.hbm_to_vmem [thread:$0]  %s3669_s1, 1024, %s42_s26, [#allocation6], %s2922_s18, %s2922_s18, %s2923_s19  }
  0x16   :  { %s2924_s22 = smov [#allocation8]   ;;  %s2925_s24 = smov [#allocation11]  }
  0x17   :  { %s69_s23 = sshll.u32 %s2924_s22, 4  ;;  %s95_s25 = sshll.u32 %s2925_s24, 4  ;;  %s70_s23 = int_to_ptr.vmem [resolvable:$true] %s69_s23  ;;  %s96_s25 = int_to_ptr.vmem [resolvable:$true] %s95_s25 }
  0x18   :  { %s2733_s29 = scalar_lea.hbm %s3673_s5, 2048 }
  0x19   :  { %p2734_p8 = scmp.ne.s32.totalorder %s3673_s5, %s2733_s29  ;;  %p2737_p9 = scmp.lt.u32.totalorder %s2733_s29, %s3673_s5 }
  0x1b   :  { %p2739_p10 = pnand %p2737_p9, %p2734_p8 }
  0x1d   :  { %2742 = shalt.err (!%p2739_p10)
}
  0x1e   :  { %s2743_s1 = scalar_lea.vmem %s70_s23, 2048  ;;  %p2748_p12 = scmp.lt.s32.totalorder %s70_s23, %s70_s23 }
  0x1f   :  { %p2744_p11 = scmp.ne.s32.totalorder %s70_s23, %s2743_s1  ;;  %p2749_p13 = scmp.lt.s32.totalorder %s2743_s1, %s2743_s1 }
  0x21   :  { %p2750_p0 = por %p2749_p13, %p2748_p12 }
  0x23   :  { %p2751_p1 = pnand %p2750_p0, %p2744_p11 }
  0x25   :  { %2754 = shalt.err (!%p2751_p1)
}
  0x26   :  { %s2926_s26 = smov 128   ;;  %s2927_s17 = smov 8  }
  0x27   :  { %75 = dma.hbm_to_vmem [thread:$0]  %s3673_s5, 2048, %s70_s23, [#allocation9], %s2926_s26, %s2926_s26, %s2927_s17  }
  0x28   :  { %s2755_s27 = scalar_lea.hbm %s3676_s8, 1024 }
  0x29   :  { %p2756_p2 = scmp.ne.s32.totalorder %s3676_s8, %s2755_s27  ;;  %p2759_p3 = scmp.lt.u32.totalorder %s2755_s27, %s3676_s8 }
  0x2b   :  { %p2761_p4 = pnand %p2759_p3, %p2756_p2 }
  0x2d   :  { %2764 = shalt.err (!%p2761_p4)
}
  0x2e   :  { %s2765_s15 = scalar_lea.vmem %s96_s25, 1024  ;;  %p2770_p6 = scmp.lt.s32.totalorder %s96_s25, %s96_s25 }
  0x2f   :  { %p2766_p5 = scmp.ne.s32.totalorder %s96_s25, %s2765_s15  ;;  %p2771_p7 = scmp.lt.s32.totalorder %s2765_s15, %s2765_s15 }
  0x31   :  { %p2772_p8 = por %p2771_p7, %p2770_p6 }
  0x33   :  { %p2773_p9 = pnand %p2772_p8, %p2766_p5 }
  0x35   :  { %2776 = shalt.err (!%p2773_p9)
}
  0x36   :  { %101 = dma.hbm_to_vmem [thread:$0]  %s3676_s8, 1024, %s96_s25, [#allocation12], %s2922_s18, %s2922_s18, %s2923_s19  }
  0x37   :  { %s2928_s16 = smov [#allocation2]   ;;  %s2929_s20 = smov [#allocation7]  }
  0x38   :  { %s29_s1 = sshll.u32 %s2928_s16, 4  ;;  %s55_s21 = sshll.u32 %s2929_s20, 4  ;;  %s30_s1 = int_to_ptr.vmem [resolvable:$true] %s29_s1  ;;  %s56_s21 = int_to_ptr.vmem [resolvable:$true] %s55_s21 }
  0x39   :  { %s2777_s27 = scalar_lea.hbm %s3668_s0, 1024 }
  0x3a   :  { %p2778_p10 = scmp.ne.s32.totalorder %s3668_s0, %s2777_s27  ;;  %p2781_p11 = scmp.lt.u32.totalorder %s2777_s27, %s3668_s0 }
  0x3c   :  { %p2783_p12 = pnand %p2781_p11, %p2778_p10 }
  0x3e   :  { %2786 = shalt.err (!%p2783_p12)
}
  0x3f   :  { %s2787_s8 = scalar_lea.vmem %s30_s1, 1024  ;;  %p2792_p0 = scmp.lt.s32.totalorder %s30_s1, %s30_s1 }
  0x40   :  { %p2788_p13 = scmp.ne.s32.totalorder %s30_s1, %s2787_s8  ;;  %p2793_p1 = scmp.lt.s32.totalorder %s2787_s8, %s2787_s8 }
  0x42   :  { %p2794_p2 = por %p2793_p1, %p2792_p0 }
  0x44   :  { %p2795_p3 = pnand %p2794_p2, %p2788_p13 }
  0x46   :  { %2798 = shalt.err (!%p2795_p3)
}
  0x47   :  { %35 = dma.hbm_to_vmem [thread:$0]  %s3668_s0, 1024, %s30_s1, [#allocation3], %s2922_s18, %s2922_s18, %s2923_s19  }
  0x48   :  { %s2799_s16 = scalar_lea.hbm %s3671_s3, 2048 }
  0x49   :  { %p2800_p4 = scmp.ne.s32.totalorder %s3671_s3, %s2799_s16  ;;  %p2803_p5 = scmp.lt.u32.totalorder %s2799_s16, %s3671_s3 }
  0x4b   :  { %p2805_p6 = pnand %p2803_p5, %p2800_p4 }
  0x4d   :  { %2808 = shalt.err (!%p2805_p6)
}
  0x4e   :  { %s2809_s28 = scalar_lea.vmem %s56_s21, 2048  ;;  %p2814_p8 = scmp.lt.s32.totalorder %s56_s21, %s56_s21 }
  0x4f   :  { %p2810_p7 = scmp.ne.s32.totalorder %s56_s21, %s2809_s28  ;;  %p2815_p9 = scmp.lt.s32.totalorder %s2809_s28, %s2809_s28 }
  0x51   :  { %p2816_p10 = por %p2815_p9, %p2814_p8 }
  0x53   :  { %p2817_p11 = pnand %p2816_p10, %p2810_p7 }
  0x55   :  { %2820 = shalt.err (!%p2817_p11)
}
  0x56   :  { %61 = dma.hbm_to_vmem [thread:$0]  %s3671_s3, 2048, %s56_s21, [#allocation6], %s2926_s26, %s2926_s26, %s2927_s17  }
  0x57   :  { %s2930_s29 = smov [#allocation10]   ;;  %s2931_s14 = smov [#allocation13]  }
  0x58   :  { %s81_s30 = sshll.u32 %s2930_s29, 4  ;;  %s109_s8 = sshll.u32 %s2931_s14, 4  ;;  %s82_s30 = int_to_ptr.vmem [resolvable:$true] %s81_s30  ;;  %s110_s8 = int_to_ptr.vmem [resolvable:$true] %s109_s8 }
  0x59   :  { %s2821_s5 = scalar_lea.hbm %s3674_s6, 2048 }
  0x5a   :  { %p2822_p12 = scmp.ne.s32.totalorder %s3674_s6, %s2821_s5  ;;  %p2825_p13 = scmp.lt.u32.totalorder %s2821_s5, %s3674_s6 }
  0x5c   :  { %p2827_p0 = pnand %p2825_p13, %p2822_p12 }
  0x5e   :  { %2830 = shalt.err (!%p2827_p0)
}
  0x5f   :  { %s2831_s3 = scalar_lea.vmem %s82_s30, 2048  ;;  %p2836_p2 = scmp.lt.s32.totalorder %s82_s30, %s82_s30 }
  0x60   :  { %p2832_p1 = scmp.ne.s32.totalorder %s82_s30, %s2831_s3  ;;  %p2837_p3 = scmp.lt.s32.totalorder %s2831_s3, %s2831_s3 }
  0x62   :  { %p2838_p4 = por %p2837_p3, %p2836_p2 }
  0x64   :  { %p2839_p5 = pnand %p2838_p4, %p2832_p1 }
  0x66   :  { %2842 = shalt.err (!%p2839_p5)
}
  0x67   :  { %87 = dma.hbm_to_vmem [thread:$0]  %s3674_s6, 2048, %s82_s30, [#allocation9], %s2922_s18, %s2922_s18, %s2923_s19  }
  0x68   :  { %s2843_s27 = scalar_lea.hbm %s3678_s10, 2048 }
  0x69   :  { %p2844_p6 = scmp.ne.s32.totalorder %s3678_s10, %s2843_s27  ;;  %p2847_p7 = scmp.lt.u32.totalorder %s2843_s27, %s3678_s10 }
  0x6b   :  { %p2849_p8 = pnand %p2847_p7, %p2844_p6 }
  0x6d   :  { %2852 = shalt.err (!%p2849_p8)
}
  0x6e   :  { %s2853_s14 = scalar_lea.vmem %s110_s8, 2048  ;;  %p2858_p10 = scmp.lt.s32.totalorder %s110_s8, %s110_s8 }
  0x6f   :  { %p2854_p9 = scmp.ne.s32.totalorder %s110_s8, %s2853_s14  ;;  %p2859_p11 = scmp.lt.s32.totalorder %s2853_s14, %s2853_s14 }
  0x71   :  { %p2860_p12 = por %p2859_p11, %p2858_p10 }
  0x73   :  { %p2861_p13 = pnand %p2860_p12, %p2854_p9 }
  0x75   :  { %2864 = shalt.err (!%p2861_p13)
}
  0x76   :  { %115 = dma.hbm_to_vmem [thread:$0]  %s3678_s10, 2048, %s110_s8, [#allocation12], %s2922_s18, %s2922_s18, %s2923_s19  }
  0x77   :  { %s2932_s25 = smov [#allocation14]   ;;  %s2865_s16 = scalar_lea.hbm %s3679_s11, 3072 }
  0x78   :  { %s121_s15 = sshll.u32 %s2932_s25, 4  ;;  %p2866_p0 = scmp.ne.s32.totalorder %s3679_s11, %s2865_s16  ;;  %s122_s15 = int_to_ptr.vmem [resolvable:$true] %s121_s15 }
  0x79   :  { %p2869_p1 = scmp.lt.u32.totalorder %s2865_s16, %s3679_s11 }
  0x7b   :  { %p2871_p2 = pnand %p2869_p1, %p2866_p0 }
  0x7d   :  { %2874 = shalt.err (!%p2871_p2)
}
  0x7e   :  { %s2875_s17 = scalar_lea.vmem %s122_s15, 3072  ;;  %p2880_p4 = scmp.lt.s32.totalorder %s122_s15, %s122_s15 }
  0x7f   :  { %p2876_p3 = scmp.ne.s32.totalorder %s122_s15, %s2875_s17  ;;  %p2881_p5 = scmp.lt.s32.totalorder %s2875_s17, %s2875_s17 }
  0x81   :  { %p2882_p6 = por %p2881_p5, %p2880_p4 }
  0x83   :  { %p2883_p7 = pnand %p2882_p6, %p2876_p3 }
  0x85   :  { %2886 = shalt.err (!%p2883_p7)
}
  0x86   :  { %s2933_s10 = smov 192   ;;  %s2934_s18 = smov 12  }
  0x87   :  { %127 = dma.hbm_to_vmem [thread:$0]  %s3679_s11, 3072, %s122_s15, [#allocation15], %s2933_s10, %s2933_s10, %s2934_s18  }
  0x88   :  { %2909 = dma.done.wait [#allocation3], 1024  }
  0x89   :  { %2910 = vsyncadd [#allocation3], 4294966272 }
  0x8a   :  { %2911 = dma.done.wait [#allocation6], 3072  }
  0x8b   :  { %2912 = vsyncadd [#allocation6], 4294964224 }
  0x8c   :  { %2913 = dma.done.wait [#allocation9], 4096  }
  0x8d   :  { %2914 = vsyncadd [#allocation9], 4294963200 }
  0x8e   :  { %2915 = dma.done.wait [#allocation12], 3072  }
  0x8f   :  { %2916 = vsyncadd [#allocation12], 4294964224 }
  0x90   :  { %2917 = dma.done.wait [#allocation15], 3072  }
  0x91   :  { %2918 = vsyncadd [#allocation15], 4294964224  ;;  %v3684_v0 = vmov 0   ;;  %v2575_v1 = vld [vmem:[#allocation5] sm:$0xff]   ;;  %v2576_v2 = vld [vmem:[#allocation5 + $0x8] sm:$0xff]  }
  0x92   :  { %665 = vmatprep.mubr.bf16.mxu1 %v3684_v0  ;;  %2381 = vmatprep.subr.bf16.mxu0 %v2575_v1  ;;  %v2577_v3 = vld [vmem:[#allocation5 + $0x10] sm:$0xff]   ;;  %v2578_v4 = vld [vmem:[#allocation5 + $0x18] sm:$0xff]   ;;  %v3127_v5 = vld [vmem:[#allocation2] sm:$0xf] }
  0x93   :  { %2382 = vmatpush3.bf16.msra.mxu0 %v2575_v1  ;;  %v3129_v6 = vld [vmem:[#allocation2 + $0x4] sm:$0xf]  ;;  %v303_v7 = vmax.bf16 %v3684_v0, %v3127_v5  ;;  %v2586_v13 = vld [vmem:[#allocation7] ss:$8 sps:$4 sm:$0xff]   ;;  %v2587_v14 = vld [vmem:[#allocation7 + $0x14] ss:$8 sps:$4 sm:$0xff]  }
  0x94   :  { %2383 = vmatprep.subr.bf16.mxu0 %v2576_v2  ;;  %v304_v8 = vmax.bf16 %v3684_v0, %v3129_v6  ;;  %v2115_v9 = vcombine.low %v3127_v5, %v3129_v6  ;;  %v2579_v11 = vld [vmem:[#allocation5 + $0x20] sm:$0xff]   ;;  %v2580_v15 = vld [vmem:[#allocation5 + $0x28] sm:$0xff]   ;;  %v2589_v16 = vld [vmem:[#allocation7 + $0x10] ss:$8 sps:$4 sm:$0xff]  }
  0x95   :  { %v2584_v12 = vld [vmem:[#allocation7 + $0x4] ss:$8 sps:$4 sm:$0xff]   ;;  %v2581_v18 = vld [vmem:[#allocation5 + $0x30] sm:$0xff]   ;;  %v2592_v19 = vld [vmem:[#allocation7 + $0x20] ss:$8 sps:$4 sm:$0xff]  }
  0x96   :  { %v2083_v10 = vcombine.low %v303_v7, %v304_v8  ;;  %633 = vmatprep.subr.bf16.mxu1 %v2584_v12  ;;  %v2590_v17 = vld [vmem:[#allocation7 + $0x24] ss:$8 sps:$4 sm:$0xff]   ;;  %v3137_v20 = vld [vmem:[#allocation2 + $0x8] sm:$0xf]  ;;  %v2593_v22 = vld [vmem:[#allocation7 + $0x34] ss:$8 sps:$4 sm:$0xff]  }
  0x97   :  { %2384 = vmatpush3.bf16.msra.mxu0 %v2576_v2  ;;  %634 = vmatpush1.bf16.msra.mxu1 %v2586_v13  ;;  %v3139_v21 = vld [vmem:[#allocation2 + $0xc] sm:$0xf]  ;;  %v2582_v23 = vld [vmem:[#allocation5 + $0x38] sm:$0xff]   ;;  %v3141_v24 = vld [vmem:[#allocation2 + $0x10] sm:$0xf]  ;;  %v305_v28 = vmax.bf16 %v3684_v0, %v3137_v20 }
  0x98   :  { %2385 = vmatprep.subr.bf16.mxu0 %v2577_v3  ;;  %2397 = vmatprep.mubr.bf16.mxu0 %v2083_v10  ;;  %v3143_v25 = vld [vmem:[#allocation2 + $0x14] sm:$0xf]  ;;  %v2595_v26 = vld [vmem:[#allocation7 + $0x30] ss:$8 sps:$4 sm:$0xff]   ;;  %v2596_v27 = vld [vmem:[#allocation7 + $0x44] ss:$8 sps:$4 sm:$0xff]   ;;  %v306_v29 = vmax.bf16 %v3684_v0, %v3139_v21  ;;  %v307_v30 = vmax.bf16 %v3684_v0, %v3141_v24 }
  0x99   :  { %635 = vmatprep.subr.bf16.mxu1 %v2587_v14  ;;  %v308_v31 = vmax.bf16 %v3684_v0, %v3143_v25  ;;  %v2598_v32 = vld [vmem:[#allocation7 + $0x40] ss:$8 sps:$4 sm:$0xff]   ;;  %v2599_v33 = vld [vmem:[#allocation7 + $0x54] ss:$8 sps:$4 sm:$0xff]   ;;  %v3153_v34 = vld [vmem:[#allocation2 + $0x18] sm:$0xf] }
  0x9a   :  { %v3155_v35 = vld [vmem:[#allocation2 + $0x1c] sm:$0xf]  ;;  %v2084_v36 = vcombine.low %v305_v28, %v306_v29  ;;  %v3157_v37 = vld [vmem:[#allocation2 + $0x20] sm:$0xf]  ;;  %v3159_v38 = vld [vmem:[#allocation2 + $0x24] sm:$0xf]  ;;  %v309_v41 = vmax.bf16 %v3684_v0, %v3153_v34 }
  0x9b   :  { %2386 = vmatpush3.bf16.msra.mxu0 %v2577_v3  ;;  %636 = vmatpush1.bf16.msra.mxu1 %v2589_v16  ;;  %v2085_v39 = vcombine.low %v307_v30, %v308_v31  ;;  %v2601_v40 = vld [vmem:[#allocation7 + $0x50] ss:$8 sps:$4 sm:$0xff]   ;;  %v310_v42 = vmax.bf16 %v3684_v0, %v3155_v35  ;;  %v311_v43 = vmax.bf16 %v3684_v0, %v3157_v37  ;;  %v3169_v45 = vld [vmem:[#allocation2 + $0x28] sm:$0xf]  ;;  %v3171_v46 = vld [vmem:[#allocation2 + $0x2c] sm:$0xf] }
  0x9c   :  { %2387 = vmatprep.subr.bf16.mxu0 %v2578_v4  ;;  %637 = vmatprep.subr.bf16.mxu1 %v2590_v17  ;;  %v312_v44 = vmax.bf16 %v3684_v0, %v3159_v38  ;;  %v3173_v48 = vld [vmem:[#allocation2 + $0x30] sm:$0xf]  ;;  %v3175_v49 = vld [vmem:[#allocation2 + $0x34] sm:$0xf]  ;;  %v313_v51 = vmax.bf16 %v3684_v0, %v3169_v45  ;;  %v314_v52 = vmax.bf16 %v3684_v0, %v3171_v46  ;;  %v3185_v55 = vld [vmem:[#allocation2 + $0x38] sm:$0xf] }
  0x9d   :  { %v2086_v47 = vcombine.low %v309_v41, %v310_v42  ;;  %v315_v53 = vmax.bf16 %v3684_v0, %v3173_v48  ;;  %v316_v54 = vmax.bf16 %v3684_v0, %v3175_v49  ;;  %v3187_v56 = vld [vmem:[#allocation2 + $0x3c] sm:$0xf]  ;;  %v317_v59 = vmax.bf16 %v3684_v0, %v3185_v55  ;;  %v2602_v62 = vld [vmem:[#allocation7 + $0x64] ss:$8 sps:$4 sm:$0xff]   ;;  %v2604_v63 = vld [vmem:[#allocation7 + $0x60] ss:$8 sps:$4 sm:$0xff]  }
  0x9e   :  { %v2087_v50 = vcombine.low %v311_v43, %v312_v44  ;;  %v2088_v57 = vcombine.low %v313_v51, %v314_v52  ;;  %v318_v60 = vmax.bf16 %v3684_v0, %v3187_v56  ;;  %v2605_v1 = vld [vmem:[#allocation7 + $0x74] ss:$8 sps:$4 sm:$0xff]   ;;  %v2607_v2 = vld [vmem:[#allocation7 + $0x70] ss:$8 sps:$4 sm:$0xff]   ;;  %v2610_v3 = vld [vmem:[#allocation8 + $0x4] ss:$8 sps:$4 sm:$0xff]   ;;  %v2119_v5 = vcombine.low %v3157_v37, %v3159_v38 }
  0x9f   :  { %2388 = vmatpush3.bf16.msra.mxu0 %v2578_v4  ;;  %638 = vmatpush1.bf16.msra.mxu1 %v2592_v19  ;;  %v2089_v58 = vcombine.low %v315_v53, %v316_v54  ;;  %v3196_v4 = vld [vmem:[%s3670_s2] ss:$0 sm:$0xff]  ;;  %v2643_v28 = vld [vmem:[#allocation10 + $0x50] sm:$0xff]   ;;  %v2645_v43 = vld [vmem:[#allocation10 + $0x58] sm:$0xff]   ;;  %v2120_v6 = vcombine.low %v3169_v45, %v3171_v46  ;;  %v543_v37 = vlaneseq }
  0xa0   :  { %2389 = vmatprep.subr.bf16.mxu0 %v2579_v11  ;;  %639 = vmatprep.subr.bf16.mxu1 %v2593_v22  ;;  %v2090_v61 = vcombine.low %v317_v59, %v318_v60  ;;  %v2639_v13 = vld [vmem:[#allocation10 + $0x40] sm:$0xff]   ;;  %v2611_v51 = vld [vmem:[#allocation8 + $0x10] ss:$8 sps:$4 sm:$0xff]  }
  0xa1   :  { %v2640_v14 = vld [vmem:[#allocation10] sm:$0xff]   ;;  %v3247_v38 = vshrl.u32 %v543_v37, 7 }
  0xa2   :  { %v2608_v30 = vld [vmem:[#allocation8] ss:$8 sps:$4 sm:$0xff]   ;;  %v2616_v54 = vld [vmem:[#allocation8 + $0x24] ss:$8 sps:$4 sm:$0xff]  }
  0xa3   :  { %2390 = vmatpush3.bf16.msra.mxu0 %v2579_v11  ;;  %640 = vmatpush1.bf16.msra.mxu1 %v2595_v26  ;;  %v2647_v60 = vld [vmem:[#allocation10 + $0x60] sm:$0xff]   ;;  %v3683_v45 = vsub.s32 0, %v3247_v38 }
  0xa4   :  { %2391 = vmatprep.subr.bf16.mxu0 %v2580_v15  ;;  %641 = vmatprep.subr.bf16.mxu1 %v2596_v27  ;;  %v204_v46 = vld [vmem:[%s3672_s4] sm:$0x3] }
  0xa7   :  { %2392 = vmatpush3.bf16.msra.mxu0 %v2580_v15  ;;  %642 = vmatpush1.bf16.msra.mxu1 %v2598_v32  ;;  %v2641_v15 = vld [vmem:[#allocation10 + $0x48] sm:$0xff]  }
  0xa8   :  { %2393 = vmatprep.subr.bf16.mxu0 %v2581_v18  ;;  %643 = vmatprep.subr.bf16.mxu1 %v2599_v33  ;;  %v2613_v33 = vld [vmem:[#allocation8 + $0x14] ss:$8 sps:$4 sm:$0xff]  }
  0xab   :  { %2394 = vmatpush3.bf16.msra.mxu0 %v2581_v18  ;;  %644 = vmatpush1.bf16.msra.mxu1 %v2601_v40  ;;  %v2644_v40 = vld [vmem:[#allocation10 + $0x10] sm:$0xff]  }
  0xac   :  { %2395 = vmatprep.subr.bf16.mxu0 %v2582_v23  ;;  %645 = vmatprep.subr.bf16.mxu1 %v2602_v62  ;;  %v2614_v62 = vld [vmem:[#allocation8 + $0x20] ss:$8 sps:$4 sm:$0xff]  }
  0xaf   :  { %2396 = vmatpush3.bf16.msra.mxu0 %v2582_v23  ;;  %646 = vmatpush1.bf16.msra.mxu1 %v2604_v63  ;;  %v2642_v23 = vld [vmem:[#allocation10 + $0x8] sm:$0xff]  }
  0xb0   :  { %647 = vmatprep.subr.bf16.mxu1 %v2605_v1  ;;  %2221 = vmatprep.subr.bf16.mxu0 %v2639_v13 }
  0xb2   :  { %2398 = vmatmul.mubr.bf16.vlgmr.msra.gmra.mrb[0].mxu0 %v2084_v36 }
  0xb3   :  { %2401 = vmatprep.mubr.bf16.mxu0 %v2085_v39  ;;  %648 = vmatpush1.bf16.msra.mxu1 %v2607_v2  ;;  %v2619_v2 = vld [vmem:[#allocation8 + $0x34] ss:$8 sps:$4 sm:$0xff]  }
  0xb4   :  { %874 = vmatprep.subr.bf16.mxu1 %v2610_v3  ;;  %2222 = vmatpush3.bf16.msra.mxu0 %v2640_v14 }
  0xb5   :  { %2223 = vmatprep.subr.bf16.mxu0 %v2641_v15 }
  0xb8   :  { %2224 = vmatpush3.bf16.msra.mxu0 %v2642_v23  ;;  %v2650_v23 = vld [vmem:[#allocation10 + $0x28] sm:$0xff]  }
  0xb9   :  { %2225 = vmatprep.subr.bf16.mxu0 %v2643_v28  ;;  %v2620_v28 = vld [vmem:[#allocation8 + $0x40] ss:$8 sps:$4 sm:$0xff]  }
  0xba   :  { %2402 = vmatmul.mubr.bf16.gmra.mrb[4].mxu0 %v2086_v47 }
  0xbb   :  { %2405 = vmatprep.mubr.bf16.mxu0 %v2087_v50 }
  0xbc   :  { %2226 = vmatpush3.bf16.msra.mxu0 %v2644_v40 }
  0xbd   :  { %2227 = vmatprep.subr.bf16.mxu0 %v2645_v43  ;;  %v2623_v43 = vld [vmem:[#allocation8 + $0x50] ss:$8 sps:$4 sm:$0xff]  }
  0xc2   :  { %2406 = vmatmul.mubr.bf16.gmra.mrb[8].mxu0 %v2088_v57 }
  0xc3   :  { %2409 = vmatprep.mubr.bf16.mxu0 %v2089_v58  ;;  %v2646_v58 = vld [vmem:[#allocation10 + $0x18] sm:$0xff]  }
  0xc4   :  { %2228 = vmatpush3.bf16.msra.mxu0 %v2646_v58  ;;  %v2631_v58 = vld [vmem:[#allocation8 + $0x74] ss:$8 sps:$4 sm:$0xff]  }
  0xc5   :  { %2229 = vmatprep.subr.bf16.mxu0 %v2647_v60  ;;  %v2117_v60 = vcombine.low %v3141_v24, %v3143_v25  ;;  %v2652_v24 = vld [vmem:[#allocation10 + $0x30] sm:$0xff]   ;;  %v2653_v25 = vld [vmem:[#allocation10 + $0x78] sm:$0xff]  }
  0xca   :  { %2410 = vmatmul.mubr.bf16.gmra.mrb[12].mxu0 %v2090_v61 }
 0x185   :  { %v2399_v7 = vpop.f32.mrb[0].mxu0 }
 0x186   :  { %v464_v8 = vadd.f32 %v2399_v7, %v3196_v4  ;;  %v455_v10 = vpop.f32.mrb[1].mxu0 }
 0x187   :  { %v456_v11 = vadd.f32 %v3196_v4, %v455_v10  ;;  %v2400_v12 = vpop.f32.mrb[2].mxu0 }
 0x188   :  { %v467_v16 = vadd.f32 %v2400_v12, %v3196_v4  ;;  %v458_v17 = vpop.f32.mrb[3].mxu0  ;;  %v520_v19 = vmax.f32 %v464_v8, 0.0  ;;  %v2648_v8 = vld [vmem:[#allocation10 + $0x20] sm:$0xff]   ;;  %v2649_v12 = vld [vmem:[#allocation10 + $0x68] sm:$0xff]  }
 0x189   :  { %v459_v18 = vadd.f32 %v3196_v4, %v458_v17  ;;  %v518_v26 = vmax.f32 %v456_v11, 0.0  ;;  %2230 = vmatpush3.bf16.msra.mxu0 %v2648_v8 }
 0x18a   :  { %v521_v22 = vmax.f32 %v467_v16, 0.0  ;;  %v2617_v16 = vld [vmem:[#allocation8 + $0x30] ss:$8 sps:$4 sm:$0xff]   ;;  %2231 = vmatprep.subr.bf16.mxu0 %v2649_v12 }
 0x18b   :  { %v519_v27 = vmax.f32 %v459_v18, 0.0 }
 0x18c   :  { %v535_v29 = vpack.c.bf16 %v521_v22, %v520_v19  ;;  %v2622_v19 = vld [vmem:[#allocation8 + $0x44] ss:$8 sps:$4 sm:$0xff]  }
 0x18d   :  { %v534_v31 = vpack.c.bf16 %v519_v27, %v518_v26  ;;  %v2403_v32 = vpop.f32.mrb[4].mxu0  ;;  %2232 = vmatpush3.bf16.msra.mxu0 %v2650_v23  ;;  %v2656_v23 = vld [vmem:[#allocation11 + $0x8] sm:$0xff]  }
 0x18e   :  { %v480_v36 = vadd.f32 %v2403_v32, %v3196_v4  ;;  %v471_v39 = vpop.f32.mrb[5].mxu0 }
 0x18f   :  { %666 = vmatmul.mubr.bf16.vlgmr.msra.gmra.mrb[0].mxu1 %v534_v31  ;;  %v472_v41 = vadd.f32 %v3196_v4, %v471_v39  ;;  %v2404_v42 = vpop.f32.mrb[6].mxu0  ;;  %v2625_v31 = vld [vmem:[#allocation8 + $0x54] ss:$8 sps:$4 sm:$0xff]  }
 0x190   :  { %875 = vmatpush1.bf16.msra.mxu1 %v2608_v30  ;;  %v524_v44 = vmax.f32 %v480_v36, 0.0  ;;  %v483_v47 = vadd.f32 %v2404_v42, %v3196_v4  ;;  %v474_v50 = vpop.f32.mrb[7].mxu0  ;;  %675 = vmatprep.mubr.bf16.mxu1 %v3684_v0 }
 0x191   :  { %v522_v52 = vmax.f32 %v472_v41, 0.0  ;;  %v475_v53 = vadd.f32 %v3196_v4, %v474_v50  ;;  %876 = vmatprep.subr.bf16.mxu1 %v2613_v33  ;;  %v2628_v50 = vld [vmem:[#allocation8 + $0x64] ss:$8 sps:$4 sm:$0xff]  }
 0x192   :  { %v525_v57 = vmax.f32 %v483_v47, 0.0 }
 0x193   :  { %v523_v59 = vmax.f32 %v475_v53, 0.0 }
 0x194   :  { %v537_v61 = vpack.c.bf16 %v525_v57, %v524_v44  ;;  %877 = vmatpush1.bf16.msra.mxu1 %v2611_v51 }
 0x195   :  { %v536_v63 = vpack.c.bf16 %v523_v59, %v522_v52  ;;  %878 = vmatprep.subr.bf16.mxu1 %v2616_v54  ;;  %v2407_v1 = vpop.f32.mrb[8].mxu0  ;;  %v2626_v54 = vld [vmem:[#allocation8 + $0x60] ss:$8 sps:$4 sm:$0xff]   ;;  %v2629_v59 = vld [vmem:[#allocation8 + $0x70] ss:$8 sps:$4 sm:$0xff]  }
 0x196   :  { %v496_v3 = vadd.f32 %v2407_v1, %v3196_v4  ;;  %v487_v7 = vpop.f32.mrb[9].mxu0 }
 0x197   :  { %676 = vmatmul.mubr.bf16.gmra.mrb[4].mxu1 %v535_v29  ;;  %v488_v10 = vadd.f32 %v3196_v4, %v487_v7  ;;  %v2408_v11 = vpop.f32.mrb[10].mxu0 }
 0x198   :  { %685 = vmatprep.mubr.bf16.mxu1 %v3684_v0  ;;  %879 = vmatpush1.bf16.msra.mxu1 %v2614_v62  ;;  %v528_v13 = vmax.f32 %v496_v3, 0.0  ;;  %v499_v14 = vadd.f32 %v2408_v11, %v3196_v4  ;;  %v490_v15 = vpop.f32.mrb[11].mxu0 }
 0x199   :  { %v526_v17 = vmax.f32 %v488_v10, 0.0  ;;  %v491_v18 = vadd.f32 %v3196_v4, %v490_v15  ;;  %880 = vmatprep.subr.bf16.mxu1 %v2619_v2 }
 0x19a   :  { %v529_v22 = vmax.f32 %v499_v14, 0.0 }
 0x19b   :  { %v527_v26 = vmax.f32 %v491_v18, 0.0 }
 0x19c   :  { %v539_v27 = vpack.c.bf16 %v529_v22, %v528_v13  ;;  %881 = vmatpush1.bf16.msra.mxu1 %v2617_v16 }
 0x19d   :  { %v538_v29 = vpack.c.bf16 %v527_v26, %v526_v17  ;;  %882 = vmatprep.subr.bf16.mxu1 %v2622_v19  ;;  %v2411_v30 = vpop.f32.mrb[12].mxu0 }
 0x19e   :  { %v512_v32 = vadd.f32 %v2411_v30, %v3196_v4  ;;  %v503_v33 = vpop.f32.mrb[13].mxu0 }
 0x19f   :  { %686 = vmatmul.mubr.bf16.gmra.mrb[8].mxu1 %v536_v63  ;;  %v504_v36 = vadd.f32 %v3196_v4, %v503_v33  ;;  %v2412_v39 = vpop.f32.mrb[14].mxu0 }
 0x1a0   :  { %695 = vmatprep.mubr.bf16.mxu1 %v3684_v0  ;;  %883 = vmatpush1.bf16.msra.mxu1 %v2620_v28  ;;  %v532_v40 = vmax.f32 %v512_v32, 0.0  ;;  %v515_v41 = vadd.f32 %v2412_v39, %v3196_v4  ;;  %v506_v42 = vpop.f32.mrb[15].mxu0 }
 0x1a1   :  { %v530_v44 = vmax.f32 %v504_v36, 0.0  ;;  %v507_v47 = vadd.f32 %v3196_v4, %v506_v42  ;;  %884 = vmatprep.subr.bf16.mxu1 %v2625_v31  ;;  %v2116_v4 = vcombine.low %v3137_v20, %v3139_v21  ;;  %v2122_v20 = vcombine.low %v3185_v55, %v3187_v56  ;;  %v2651_v21 = vld [vmem:[#allocation10 + $0x70] sm:$0xff]  }
 0x1a2   :  { %v533_v51 = vmax.f32 %v515_v41, 0.0  ;;  %2233 = vmatprep.subr.bf16.mxu0 %v2651_v21  ;;  %v2657_v36 = vld [vmem:[#allocation11 + $0x10] sm:$0xff]  }
 0x1a3   :  { %v531_v52 = vmax.f32 %v507_v47, 0.0  ;;  %2234 = vmatpush3.bf16.msra.mxu0 %v2652_v24 }
 0x1a4   :  { %v541_v53 = vpack.c.bf16 %v533_v51, %v532_v40  ;;  %885 = vmatpush1.bf16.msra.mxu1 %v2623_v43  ;;  %2235 = vmatprep.subr.bf16.mxu0 %v2653_v25 }
 0x1a5   :  { %v540_v57 = vpack.c.bf16 %v531_v52, %v530_v44  ;;  %886 = vmatprep.subr.bf16.mxu1 %v2628_v50 }
 0x1a7   :  { %696 = vmatmul.mubr.bf16.gmra.mrb[12].mxu1 %v537_v61  ;;  %v2118_v61 = vcombine.low %v3153_v34, %v3155_v35  ;;  %v2654_v34 = vld [vmem:[#allocation10 + $0x38] sm:$0xff]   ;;  %v2655_v35 = vld [vmem:[#allocation11] sm:$0xff]  }
 0x1a8   :  { %705 = vmatprep.mubr.bf16.mxu1 %v3684_v0  ;;  %887 = vmatpush1.bf16.msra.mxu1 %v2626_v54 }
 0x1a9   :  { %888 = vmatprep.subr.bf16.mxu1 %v2631_v58  ;;  %2236 = vmatpush3.bf16.msra.mxu0 %v2654_v34 }
 0x1aa   :  { %2413 = vmatprep.subr.bf16.mxu0 %v2655_v35 }
 0x1ac   :  { %889 = vmatpush1.bf16.msra.mxu1 %v2629_v59 }
 0x1af   :  { %706 = vmatmul.mubr.bf16.gmra.mrb[16].mxu1 %v538_v29 }
 0x1b0   :  { %715 = vmatprep.mubr.bf16.mxu1 %v3684_v0 }
 0x1b7   :  { %716 = vmatmul.mubr.bf16.gmra.mrb[20].mxu1 %v539_v27 }
 0x1b8   :  { %725 = vmatprep.mubr.bf16.mxu1 %v3684_v0 }
 0x1bf   :  { %726 = vmatmul.mubr.bf16.gmra.mrb[24].mxu1 %v540_v57 }
 0x1c0   :  { %735 = vmatprep.mubr.bf16.mxu1 %v3684_v0 }
 0x1c7   :  { %736 = vmatmul.mubr.bf16.gmra.mrb[28].mxu1 %v541_v53 }
 0x1c8   :  { %906 = vmatprep.mubr.bf16.mxu1 %v3684_v0 }
 0x1cf   :  { %907 = vmatmul.mubr.bf16.vlgmr.msra.gmra.mrb[0].mxu1 %v2115_v9  ;;  %v2121_v9 = vcombine.low %v3173_v48, %v3175_v49  ;;  %v3682_v48 = vsub.s32 1, %v3247_v38  ;;  %v3256_v49 = vrot.slane %v204_v46, %v3683_v45 }
 0x1d0   :  { %916 = vmatprep.mubr.bf16.mxu1 %v3684_v0 }
 0x1d1   :  { %v3260_v55 = vrot.slane %v204_v46, %v3682_v48 }
 0x1d7   :  { %917 = vmatmul.mubr.bf16.gmra.mrb[4].mxu1 %v2116_v4 }
 0x1d8   :  { %926 = vmatprep.mubr.bf16.mxu1 %v3684_v0 }
 0x1df   :  { %927 = vmatmul.mubr.bf16.gmra.mrb[8].mxu1 %v2117_v60 }
 0x1e0   :  { %936 = vmatprep.mubr.bf16.mxu1 %v3684_v0 }
 0x1e7   :  { %937 = vmatmul.mubr.bf16.gmra.mrb[12].mxu1 %v2118_v61 }
 0x1e8   :  { %946 = vmatprep.mubr.bf16.mxu1 %v3684_v0 }
 0x1ef   :  { %947 = vmatmul.mubr.bf16.gmra.mrb[16].mxu1 %v2119_v5 }
 0x1f0   :  { %956 = vmatprep.mubr.bf16.mxu1 %v3684_v0 }
 0x1f7   :  { %957 = vmatmul.mubr.bf16.gmra.mrb[20].mxu1 %v2120_v6 }
 0x1f8   :  { %966 = vmatprep.mubr.bf16.mxu1 %v3684_v0 }
 0x1ff   :  { %967 = vmatmul.mubr.bf16.gmra.mrb[24].mxu1 %v2121_v9 }
 0x200   :  { %976 = vmatprep.mubr.bf16.mxu1 %v3684_v0 }
 0x207   :  { %977 = vmatmul.mubr.bf16.gmra.mrb[28].mxu1 %v2122_v20 }
 0x208   :  { %1835 = vmatprep.mubr.bf16.mxu1 %v3684_v0 }
 0x2a2   :  { %v908_v56 = vpop.f32.mrb[0].mxu1 }
 0x2a3   :  { %v3263_v62 = vadd.f32 %v908_v56, %v3256_v49  ;;  %v910_v63 = vpop.f32.mrb[1].mxu1 }
 0x2a4   :  { %v3266_v1 = vadd.f32 %v910_v63, %v3260_v55  ;;  %v912_v2 = vpop.f32.mrb[2].mxu1 }
 0x2a5   :  { %v3269_v3 = vadd.f32 %v912_v2, %v3256_v49  ;;  %v914_v7 = vpop.f32.mrb[3].mxu1  ;;  %v987_v10 = vmax.f32 %v3263_v62, 0.0 }
 0x2a6   :  { %v3272_v8 = vadd.f32 %v914_v7, %v3260_v55  ;;  %v988_v13 = vmax.f32 %v3266_v1, 0.0 }
 0x2a7   :  { %v989_v11 = vmax.f32 %v3269_v3, 0.0  ;;  %v1409_v12 = vpack.c.bf16 %v3269_v3, %v3263_v62  ;;  %v2679_v62 = vld [vmem:[#allocation14] ss:$12 sps:$4 sm:$0xff]   ;;  %v2684_v3 = vld [vmem:[#allocation14 + $0x1c] ss:$12 sps:$4 sm:$0xff]  }
 0x2a8   :  { %v990_v14 = vmax.f32 %v3272_v8, 0.0  ;;  %v1410_v15 = vpack.c.bf16 %v3272_v8, %v3266_v1  ;;  %v2681_v1 = vld [vmem:[#allocation14 + $0x4] ss:$12 sps:$4 sm:$0xff]  }
 0x2a9   :  { %v1019_v16 = vpack.c.bf16 %v989_v11, %v987_v10  ;;  %1803 = vmatprep.subr.bf16.mxu1 %v2681_v1 }
 0x2aa   :  { %v918_v17 = vpop.f32.mrb[4].mxu1  ;;  %v1020_v18 = vpack.c.bf16 %v990_v14, %v988_v13  ;;  %1804 = vmatpush1.bf16.msra.mxu1 %v2679_v62 }
 0x2ab   :  { %v3283_v19 = vadd.f32 %v918_v17, %v3256_v49  ;;  %v920_v22 = vpop.f32.mrb[5].mxu1  ;;  %1805 = vmatprep.subr.bf16.mxu1 %v2684_v3  ;;  %v3693_v3 = vmov 0  }
 0x2ac   :  { %v3286_v26 = vadd.f32 %v920_v22, %v3260_v55  ;;  %v922_v27 = vpop.f32.mrb[6].mxu1  ;;  %1169 = vmatprep.mubr.bf16.mxu0 %v1020_v18 }
 0x2ad   :  { %v3289_v28 = vadd.f32 %v922_v27, %v3256_v49  ;;  %v924_v29 = vpop.f32.mrb[7].mxu1  ;;  %1170 = vmatmul.mubr.bf16.vlgmr.msra.gmra.mrb[16].mxu0 %v1019_v16  ;;  %v991_v31 = vmax.f32 %v3283_v19, 0.0 }
 0x2ae   :  { %v3292_v30 = vadd.f32 %v924_v29, %v3260_v55  ;;  %2414 = vmatpush3.bf16.msra.mxu0 %v2655_v35  ;;  %v992_v39 = vmax.f32 %v3286_v26, 0.0 }
 0x2af   :  { %v993_v32 = vmax.f32 %v3289_v28, 0.0  ;;  %v1411_v33 = vpack.c.bf16 %v3289_v28, %v3283_v19  ;;  %2415 = vmatprep.subr.bf16.mxu0 %v2656_v23  ;;  %v2685_v28 = vld [vmem:[#allocation14 + $0x30] ss:$12 sps:$4 sm:$0xff]  }
 0x2b0   :  { %v994_v40 = vmax.f32 %v3292_v30, 0.0  ;;  %v1412_v41 = vpack.c.bf16 %v3292_v30, %v3286_v26  ;;  %v2687_v30 = vld [vmem:[#allocation14 + $0x34] ss:$12 sps:$4 sm:$0xff]  }
 0x2b1   :  { %v1021_v42 = vpack.c.bf16 %v993_v32, %v991_v31 }
 0x2b2   :  { %v928_v43 = vpop.f32.mrb[8].mxu1  ;;  %v1022_v44 = vpack.c.bf16 %v994_v40, %v992_v39  ;;  %2416 = vmatpush3.bf16.msra.mxu0 %v2656_v23 }
 0x2b3   :  { %v3303_v47 = vadd.f32 %v928_v43, %v3256_v49  ;;  %v930_v50 = vpop.f32.mrb[9].mxu1  ;;  %2417 = vmatprep.subr.bf16.mxu0 %v2657_v36 }
 0x2b4   :  { %v3306_v51 = vadd.f32 %v930_v50, %v3260_v55  ;;  %v932_v52 = vpop.f32.mrb[10].mxu1  ;;  %1177 = vmatprep.mubr.bf16.mxu0 %v1022_v44 }
 0x2b5   :  { %v3309_v53 = vadd.f32 %v932_v52, %v3256_v49  ;;  %v934_v54 = vpop.f32.mrb[11].mxu1  ;;  %1178 = vmatmul.mubr.bf16.gmra.mrb[20].mxu0 %v1021_v42  ;;  %v995_v58 = vmax.f32 %v3303_v47, 0.0 }
 0x2b6   :  { %v3312_v57 = vadd.f32 %v934_v54, %v3260_v55  ;;  %2418 = vmatpush3.bf16.msra.mxu0 %v2657_v36  ;;  %v996_v60 = vmax.f32 %v3306_v51, 0.0 }
 0x2b7   :  { %v997_v59 = vmax.f32 %v3309_v53, 0.0  ;;  %v1413_v4 = vpack.c.bf16 %v3309_v53, %v3303_v47  ;;  %v2688_v47 = vld [vmem:[#allocation14 + $0x48] ss:$12 sps:$4 sm:$0xff]  }
 0x2b8   :  { %v998_v61 = vmax.f32 %v3312_v57, 0.0  ;;  %v1414_v5 = vpack.c.bf16 %v3312_v57, %v3306_v51  ;;  %v2691_v57 = vld [vmem:[#allocation14 + $0x60] ss:$12 sps:$4 sm:$0xff]  }
 0x2b9   :  { %v1023_v6 = vpack.c.bf16 %v997_v59, %v995_v58 }
 0x2ba   :  { %v938_v9 = vpop.f32.mrb[12].mxu1  ;;  %v1024_v20 = vpack.c.bf16 %v998_v61, %v996_v60 }
 0x2bb   :  { %v3323_v21 = vadd.f32 %v938_v9, %v3256_v49  ;;  %v940_v24 = vpop.f32.mrb[13].mxu1 }
 0x2bc   :  { %v3326_v25 = vadd.f32 %v940_v24, %v3260_v55  ;;  %v942_v34 = vpop.f32.mrb[14].mxu1  ;;  %1185 = vmatprep.mubr.bf16.mxu0 %v1024_v20 }
 0x2bd   :  { %v3329_v35 = vadd.f32 %v942_v34, %v3256_v49  ;;  %v944_v37 = vpop.f32.mrb[15].mxu1  ;;  %1186 = vmatmul.mubr.bf16.gmra.mrb[24].mxu0 %v1023_v6  ;;  %v999_v56 = vmax.f32 %v3323_v21, 0.0 }
 0x2be   :  { %v3332_v46 = vadd.f32 %v944_v37, %v3260_v55  ;;  %v1000_v7 = vmax.f32 %v3326_v25, 0.0 }
 0x2bf   :  { %v1001_v63 = vmax.f32 %v3329_v35, 0.0  ;;  %v1415_v2 = vpack.c.bf16 %v3329_v35, %v3323_v21  ;;  %v3491_v21 = vld [vmem:[#allocation14 + $0x8] ss:$12 sps:$4 sm:$0xff]   ;;  %v3493_v35 = vld [vmem:[#allocation14 + $0x20] ss:$12 sps:$4 sm:$0xff]  }
 0x2c0   :  { %v1002_v10 = vmax.f32 %v3332_v46, 0.0  ;;  %v1416_v11 = vpack.c.bf16 %v3332_v46, %v3326_v25  ;;  %v2694_v25 = vld [vmem:[#allocation14 + $0x78] ss:$12 sps:$4 sm:$0xff]  }
 0x2c1   :  { %v1025_v13 = vpack.c.bf16 %v1001_v63, %v999_v56  ;;  %v2665_v63 = vld [vmem:[#allocation13 + $0x48] sm:$0xff]   ;;  %v3499_v46 = vld [vmem:[#allocation14 + $0x38] ss:$12 sps:$4 sm:$0xff]  }
 0x2c2   :  { %v948_v14 = vpop.f32.mrb[16].mxu1  ;;  %v1026_v16 = vpack.c.bf16 %v1002_v10, %v1000_v7 }
 0x2c3   :  { %v3343_v17 = vadd.f32 %v948_v14, %v3256_v49  ;;  %v950_v18 = vpop.f32.mrb[17].mxu1 }
 0x2c4   :  { %v3346_v22 = vadd.f32 %v950_v18, %v3260_v55  ;;  %v952_v23 = vpop.f32.mrb[18].mxu1  ;;  %1193 = vmatprep.mubr.bf16.mxu0 %v1026_v16 }
 0x2c5   :  { %v3349_v27 = vadd.f32 %v952_v23, %v3256_v49  ;;  %v954_v29 = vpop.f32.mrb[19].mxu1  ;;  %1194 = vmatmul.mubr.bf16.gmra.mrb[28].mxu0 %v1025_v13  ;;  %v1003_v32 = vmax.f32 %v3343_v17, 0.0 }
 0x2c6   :  { %v3352_v31 = vadd.f32 %v954_v29, %v3260_v55  ;;  %v1004_v40 = vmax.f32 %v3346_v22, 0.0 }
 0x2c7   :  { %v1005_v36 = vmax.f32 %v3349_v27, 0.0  ;;  %v3686_v8 = vpack.c.bf16 %v3349_v27, %v3343_v17  ;;  %v3503_v17 = vld [vmem:[#allocation14 + $0x50] ss:$12 sps:$4 sm:$0xff]   ;;  %v2704_v27 = vld [vmem:[#allocation14 + $0xa8] ss:$12 sps:$4 sm:$0xff]  }
 0x2c8   :  { %v1006_v42 = vmax.f32 %v3352_v31, 0.0  ;;  %v1418_v43 = vpack.c.bf16 %v3352_v31, %v3346_v22  ;;  %v3507_v22 = vld [vmem:[#allocation14 + $0x68] ss:$12 sps:$4 sm:$0xff]   ;;  %v2706_v31 = vld [vmem:[#allocation14 + $0xac] ss:$12 sps:$4 sm:$0xff]  }
 0x2c9   :  { %v1027_v44 = vpack.c.bf16 %v1005_v36, %v1003_v32 }
 0x2ca   :  { %v958_v50 = vpop.f32.mrb[20].mxu1  ;;  %v1028_v52 = vpack.c.bf16 %v1006_v42, %v1004_v40 }
 0x2cb   :  { %v3363_v54 = vadd.f32 %v958_v50, %v3256_v49  ;;  %v960_v58 = vpop.f32.mrb[21].mxu1 }
 0x2cc   :  { %v3366_v59 = vadd.f32 %v960_v58, %v3260_v55  ;;  %v962_v60 = vpop.f32.mrb[22].mxu1  ;;  %1201 = vmatprep.mubr.bf16.mxu0 %v1028_v52 }
 0x2cd   :  { %v3369_v61 = vadd.f32 %v962_v60, %v3256_v49  ;;  %v964_v6 = vpop.f32.mrb[23].mxu1  ;;  %1202 = vmatmul.mubr.bf16.gmra.mrb[32].mxu0 %v1027_v44  ;;  %v1007_v20 = vmax.f32 %v3363_v54, 0.0 }
 0x2ce   :  { %v3372_v9 = vadd.f32 %v964_v6, %v3260_v55  ;;  %v1008_v37 = vmax.f32 %v3366_v59, 0.0 }
 0x2cf   :  { %v1009_v24 = vmax.f32 %v3369_v61, 0.0  ;;  %v3688_v19 = vpack.c.bf16 %v3369_v61, %v3363_v54  ;;  %v3516_v54 = vld [vmem:[#allocation14 + $0x98] ss:$12 sps:$4 sm:$0xff]  }
 0x2d0   :  { %v1010_v56 = vmax.f32 %v3372_v9, 0.0 }
 0x2d1   :  { %v1029_v7 = vpack.c.bf16 %v1009_v24, %v1007_v20 }
 0x2d2   :  { %v968_v10 = vpop.f32.mrb[24].mxu1  ;;  %v1030_v13 = vpack.c.bf16 %v1010_v56, %v1008_v37 }
 0x2d3   :  { %v3383_v14 = vadd.f32 %v968_v10, %v3256_v49  ;;  %v970_v16 = vpop.f32.mrb[25].mxu1 }
 0x2d4   :  { %v3386_v18 = vadd.f32 %v970_v16, %v3260_v55  ;;  %v972_v23 = vpop.f32.mrb[26].mxu1  ;;  %1209 = vmatprep.mubr.bf16.mxu0 %v1030_v13 }
 0x2d5   :  { %v3389_v29 = vadd.f32 %v972_v23, %v3256_v49  ;;  %v974_v32 = vpop.f32.mrb[27].mxu1  ;;  %1210 = vmatmul.mubr.bf16.gmra.mrb[36].mxu0 %v1029_v7  ;;  %v1011_v40 = vmax.f32 %v3383_v14, 0.0 }
 0x2d6   :  { %v3392_v36 = vadd.f32 %v974_v32, %v3260_v55  ;;  %v1012_v50 = vmax.f32 %v3386_v18, 0.0 }
 0x2d7   :  { %v1013_v42 = vmax.f32 %v3389_v29, 0.0 }
 0x2d8   :  { %v1014_v52 = vmax.f32 %v3392_v36, 0.0  ;;  %v3689_v26 = vpack.c.bf16 %v3392_v36, %v3386_v18 }
 0x2d9   :  { %v1031_v60 = vpack.c.bf16 %v1013_v42, %v1011_v40 }
 0x2da   :  { %v978_v6 = vpop.f32.mrb[28].mxu1  ;;  %v1032_v20 = vpack.c.bf16 %v1014_v52, %v1012_v50 }
 0x2db   :  { %v3403_v24 = vadd.f32 %v978_v6, %v3256_v49  ;;  %v980_v37 = vpop.f32.mrb[29].mxu1 }
 0x2dc   :  { %v3406_v56 = vadd.f32 %v980_v37, %v3260_v55  ;;  %v982_v7 = vpop.f32.mrb[30].mxu1  ;;  %1217 = vmatprep.mubr.bf16.mxu0 %v1032_v20  ;;  %v2660_v20 = vld [vmem:[#allocation11 + $0x28] sm:$0xff]   ;;  %v2661_v37 = vld [vmem:[#allocation11 + $0x30] sm:$0xff]  }
 0x2dd   :  { %v3409_v10 = vadd.f32 %v982_v7, %v3256_v49  ;;  %v984_v13 = vpop.f32.mrb[31].mxu1  ;;  %1218 = vmatmul.mubr.bf16.gmra.mrb[40].mxu0 %v1031_v60  ;;  %v1015_v23 = vmax.f32 %v3403_v24, 0.0  ;;  %v2659_v60 = vld [vmem:[#allocation11 + $0x20] sm:$0xff]   ;;  %v2662_v7 = vld [vmem:[#allocation11 + $0x38] sm:$0xff]  }
 0x2de   :  { %v3412_v16 = vadd.f32 %v984_v13, %v3260_v55  ;;  %v1016_v42 = vmax.f32 %v3406_v56, 0.0  ;;  %v2658_v55 = vld [vmem:[#allocation11 + $0x18] sm:$0xff]   ;;  %v2663_v13 = vld [vmem:[#allocation13 + $0x40] sm:$0xff]  }
 0x2df   :  { %v1017_v32 = vmax.f32 %v3409_v10, 0.0  ;;  %2419 = vmatprep.subr.bf16.mxu0 %v2658_v55  ;;  %v3692_v53 = vpack.c.bf16 %v3409_v10, %v3403_v24 }
 0x2e0   :  { %v1018_v50 = vmax.f32 %v3412_v16, 0.0  ;;  %2420 = vmatpush3.bf16.msra.mxu0 %v2658_v55  ;;  %v3691_v51 = vpack.c.bf16 %v3412_v16, %v3406_v56 }
 0x2e1   :  { %v1033_v52 = vpack.c.bf16 %v1017_v32, %v1015_v23  ;;  %2421 = vmatprep.subr.bf16.mxu0 %v2659_v60  ;;  %v3425_v32 = vld [vmem:[%s3675_s7] ss:$0 sm:$0xff] }
 0x2e2   :  { %v1034_v6 = vpack.c.bf16 %v1018_v50, %v1016_v42 }
 0x2e4   :  { %1225 = vmatprep.mubr.bf16.mxu0 %v1034_v6  ;;  %2422 = vmatpush3.bf16.msra.mxu0 %v2659_v60 }
 0x2e5   :  { %1226 = vmatmul.mubr.bf16.gmra.mrb[44].mxu0 %v1033_v52  ;;  %2423 = vmatprep.subr.bf16.mxu0 %v2660_v20 }
 0x2e8   :  { %2424 = vmatpush3.bf16.msra.mxu0 %v2660_v20 }
 0x2e9   :  { %2425 = vmatprep.subr.bf16.mxu0 %v2661_v37 }
 0x2ec   :  { %2426 = vmatpush3.bf16.msra.mxu0 %v2661_v37 }
 0x2ed   :  { %2427 = vmatprep.subr.bf16.mxu0 %v2662_v7 }
 0x2f0   :  { %2428 = vmatpush3.bf16.msra.mxu0 %v2662_v7 }
 0x2f1   :  { %2301 = vmatprep.subr.bf16.mxu0 %v2663_v13 }
 0x380   :  { %v2237_v23 = vpop.f32.mrb[16].mxu0 }
 0x381   :  { %v2238_v42 = vpop.f32.mrb[17].mxu0 }
 0x382   :  { %v2239_v50 = vadd.f32 %v2238_v42, %v2237_v23  ;;  %v2240_v52 = vpop.f32.mrb[18].mxu0 }
 0x383   :  { %v2241_v6 = vpop.f32.mrb[19].mxu0 }
 0x384   :  { %v1172_v55 = vadd.f32 %v2239_v50, %v3425_v32  ;;  %v2242_v60 = vadd.f32 %v2241_v6, %v2240_v52  ;;  %v2664_v6 = vld [vmem:[#allocation13] sm:$0xff]  }
 0x386   :  { %v1175_v20 = vadd.f32 %v2242_v60, %v3425_v32  ;;  %v1234_v37 = vmax.f32 %v1172_v55, 0.0 }
 0x388   :  { %v1235_v48 = vmax.f32 %v1175_v20, 0.0  ;;  %v2243_v7 = vpop.f32.mrb[20].mxu0 }
 0x389   :  { %v2244_v45 = vpop.f32.mrb[21].mxu0 }
 0x38a   :  { %v2245_v13 = vadd.f32 %v2244_v45, %v2243_v7  ;;  %v2246_v0 = vpop.f32.mrb[22].mxu0  ;;  %v1250_v40 = vpack.c.bf16 %v1235_v48, %v1234_v37  ;;  %v2666_v37 = vld [vmem:[#allocation13 + $0x8] sm:$0xff]  }
 0x38b   :  { %v2247_v49 = vpop.f32.mrb[23].mxu0 }
 0x38c   :  { %v1180_v44 = vadd.f32 %v2245_v13, %v3425_v32  ;;  %v2248_v58 = vadd.f32 %v2247_v49, %v2246_v0  ;;  %2429 = vmatprep.mubr.bf16.mxu0 %v1250_v40 }
 0x38e   :  { %v1183_v23 = vadd.f32 %v2248_v58, %v3425_v32  ;;  %v1236_v42 = vmax.f32 %v1180_v44, 0.0  ;;  %v2667_v58 = vld [vmem:[#allocation13 + $0x50] sm:$0xff]  }
 0x390   :  { %v1237_v34 = vmax.f32 %v1183_v23, 0.0  ;;  %v2249_v50 = vpop.f32.mrb[24].mxu0 }
 0x391   :  { %v2250_v52 = vpop.f32.mrb[25].mxu0 }
 0x392   :  { %v1251_v60 = vpack.c.bf16 %v1237_v34, %v1236_v42  ;;  %v2251_v55 = vadd.f32 %v2250_v52, %v2249_v50  ;;  %v2252_v20 = vpop.f32.mrb[26].mxu0  ;;  %v2668_v34 = vld [vmem:[#allocation13 + $0x10] sm:$0xff]   ;;  %v2669_v50 = vld [vmem:[#allocation13 + $0x58] sm:$0xff]  }
 0x393   :  { %v2253_v39 = vpop.f32.mrb[27].mxu0 }
 0x394   :  { %v1188_v45 = vadd.f32 %v2251_v55, %v3425_v32  ;;  %v2254_v48 = vadd.f32 %v2253_v39, %v2252_v20  ;;  %2430 = vmatmul.mubr.bf16.vlgmr.msra.gmra.mrb[48].mxu0 %v1251_v60  ;;  %v2670_v60 = vld [vmem:[#allocation13 + $0x18] sm:$0xff]   ;;  %v2671_v55 = vld [vmem:[#allocation13 + $0x60] sm:$0xff]  }
 0x395   :  { %2302 = vmatpush3.bf16.msra.mxu0 %v2664_v6 }
 0x396   :  { %v1191_v0 = vadd.f32 %v2254_v48, %v3425_v32  ;;  %2303 = vmatprep.subr.bf16.mxu0 %v2665_v63  ;;  %v1238_v44 = vmax.f32 %v1188_v45, 0.0 }
 0x398   :  { %v1239_v40 = vmax.f32 %v1191_v0, 0.0  ;;  %v2255_v49 = vpop.f32.mrb[28].mxu0  ;;  %v2672_v0 = vld [vmem:[#allocation13 + $0x20] sm:$0xff]  }
 0x399   :  { %v2256_v7 = vpop.f32.mrb[29].mxu0  ;;  %2304 = vmatpush3.bf16.msra.mxu0 %v2666_v37 }
 0x39a   :  { %v2257_v13 = vadd.f32 %v2256_v7, %v2255_v49  ;;  %v2258_v23 = vpop.f32.mrb[30].mxu0  ;;  %v1252_v42 = vpack.c.bf16 %v1239_v40, %v1238_v44  ;;  %2305 = vmatprep.subr.bf16.mxu0 %v2667_v58  ;;  %v2673_v49 = vld [vmem:[#allocation13 + $0x68] sm:$0xff]  }
 0x39b   :  { %v2259_v52 = vpop.f32.mrb[31].mxu0 }
 0x39c   :  { %v1196_v39 = vadd.f32 %v2257_v13, %v3425_v32  ;;  %v2260_v6 = vadd.f32 %v2259_v52, %v2258_v23  ;;  %2433 = vmatprep.mubr.bf16.mxu0 %v1252_v42  ;;  %v2674_v23 = vld [vmem:[#allocation13 + $0x28] sm:$0xff]  }
 0x39d   :  { %2306 = vmatpush3.bf16.msra.mxu0 %v2668_v34 }
 0x39e   :  { %v1199_v63 = vadd.f32 %v2260_v6, %v3425_v32  ;;  %2307 = vmatprep.subr.bf16.mxu0 %v2669_v50  ;;  %v1240_v20 = vmax.f32 %v1196_v39, 0.0  ;;  %v2675_v50 = vld [vmem:[#allocation13 + $0x70] sm:$0xff]  }
 0x3a0   :  { %v1241_v45 = vmax.f32 %v1199_v63, 0.0  ;;  %v2261_v48 = vpop.f32.mrb[32].mxu0  ;;  %v2676_v63 = vld [vmem:[#allocation13 + $0x30] sm:$0xff]  }
 0x3a1   :  { %v2262_v37 = vpop.f32.mrb[33].mxu0  ;;  %2308 = vmatpush3.bf16.msra.mxu0 %v2670_v60 }
 0x3a2   :  { %v2263_v44 = vadd.f32 %v2262_v37, %v2261_v48  ;;  %v2264_v58 = vpop.f32.mrb[34].mxu0  ;;  %v1253_v40 = vpack.c.bf16 %v1241_v45, %v1240_v20  ;;  %2309 = vmatprep.subr.bf16.mxu0 %v2671_v55  ;;  %v2677_v48 = vld [vmem:[#allocation13 + $0x78] sm:$0xff]  }
 0x3a3   :  { %v2265_v7 = vpop.f32.mrb[35].mxu0 }
 0x3a4   :  { %v1204_v13 = vadd.f32 %v2263_v44, %v3425_v32  ;;  %v2266_v34 = vadd.f32 %v2265_v7, %v2264_v58  ;;  %2434 = vmatmul.mubr.bf16.gmra.mrb[52].mxu0 %v1253_v40  ;;  %v2678_v58 = vld [vmem:[#allocation13 + $0x38] sm:$0xff]  }
 0x3a5   :  { %2310 = vmatpush3.bf16.msra.mxu0 %v2672_v0 }
 0x3a6   :  { %v1207_v42 = vadd.f32 %v2266_v34, %v3425_v32  ;;  %2311 = vmatprep.subr.bf16.mxu0 %v2673_v49  ;;  %v1242_v52 = vmax.f32 %v1204_v13, 0.0 }
 0x3a8   :  { %v1243_v39 = vmax.f32 %v1207_v42, 0.0  ;;  %v2267_v6 = vpop.f32.mrb[36].mxu0 }
 0x3a9   :  { %v2268_v60 = vpop.f32.mrb[37].mxu0  ;;  %2312 = vmatpush3.bf16.msra.mxu0 %v2674_v23 }
 0x3aa   :  { %v2269_v20 = vadd.f32 %v2268_v60, %v2267_v6  ;;  %v2270_v55 = vpop.f32.mrb[38].mxu0  ;;  %v1254_v45 = vpack.c.bf16 %v1243_v39, %v1242_v52  ;;  %2313 = vmatprep.subr.bf16.mxu0 %v2675_v50 }
 0x3ab   :  { %v2271_v37 = vpop.f32.mrb[39].mxu0 }
 0x3ac   :  { %v1212_v44 = vadd.f32 %v2269_v20, %v3425_v32  ;;  %v2272_v0 = vadd.f32 %v2271_v37, %v2270_v55  ;;  %2437 = vmatprep.mubr.bf16.mxu0 %v1254_v45 }
 0x3ad   :  { %2314 = vmatpush3.bf16.msra.mxu0 %v2676_v63 }
 0x3ae   :  { %v1215_v40 = vadd.f32 %v2272_v0, %v3425_v32  ;;  %2315 = vmatprep.subr.bf16.mxu0 %v2677_v48  ;;  %v1244_v49 = vmax.f32 %v1212_v44, 0.0 }
 0x3b0   :  { %v1245_v7 = vmax.f32 %v1215_v40, 0.0  ;;  %v2273_v13 = vpop.f32.mrb[40].mxu0 }
 0x3b1   :  { %v2274_v34 = vpop.f32.mrb[41].mxu0  ;;  %2316 = vmatpush3.bf16.msra.mxu0 %v2678_v58 }
 0x3b2   :  { %v2275_v23 = vadd.f32 %v2274_v34, %v2273_v13  ;;  %v2276_v42 = vpop.f32.mrb[42].mxu0  ;;  %v1255_v52 = vpack.c.bf16 %v1245_v7, %v1244_v49  ;;  %2445 = vmatprep.subr.bf16.mxu0 %v3491_v21 }
 0x3b3   :  { %v2277_v50 = vpop.f32.mrb[43].mxu0 }
 0x3b4   :  { %v1220_v39 = vadd.f32 %v2275_v23, %v3425_v32  ;;  %v2278_v6 = vadd.f32 %v2277_v50, %v2276_v42  ;;  %2438 = vmatmul.mubr.bf16.gmra.mrb[56].mxu0 %v1255_v52 }
 0x3b6   :  { %v1223_v60 = vadd.f32 %v2278_v6, %v3425_v32  ;;  %v1246_v63 = vmax.f32 %v1220_v39, 0.0  ;;  %v3545_v6 = vld [vmem:[%s3677_s9] ss:$0 sm:$0xff] }
 0x3b8   :  { %v1247_v20 = vmax.f32 %v1223_v60, 0.0  ;;  %v2279_v55 = vpop.f32.mrb[44].mxu0 }
 0x3b9   :  { %v2280_v45 = vpop.f32.mrb[45].mxu0 }
 0x3ba   :  { %v2281_v48 = vadd.f32 %v2280_v45, %v2279_v55  ;;  %v2282_v37 = vpop.f32.mrb[46].mxu0  ;;  %v1256_v44 = vpack.c.bf16 %v1247_v20, %v1246_v63 }
 0x3bb   :  { %v2283_v0 = vpop.f32.mrb[47].mxu0 }
 0x3bc   :  { %v1228_v58 = vadd.f32 %v2281_v48, %v3425_v32  ;;  %v2284_v40 = vadd.f32 %v2283_v0, %v2282_v37  ;;  %2441 = vmatprep.mubr.bf16.mxu0 %v1256_v44 }
 0x3be   :  { %v1231_v49 = vadd.f32 %v2284_v40, %v3425_v32  ;;  %v1248_v7 = vmax.f32 %v1228_v58, 0.0 }
 0x3c0   :  { %v1249_v13 = vmax.f32 %v1231_v49, 0.0 }
 0x3c2   :  { %v1257_v34 = vpack.c.bf16 %v1249_v13, %v1248_v7 }
 0x3c4   :  { %2442 = vmatmul.mubr.bf16.gmra.mrb[60].mxu0 %v1257_v34 }
 0x3c5   :  { %1553 = vmatprep.mubr.bf16.mxu0 %v1410_v15  ;;  %v3687_v15 = vpack.c.bf16 %v3372_v9, %v3366_v59  ;;  %v3520_v59 = vld [vmem:[#allocation14 + $0xb0] ss:$12 sps:$4 sm:$0xff]  }
 0x3cc   :  { %1554 = vmatmul.mubr.bf16.vlgmr.msra.gmra.mrb[64].mxu0 %v1409_v12  ;;  %v2682_v12 = vld [vmem:[#allocation14 + $0x18] ss:$12 sps:$4 sm:$0xff]  }
 0x3cd   :  { %1561 = vmatprep.mubr.bf16.mxu0 %v1412_v41  ;;  %1806 = vmatpush1.bf16.msra.mxu1 %v2682_v12  ;;  %v3690_v41 = vpack.c.bf16 %v3389_v29, %v3383_v14 }
 0x3ce   :  { %1807 = vmatprep.subr.bf16.mxu1 %v2687_v30  ;;  %2446 = vmatpush3.bf16.msra.mxu0 %v3491_v21 }
 0x3cf   :  { %2447 = vmatprep.subr.bf16.mxu0 %v3493_v35 }
 0x3d1   :  { %1808 = vmatpush1.bf16.msra.mxu1 %v2685_v28 }
 0x3d2   :  { %2448 = vmatpush3.bf16.msra.mxu0 %v3493_v35 }
 0x3d3   :  { %2449 = vmatprep.subr.bf16.mxu0 %v3499_v46 }
 0x3d4   :  { %1562 = vmatmul.mubr.bf16.gmra.mrb[68].mxu0 %v1411_v33  ;;  %v2690_v33 = vld [vmem:[#allocation14 + $0x4c] ss:$12 sps:$4 sm:$0xff]  }
 0x3d5   :  { %1569 = vmatprep.mubr.bf16.mxu0 %v1414_v5  ;;  %1809 = vmatprep.subr.bf16.mxu1 %v2690_v33  ;;  %v2696_v5 = vld [vmem:[#allocation14 + $0x7c] ss:$12 sps:$4 sm:$0xff]  }
 0x3d6   :  { %1810 = vmatpush1.bf16.msra.mxu1 %v2688_v47  ;;  %2450 = vmatpush3.bf16.msra.mxu0 %v3499_v46 }
 0x3d7   :  { %2451 = vmatprep.subr.bf16.mxu0 %v3503_v17 }
 0x3da   :  { %2452 = vmatpush3.bf16.msra.mxu0 %v3503_v17 }
 0x3db   :  { %2453 = vmatprep.subr.bf16.mxu0 %v3507_v22 }
 0x3dc   :  { %1570 = vmatmul.mubr.bf16.gmra.mrb[72].mxu0 %v1413_v4  ;;  %v2693_v4 = vld [vmem:[#allocation14 + $0x64] ss:$12 sps:$4 sm:$0xff]  }
 0x3dd   :  { %1577 = vmatprep.mubr.bf16.mxu0 %v1416_v11  ;;  %1811 = vmatprep.subr.bf16.mxu1 %v2693_v4  ;;  %v2701_v11 = vld [vmem:[#allocation14 + $0x94] ss:$12 sps:$4 sm:$0xff]  }
 0x3de   :  { %1812 = vmatpush1.bf16.msra.mxu1 %v2691_v57  ;;  %2454 = vmatpush3.bf16.msra.mxu0 %v3507_v22 }
 0x3df   :  { %1813 = vmatprep.subr.bf16.mxu1 %v2696_v5 }
 0x3e2   :  { %1814 = vmatpush1.bf16.msra.mxu1 %v2694_v25 }
 0x3e3   :  { %1815 = vmatprep.subr.bf16.mxu1 %v2701_v11 }
 0x3e4   :  { %1578 = vmatmul.mubr.bf16.gmra.mrb[76].mxu0 %v1415_v2  ;;  %v2699_v2 = vld [vmem:[#allocation14 + $0x90] ss:$12 sps:$4 sm:$0xff]  }
 0x3e5   :  { %1585 = vmatprep.mubr.bf16.mxu0 %v1418_v43  ;;  %v3511_v43 = vld [vmem:[#allocation14 + $0x80] ss:$12 sps:$4 sm:$0xff]  }
 0x3e6   :  { %1816 = vmatpush1.bf16.msra.mxu1 %v2699_v2  ;;  %2455 = vmatprep.subr.bf16.mxu0 %v3511_v43 }
 0x3e7   :  { %1817 = vmatprep.subr.bf16.mxu1 %v2706_v31  ;;  %2456 = vmatpush3.bf16.msra.mxu0 %v3511_v43 }
 0x3e8   :  { %2457 = vmatprep.subr.bf16.mxu0 %v3516_v54 }
 0x3ea   :  { %1818 = vmatpush1.bf16.msra.mxu1 %v2704_v27 }
 0x3eb   :  { %2477 = vmatprep.subr.bf16.mxu1 %v3491_v21  ;;  %2458 = vmatpush3.bf16.msra.mxu0 %v3516_v54 }
 0x3ec   :  { %1586 = vmatmul.mubr.bf16.gmra.mrb[80].mxu0 %v3686_v8  ;;  %2459 = vmatprep.subr.bf16.mxu0 %v3520_v59 }
 0x3ed   :  { %1593 = vmatprep.mubr.bf16.mxu0 %v3687_v15 }
 0x3ef   :  { %2460 = vmatpush3.bf16.msra.mxu0 %v3520_v59 }
 0x3f4   :  { %1594 = vmatmul.mubr.bf16.gmra.mrb[84].mxu0 %v3688_v19 }
 0x3f5   :  { %1601 = vmatprep.mubr.bf16.mxu0 %v3689_v26 }
 0x3fc   :  { %1602 = vmatmul.mubr.bf16.gmra.mrb[88].mxu0 %v3690_v41 }
 0x3fd   :  { %1609 = vmatprep.mubr.bf16.mxu0 %v3691_v51 }
 0x404   :  { %1610 = vmatmul.mubr.bf16.gmra.mrb[92].mxu0 %v3692_v53 }
 0x467   :  { %v2431_v61 = vpop.f32.mrb[48].mxu0 }
 0x468   :  { %v1346_v9 = vpop.f32.mrb[49].mxu0  ;;  %v1355_v13 = vadd.f32 %v2431_v61, %v3545_v6 }
 0x469   :  { %v2432_v14 = vpop.f32.mrb[50].mxu0  ;;  %v1347_v20 = vadd.f32 %v3545_v6, %v1346_v9 }
 0x46a   :  { %v1349_v18 = vpop.f32.mrb[51].mxu0  ;;  %v1358_v8 = vadd.f32 %v2432_v14, %v3545_v6 }
 0x46b   :  { %v1350_v37 = vadd.f32 %v3545_v6, %v1349_v18 }
 0x477   :  { %v2435_v29 = vpop.f32.mrb[52].mxu0 }
 0x478   :  { %v1362_v36 = vpop.f32.mrb[53].mxu0  ;;  %v1371_v2 = vadd.f32 %v2435_v29, %v3545_v6 }
 0x479   :  { %v3524_v24 = vpop.f32.mrb[54].mxu0  ;;  %v1363_v33 = vadd.f32 %v3545_v6, %v1362_v36 }
 0x47a   :  { %v1365_v56 = vpop.f32.mrb[55].mxu0  ;;  %v1374_v31 = vadd.f32 %v3524_v24, %v3545_v6 }
 0x47b   :  { %v1366_v53 = vadd.f32 %v3545_v6, %v1365_v56 }
 0x487   :  { %v3526_v10 = vpop.f32.mrb[56].mxu0 }
 0x488   :  { %v3528_v16 = vpop.f32.mrb[57].mxu0 }
 0x489   :  { %v3530_v32 = vpop.f32.mrb[58].mxu0  ;;  %v1379_v36 = vadd.f32 %v3545_v6, %v3528_v16 }
 0x48a   :  { %v3532_v23 = vpop.f32.mrb[59].mxu0 }
 0x497   :  { %v3534_v42 = vpop.f32.mrb[60].mxu0 }
 0x498   :  { %v3536_v52 = vpop.f32.mrb[61].mxu0 }
 0x499   :  { %v3538_v50 = vpop.f32.mrb[62].mxu0 }
 0x49a   :  { %v3540_v39 = vpop.f32.mrb[63].mxu0 }
 0x49f   :  { %v2317_v60 = vpop.f32.mrb[64].mxu0 }
 0x4a0   :  { %v2318_v63 = vpop.f32.mrb[65].mxu0 }
 0x4a1   :  { %v2319_v55 = vadd.f32 %v2318_v63, %v2317_v60  ;;  %v2320_v45 = vpop.f32.mrb[66].mxu0 }
 0x4a2   :  { %v2321_v48 = vpop.f32.mrb[67].mxu0 }
 0x4a3   :  { %v1556_v44 = vadd.f32 %v2319_v55, %v1347_v20  ;;  %v2322_v0 = vadd.f32 %v2321_v48, %v2320_v45  ;;  %v1387_v48 = vadd.f32 %v3526_v10, %v3545_v6 }
 0x4a5   :  { %v1559_v58 = vadd.f32 %v2322_v0, %v1350_v37 }
 0x4a7   :  { %v1618_v40 = vpack.c.bf16 %v1559_v58, %v1556_v44  ;;  %v2323_v49 = vpop.f32.mrb[68].mxu0 }
 0x4a8   :  { %v2324_v7 = vpop.f32.mrb[69].mxu0 }
 0x4a9   :  { %v2325_v34 = vadd.f32 %v2324_v7, %v2323_v49  ;;  %v2326_v62 = vpop.f32.mrb[70].mxu0  ;;  %1836 = vmatmul.mubr.bf16.vlgmr.msra.gmra.mrb[32].mxu1 %v1618_v40  ;;  %2461 = vmatprep.mubr.bf16.mxu0 %v1618_v40 }
 0x4aa   :  { %2485 = vmatpush3.bf16.msra.mxu1 %v3491_v21  ;;  %v2327_v1 = vpop.f32.mrb[71].mxu0  ;;  %1845 = vmatprep.mubr.bf16.mxu1 %v3693_v3 }
 0x4ab   :  { %v1564_v12 = vadd.f32 %v2325_v34, %v1355_v13  ;;  %v2328_v15 = vadd.f32 %v2327_v1, %v2326_v62  ;;  %2478 = vmatprep.subr.bf16.mxu1 %v3493_v35  ;;  %v1395_v13 = vadd.f32 %v3545_v6, %v3536_v52  ;;  %v1398_v1 = vadd.f32 %v3545_v6, %v3540_v39 }
 0x4ad   :  { %v1567_v19 = vadd.f32 %v2328_v15, %v1358_v8 }
 0x4ae   :  { %2486 = vmatpush3.bf16.msra.mxu1 %v3493_v35 }
 0x4af   :  { %v2329_v26 = vpop.f32.mrb[72].mxu0  ;;  %v1619_v28 = vpack.c.bf16 %v1567_v19, %v1564_v12  ;;  %2479 = vmatprep.subr.bf16.mxu1 %v3499_v46 }
 0x4b0   :  { %v2330_v30 = vpop.f32.mrb[73].mxu0 }
 0x4b1   :  { %v2331_v41 = vadd.f32 %v2330_v30, %v2329_v26  ;;  %v2332_v47 = vpop.f32.mrb[74].mxu0  ;;  %1846 = vmatmul.mubr.bf16.gmra.mrb[36].mxu1 %v1619_v28  ;;  %2462 = vmatmul.mubr.bf16.vlgmr.msra.gmra.mrb[96].mxu0 %v1619_v28  ;;  %v1403_v28 = vadd.f32 %v3534_v42, %v3545_v6  ;;  %v1658_v42 = vld [vmem:[%s3680_s12] sm:$0x7]  ;;  %s2936_s12 = smov [#allocation16]  }
 0x4b2   :  { %v2333_v51 = vpop.f32.mrb[75].mxu0  ;;  %1855 = vmatprep.mubr.bf16.mxu1 %v3693_v3  ;;  %2487 = vmatpush3.bf16.msra.mxu1 %v3499_v46  ;;  %s2066_s1 = sshll.u32 %s2936_s12, 4  ;;  %s2067_s1 = int_to_ptr.vmem [resolvable:$true] %s2066_s1 }
 0x4b3   :  { %v1572_v57 = vadd.f32 %v2331_v41, %v1363_v33  ;;  %v2334_v4 = vadd.f32 %v2333_v51, %v2332_v47  ;;  %2480 = vmatprep.subr.bf16.mxu1 %v3503_v17  ;;  %v1406_v41 = vadd.f32 %v3538_v50, %v3545_v6  ;;  %s2887_s29 = scalar_lea.vmem %s2067_s1, 6144  ;;  %p2892_p9 = scmp.lt.s32.totalorder %s2067_s1, %s2067_s1 }
 0x4b4   :  { %p2888_p8 = scmp.ne.s32.totalorder %s2067_s1, %s2887_s29  ;;  %p2893_p10 = scmp.lt.s32.totalorder %s2887_s29, %s2887_s29 }
 0x4b5   :  { %v1575_v5 = vadd.f32 %v2334_v4, %v1366_v53 }
 0x4b6   :  { %2488 = vmatpush3.bf16.msra.mxu1 %v3503_v17  ;;  %p2894_p11 = por %p2893_p10, %p2892_p9 }
 0x4b7   :  { %v2335_v21 = vpop.f32.mrb[76].mxu0  ;;  %v1620_v25 = vpack.c.bf16 %v1575_v5, %v1572_v57  ;;  %2481 = vmatprep.subr.bf16.mxu1 %v3507_v22  ;;  %v3694_v57 = vsub.s32 0, %v3247_v38 }
 0x4b8   :  { %v2336_v35 = vpop.f32.mrb[77].mxu0  ;;  %p2895_p12 = pnand %p2894_p11, %p2888_p8 }
 0x4b9   :  { %v2337_v11 = vadd.f32 %v2336_v35, %v2335_v21  ;;  %v2338_v27 = vpop.f32.mrb[78].mxu0  ;;  %1856 = vmatmul.mubr.bf16.gmra.mrb[40].mxu1 %v1620_v25  ;;  %2465 = vmatprep.mubr.bf16.mxu0 %v1620_v25  ;;  %v3599_v4 = vrot.slane %v1658_v42, %v3694_v57  ;;  %v1670_v25 = vsub.s32 2, %v3247_v38 }
 0x4ba   :  { %v2339_v46 = vpop.f32.mrb[79].mxu0  ;;  %1865 = vmatprep.mubr.bf16.mxu1 %v3693_v3  ;;  %2489 = vmatpush3.bf16.msra.mxu1 %v3507_v22 }
 0x4bb   :  { %v1580_v17 = vadd.f32 %v2337_v11, %v1371_v2  ;;  %v2340_v61 = vadd.f32 %v2339_v46, %v2338_v27  ;;  %2482 = vmatprep.subr.bf16.mxu1 %v3511_v43 }
 0x4bd   :  { %v1583_v9 = vadd.f32 %v2340_v61, %v1374_v31  ;;  %v3610_v31 = vrot.slane %v1658_v42, %v1670_v25 }
 0x4be   :  { %2490 = vmatpush3.bf16.msra.mxu1 %v3511_v43  ;;  %v1382_v43 = vadd.f32 %v3545_v6, %v3532_v23  ;;  %v1390_v23 = vadd.f32 %v3530_v32, %v3545_v6 }
 0x4bf   :  { %v2341_v14 = vpop.f32.mrb[80].mxu0  ;;  %v1621_v18 = vpack.c.bf16 %v1583_v9, %v1580_v17  ;;  %2483 = vmatprep.subr.bf16.mxu1 %v3516_v54 }
 0x4c0   :  { %v2342_v29 = vpop.f32.mrb[81].mxu0 }
 0x4c1   :  { %v2343_v56 = vadd.f32 %v2342_v29, %v2341_v14  ;;  %v2344_v22 = vpop.f32.mrb[82].mxu0  ;;  %1866 = vmatmul.mubr.bf16.gmra.mrb[44].mxu1 %v1621_v18  ;;  %2466 = vmatmul.mubr.bf16.gmra.mrb[100].mxu0 %v1621_v18 }
 0x4c2   :  { %v2345_v24 = vpop.f32.mrb[83].mxu0  ;;  %1875 = vmatprep.mubr.bf16.mxu1 %v3693_v3  ;;  %2491 = vmatpush3.bf16.msra.mxu1 %v3516_v54 }
 0x4c3   :  { %v1588_v60 = vadd.f32 %v2343_v56, %v1379_v36  ;;  %v2346_v63 = vadd.f32 %v2345_v24, %v2344_v22  ;;  %2484 = vmatprep.subr.bf16.mxu1 %v3520_v59 }
 0x4c5   :  { %v1591_v20 = vadd.f32 %v2346_v63, %v1382_v43 }
 0x4c6   :  { %2492 = vmatpush3.bf16.msra.mxu1 %v3520_v59 }
 0x4c7   :  { %v2347_v16 = vpop.f32.mrb[84].mxu0  ;;  %v1622_v55 = vpack.c.bf16 %v1591_v20, %v1588_v60 }
 0x4c8   :  { %v2348_v45 = vpop.f32.mrb[85].mxu0 }
 0x4c9   :  { %v2349_v37 = vadd.f32 %v2348_v45, %v2347_v16  ;;  %v2350_v44 = vpop.f32.mrb[86].mxu0  ;;  %1876 = vmatmul.mubr.bf16.gmra.mrb[48].mxu1 %v1622_v55 }
 0x4ca   :  { %v2351_v54 = vpop.f32.mrb[87].mxu0  ;;  %1885 = vmatprep.mubr.bf16.mxu1 %v3693_v3 }
 0x4cb   :  { %v1596_v0 = vadd.f32 %v2349_v37, %v1387_v48  ;;  %v2352_v58 = vadd.f32 %v2351_v54, %v2350_v44 }
 0x4cd   :  { %v1599_v40 = vadd.f32 %v2352_v58, %v1390_v23 }
 0x4cf   :  { %v2353_v49 = vpop.f32.mrb[88].mxu0  ;;  %v1623_v59 = vpack.c.bf16 %v1599_v40, %v1596_v0 }
 0x4d0   :  { %v2354_v7 = vpop.f32.mrb[89].mxu0 }
 0x4d1   :  { %v2355_v34 = vadd.f32 %v2354_v7, %v2353_v49  ;;  %v2356_v10 = vpop.f32.mrb[90].mxu0  ;;  %1886 = vmatmul.mubr.bf16.gmra.mrb[52].mxu1 %v1623_v59 }
 0x4d2   :  { %v2357_v62 = vpop.f32.mrb[91].mxu0  ;;  %1895 = vmatprep.mubr.bf16.mxu1 %v3693_v3 }
 0x4d3   :  { %v1604_v8 = vadd.f32 %v2355_v34, %v1395_v13  ;;  %v2358_v32 = vadd.f32 %v2357_v62, %v2356_v10 }
 0x4d5   :  { %v1607_v12 = vadd.f32 %v2358_v32, %v1398_v1 }
 0x4d7   :  { %v2359_v15 = vpop.f32.mrb[92].mxu0  ;;  %v1624_v19 = vpack.c.bf16 %v1607_v12, %v1604_v8 }
 0x4d8   :  { %v2360_v26 = vpop.f32.mrb[93].mxu0 }
 0x4d9   :  { %v2361_v30 = vadd.f32 %v2360_v26, %v2359_v15  ;;  %v2362_v52 = vpop.f32.mrb[94].mxu0  ;;  %1896 = vmatmul.mubr.bf16.gmra.mrb[56].mxu1 %v1624_v19 }
 0x4da   :  { %v2363_v33 = vpop.f32.mrb[95].mxu0  ;;  %1905 = vmatprep.mubr.bf16.mxu1 %v3693_v3  ;;  %v3695_v3 = vsub.s32 1, %v3247_v38 }
 0x4db   :  { %v1612_v47 = vadd.f32 %v2361_v30, %v1403_v28  ;;  %v2364_v39 = vadd.f32 %v2363_v33, %v2362_v52 }
 0x4dc   :  { %v3603_v50 = vrot.slane %v1658_v42, %v3695_v3 }
 0x4dd   :  { %v1615_v51 = vadd.f32 %v2364_v39, %v1406_v41 }
 0x4df   :  { %v1625_v53 = vpack.c.bf16 %v1615_v51, %v1612_v47 }
 0x4e1   :  { %1906 = vmatmul.mubr.bf16.gmra.mrb[60].mxu1 %v1625_v53 }
 0x4e2   :  { %2469 = vmatprep.mubr.bf16.mxu1 %v1622_v55 }
 0x4e9   :  { %2470 = vmatmul.mubr.bf16.vlgmr.msra.gmra.mrb[64].mxu1 %v1623_v59 }
 0x4ea   :  { %2473 = vmatprep.mubr.bf16.mxu1 %v1624_v19 }
 0x4f1   :  { %2474 = vmatmul.mubr.bf16.gmra.mrb[68].mxu1 %v1625_v53 }
 0x57c   :  { %v1837_v6 = vpop.f32.mrb[32].mxu1 }
 0x57d   :  { %v1838_v5 = vadd.f32 %v1837_v6, %v3599_v4  ;;  %v1839_v21 = vpop.f32.mrb[33].mxu1 }
 0x57e   :  { %v1840_v35 = vadd.f32 %v1839_v21, %v3603_v50  ;;  %v1841_v2 = vpop.f32.mrb[34].mxu1 }
 0x57f   :  { %2013 = vst [vmem:[#allocation16] sm:$0xff] %v1838_v5  ;;  %v1842_v11 = vadd.f32 %v1841_v2, %v3599_v4  ;;  %v1843_v27 = vpop.f32.mrb[35].mxu1 }
 0x580   :  { %2014 = vst [vmem:[#allocation16 + $0x8] sm:$0xff] %v1840_v35  ;;  %v1844_v46 = vadd.f32 %v1843_v27, %v3603_v50 }
 0x581   :  { %2016 = vst [vmem:[#allocation16 + $0x18] sm:$0xff] %v1842_v11 }
 0x582   :  { %2017 = vst [vmem:[#allocation16 + $0x20] sm:$0xff] %v1844_v46 }
 0x584   :  { %v1847_v17 = vpop.f32.mrb[36].mxu1  ;;  %v2463_v61 = vpop.f32.mrb[96].mxu0 }
 0x585   :  { %v1848_v9 = vadd.f32 %v1847_v17, %v3599_v4  ;;  %v1959_v38 = vadd.f32 %v2463_v61, %v3610_v31  ;;  %v1849_v14 = vpop.f32.mrb[37].mxu1  ;;  %v1950_v18 = vpop.f32.mrb[97].mxu0 }
 0x586   :  { %v1850_v29 = vadd.f32 %v1849_v14, %v3603_v50  ;;  %v1951_v36 = vadd.f32 %v1950_v18, %v3610_v31  ;;  %v1851_v56 = vpop.f32.mrb[38].mxu1  ;;  %v2464_v22 = vpop.f32.mrb[98].mxu0 }
 0x587   :  { %2019 = vst [vmem:[#allocation16 + $0x30] sm:$0xff] %v1848_v9  ;;  %2021 = vst [vmem:[#allocation16 + $0x40] sm:$0xff] %v1959_v38  ;;  %v1852_v24 = vadd.f32 %v1851_v56, %v3599_v4  ;;  %v1962_v43 = vadd.f32 %v2464_v22, %v3610_v31  ;;  %v1853_v60 = vpop.f32.mrb[39].mxu1  ;;  %v1953_v63 = vpop.f32.mrb[99].mxu0 }
 0x588   :  { %2020 = vst [vmem:[#allocation16 + $0x38] sm:$0xff] %v1850_v29  ;;  %2015 = vst [vmem:[#allocation16 + $0x10] sm:$0xff] %v1951_v36  ;;  %v1854_v20 = vadd.f32 %v1853_v60, %v3603_v50  ;;  %v1954_v16 = vadd.f32 %v1953_v63, %v3610_v31 }
 0x589   :  { %2022 = vst [vmem:[#allocation16 + $0x48] sm:$0xff] %v1852_v24  ;;  %2024 = vst [vmem:[#allocation16 + $0x58] sm:$0xff] %v1962_v43 }
 0x58a   :  { %2023 = vst [vmem:[#allocation16 + $0x50] sm:$0xff] %v1854_v20  ;;  %2018 = vst [vmem:[#allocation16 + $0x28] sm:$0xff] %v1954_v16 }
 0x58c   :  { %v1857_v55 = vpop.f32.mrb[40].mxu1 }
 0x58d   :  { %v1858_v45 = vadd.f32 %v1857_v55, %v3599_v4  ;;  %v1859_v48 = vpop.f32.mrb[41].mxu1 }
 0x58e   :  { %v1860_v37 = vadd.f32 %v1859_v48, %v3603_v50  ;;  %v1861_v44 = vpop.f32.mrb[42].mxu1 }
 0x58f   :  { %2025 = vst [vmem:[#allocation16 + $0x60] sm:$0xff] %v1858_v45  ;;  %v1862_v54 = vadd.f32 %v1861_v44, %v3599_v4  ;;  %v1863_v23 = vpop.f32.mrb[43].mxu1 }
 0x590   :  { %2026 = vst [vmem:[#allocation16 + $0x68] sm:$0xff] %v1860_v37  ;;  %v1864_v0 = vadd.f32 %v1863_v23, %v3603_v50 }
 0x591   :  { %2028 = vst [vmem:[#allocation16 + $0x78] sm:$0xff] %v1862_v54 }
 0x592   :  { %2029 = vst [vmem:[#allocation16 + $0x80] sm:$0xff] %v1864_v0 }
 0x594   :  { %v1867_v58 = vpop.f32.mrb[44].mxu1  ;;  %v2467_v40 = vpop.f32.mrb[100].mxu0 }
 0x595   :  { %v1868_v49 = vadd.f32 %v1867_v58, %v3599_v4  ;;  %v1975_v59 = vadd.f32 %v2467_v40, %v3610_v31  ;;  %v1869_v7 = vpop.f32.mrb[45].mxu1  ;;  %v1966_v13 = vpop.f32.mrb[101].mxu0 }
 0x596   :  { %v1870_v34 = vadd.f32 %v1869_v7, %v3603_v50  ;;  %v1967_v10 = vadd.f32 %v1966_v13, %v3610_v31  ;;  %v1871_v62 = vpop.f32.mrb[46].mxu1  ;;  %v2468_v1 = vpop.f32.mrb[102].mxu0 }
 0x597   :  { %2031 = vst [vmem:[#allocation16 + $0x90] sm:$0xff] %v1868_v49  ;;  %2033 = vst [vmem:[#allocation16 + $0xa0] sm:$0xff] %v1975_v59  ;;  %v1872_v8 = vadd.f32 %v1871_v62, %v3599_v4  ;;  %v1978_v32 = vadd.f32 %v2468_v1, %v3610_v31  ;;  %v1873_v12 = vpop.f32.mrb[47].mxu1  ;;  %v1969_v15 = vpop.f32.mrb[103].mxu0 }
 0x598   :  { %2032 = vst [vmem:[#allocation16 + $0x98] sm:$0xff] %v1870_v34  ;;  %2027 = vst [vmem:[#allocation16 + $0x70] sm:$0xff] %v1967_v10  ;;  %v1874_v19 = vadd.f32 %v1873_v12, %v3603_v50  ;;  %v1970_v26 = vadd.f32 %v1969_v15, %v3610_v31 }
 0x599   :  { %2034 = vst [vmem:[#allocation16 + $0xa8] sm:$0xff] %v1872_v8  ;;  %2036 = vst [vmem:[#allocation16 + $0xb8] sm:$0xff] %v1978_v32 }
 0x59a   :  { %2035 = vst [vmem:[#allocation16 + $0xb0] sm:$0xff] %v1874_v19  ;;  %2030 = vst [vmem:[#allocation16 + $0x88] sm:$0xff] %v1970_v26 }
 0x59c   :  { %v1877_v28 = vpop.f32.mrb[48].mxu1 }
 0x59d   :  { %v1878_v30 = vadd.f32 %v1877_v28, %v3599_v4  ;;  %v1879_v52 = vpop.f32.mrb[49].mxu1 }
 0x59e   :  { %v1880_v33 = vadd.f32 %v1879_v52, %v3603_v50  ;;  %v1881_v41 = vpop.f32.mrb[50].mxu1 }
 0x59f   :  { %2037 = vst [vmem:[#allocation16 + $0xc0] sm:$0xff] %v1878_v30  ;;  %v1882_v47 = vadd.f32 %v1881_v41, %v3599_v4  ;;  %v1883_v39 = vpop.f32.mrb[51].mxu1 }
 0x5a0   :  { %2038 = vst [vmem:[#allocation16 + $0xc8] sm:$0xff] %v1880_v33  ;;  %v1884_v51 = vadd.f32 %v1883_v39, %v3603_v50 }
 0x5a1   :  { %2040 = vst [vmem:[#allocation16 + $0xd8] sm:$0xff] %v1882_v47 }
 0x5a2   :  { %2041 = vst [vmem:[#allocation16 + $0xe0] sm:$0xff] %v1884_v51 }
 0x5a4   :  { %v1887_v53 = vpop.f32.mrb[52].mxu1 }
 0x5a5   :  { %v1888_v42 = vadd.f32 %v1887_v53, %v3599_v4  ;;  %v1889_v57 = vpop.f32.mrb[53].mxu1 }
 0x5a6   :  { %v1890_v3 = vadd.f32 %v1889_v57, %v3603_v50  ;;  %v1891_v6 = vpop.f32.mrb[54].mxu1 }
 0x5a7   :  { %2043 = vst [vmem:[#allocation16 + $0xf0] sm:$0xff] %v1888_v42  ;;  %v1892_v5 = vadd.f32 %v1891_v6, %v3599_v4  ;;  %v1893_v21 = vpop.f32.mrb[55].mxu1 }
 0x5a8   :  { %2044 = vst [vmem:[#allocation16 + $0xf8] sm:$0xff] %v1890_v3  ;;  %v1894_v25 = vadd.f32 %v1893_v21, %v3603_v50 }
 0x5a9   :  { %2046 = vst [vmem:[#allocation16 + $0x108] sm:$0xff] %v1892_v5 }
 0x5aa   :  { %2047 = vst [vmem:[#allocation16 + $0x110] sm:$0xff] %v1894_v25 }
 0x5ac   :  { %v1897_v35 = vpop.f32.mrb[56].mxu1 }
 0x5ad   :  { %v1898_v2 = vadd.f32 %v1897_v35, %v3599_v4  ;;  %v1899_v11 = vpop.f32.mrb[57].mxu1 }
 0x5ae   :  { %v1900_v27 = vadd.f32 %v1899_v11, %v3603_v50  ;;  %v1901_v46 = vpop.f32.mrb[58].mxu1 }
 0x5af   :  { %2049 = vst [vmem:[#allocation16 + $0x120] sm:$0xff] %v1898_v2  ;;  %v1902_v17 = vadd.f32 %v1901_v46, %v3599_v4  ;;  %v1903_v61 = vpop.f32.mrb[59].mxu1 }
 0x5b0   :  { %2050 = vst [vmem:[#allocation16 + $0x128] sm:$0xff] %v1900_v27  ;;  %v1904_v9 = vadd.f32 %v1903_v61, %v3603_v50 }
 0x5b1   :  { %2052 = vst [vmem:[#allocation16 + $0x138] sm:$0xff] %v1902_v17 }
 0x5b2   :  { %2053 = vst [vmem:[#allocation16 + $0x140] sm:$0xff] %v1904_v9 }
 0x5b4   :  { %v1907_v38 = vpop.f32.mrb[60].mxu1 }
 0x5b5   :  { %v1908_v14 = vadd.f32 %v1907_v38, %v3599_v4  ;;  %v1909_v18 = vpop.f32.mrb[61].mxu1 }
 0x5b6   :  { %v1910_v29 = vadd.f32 %v1909_v18, %v3603_v50  ;;  %v1911_v36 = vpop.f32.mrb[62].mxu1 }
 0x5b7   :  { %2055 = vst [vmem:[#allocation16 + $0x150] sm:$0xff] %v1908_v14  ;;  %v1912_v56 = vadd.f32 %v1911_v36, %v3599_v4  ;;  %v1913_v22 = vpop.f32.mrb[63].mxu1 }
 0x5b8   :  { %2056 = vst [vmem:[#allocation16 + $0x158] sm:$0xff] %v1910_v29  ;;  %v1914_v24 = vadd.f32 %v1913_v22, %v3603_v50 }
 0x5b9   :  { %2058 = vst [vmem:[#allocation16 + $0x168] sm:$0xff] %v1912_v56 }
 0x5ba   :  { %2059 = vst [vmem:[#allocation16 + $0x170] sm:$0xff] %v1914_v24 }
 0x5bc   :  { %v2471_v43 = vpop.f32.mrb[64].mxu1 }
 0x5bd   :  { %v1991_v60 = vadd.f32 %v2471_v43, %v3610_v31  ;;  %v1982_v63 = vpop.f32.mrb[65].mxu1 }
 0x5be   :  { %v1983_v20 = vadd.f32 %v1982_v63, %v3610_v31  ;;  %v2472_v16 = vpop.f32.mrb[66].mxu1 }
 0x5bf   :  { %2045 = vst [vmem:[#allocation16 + $0x100] sm:$0xff] %v1991_v60  ;;  %v1994_v55 = vadd.f32 %v2472_v16, %v3610_v31  ;;  %v1985_v45 = vpop.f32.mrb[67].mxu1 }
 0x5c0   :  { %2039 = vst [vmem:[#allocation16 + $0xd0] sm:$0xff] %v1983_v20  ;;  %v1986_v4 = vadd.f32 %v1985_v45, %v3610_v31 }
 0x5c1   :  { %2048 = vst [vmem:[#allocation16 + $0x118] sm:$0xff] %v1994_v55 }
 0x5c2   :  { %2042 = vst [vmem:[#allocation16 + $0xe8] sm:$0xff] %v1986_v4 }
 0x5c4   :  { %v2475_v48 = vpop.f32.mrb[68].mxu1 }
 0x5c5   :  { %v2007_v50 = vadd.f32 %v2475_v48, %v3610_v31  ;;  %v1998_v37 = vpop.f32.mrb[69].mxu1 }
 0x5c6   :  { %v1999_v44 = vadd.f32 %v1998_v37, %v3610_v31  ;;  %v2476_v54 = vpop.f32.mrb[70].mxu1 }
 0x5c7   :  { %2057 = vst [vmem:[#allocation16 + $0x160] sm:$0xff] %v2007_v50  ;;  %v2010_v23 = vadd.f32 %v2476_v54, %v3610_v31  ;;  %v2001_v0 = vpop.f32.mrb[71].mxu1 }
 0x5c8   :  { %2051 = vst [vmem:[#allocation16 + $0x130] sm:$0xff] %v1999_v44  ;;  %v2002_v58 = vadd.f32 %v2001_v0, %v3610_v31 }
 0x5c9   :  { %2060 = vst [vmem:[#allocation16 + $0x178] sm:$0xff] %v2010_v23 }
 0x5ca   :  { %2054 = vst [vmem:[#allocation16 + $0x148] sm:$0xff] %v2002_v58 }
 0x5cb   :  { %2898 = shalt.err (!%p2895_p12)
}
 0x5cc   :  { %s2899_s30 = scalar_lea.hbm %s3681_s13, 6144 }
 0x5cd   :  { %p2900_p13 = scmp.ne.s32.totalorder %s3681_s13, %s2899_s30  ;;  %p2903_p0 = scmp.lt.u32.totalorder %s2899_s30, %s3681_s13 }
 0x5cf   :  { %p2905_p1 = pnand %p2903_p0, %p2900_p13 }
 0x5d1   :  { %2908 = shalt.err (!%p2905_p1)
}
 0x5d2   :  { %s2937_s16 = smov 384   ;;  %s2938_s20 = smov 24  }
 0x5d3   :  { %2072 = dma.vmem_to_hbm [thread:$0]  %s2067_s1, 6144, %s3681_s13, [#allocation4], %s2937_s16, %s2937_s16, %s2938_s20  }
 0x5d4   :  { %2919 = dma.done.wait [#allocation4], 6144  }
 0x5d5   :  { %2920 = vsyncadd [#allocation4], 4294961152 }
 0x5d6   :  { %2076 = vsyncpa [#allocation3], 1 }
 0x5d7   :  { %2077 = vsyncpa [#allocation6], 1 }
 0x5d8   :  { %2078 = vsyncpa [#allocation9], 1 }
 0x5d9   :  { %2079 = vsyncpa [#allocation12], 1 }
 0x5da   :  { %2080 = vsyncpa [#allocation15], 1 }
 0x5db   :  { %2081 = vsyncpa [#allocation4], 1 }

</bundles_post_ra>
